<compile_context>
chip_gen: v7x
topology: tpu7x:2x2x1
jax: 0.10.0
libtpu: 0.0.40
codegen_flags: <defaults>
</compile_context>

<pallas_src>
import functools

import jax
import jax.numpy as jnp
from jax.experimental import pallas as pl
from jax.experimental.pallas import tpu as pltpu


def _spatial_attn_kernel(w_ref, x_ref, o_ref, sum_ref, max_ref, pp_ref,
                         *, K: int, H: int, W: int, SUB: int):
    # w_ref  : SMEM (2*K*K,) f32       conv weight, (map, ky, kx) flattened;
    #                                  map 0 (avg branch) pre-scaled by 1/C.
    # x_ref  : VMEM (Bt, Ct, H*W)      batch/channel tile, lane-dense.
    # o_ref  : VMEM (Bt, 1, H, W)      attention map output.
    # sum_ref: VMEM (Bt, SUB, H*W) f32 running sublane-partial channel sums.
    # max_ref: VMEM (Bt, SUB, H*W) f32 running sublane-partial channel maxes.
    # pp_ref : VMEM (2, Hp, Wpad) f32  zero-padded pooled maps (sum, max).
    pad = K // 2
    Bt, Ct, _HW = x_ref.shape
    G = Ct // SUB

    c_idx = pl.program_id(1)
    n_c = pl.num_programs(1)

    # ---- per-step partial reduce (VPU only when SUB > 1; no full f32 block) ----
    if SUB == 1:
        xf = x_ref[...].astype(jnp.float32)              # (Bt, Ct, HW)
        psum = jnp.sum(xf, axis=1, keepdims=True)        # (Bt, 1, HW)
        pmax = jnp.max(xf, axis=1, keepdims=True)
    else:
        blk = x_ref[:, 0:SUB, :].astype(jnp.float32)     # (Bt, SUB, HW)
        psum, pmax = blk, blk
        for g in range(1, G):                            # sublane-aligned slices
            blk = x_ref[:, g * SUB:(g + 1) * SUB, :].astype(jnp.float32)
            psum = psum + blk
            pmax = jnp.maximum(pmax, blk)

    @pl.when(c_idx == 0)
    def _init():
        sum_ref[...] = psum                              # first tile: plain assign
        max_ref[...] = pmax                              # (no -inf init needed)

    @pl.when(c_idx > 0)
    def _accumulate():
        sum_ref[...] = sum_ref[...] + psum
        max_ref[...] = jnp.maximum(max_ref[...], pmax)

    @pl.when(c_idx == n_c - 1)
    def _finalize():
        # Zero the padded scratch once; the interior is rewritten per batch elem.
        pp_ref[...] = jnp.zeros_like(pp_ref)
        for b in range(Bt):
            # Single cross-sublane (XLU) reduce of the partial rows, once.
            tot = (jnp.sum(sum_ref[b], axis=0, keepdims=True),   # (1, HW) sum
                   jnp.max(max_ref[b], axis=0, keepdims=True))   # (1, HW) max
            # Scatter finished pooled rows into the zero-padded interior
            # (== Conv2d padding=K//2 applied to the pooled maps).
            for m in range(2):
                for y in range(H):
                    pp_ref[m, pad + y, pad:pad + W] = tot[m][0, y * W:(y + 1) * W]

            # 2*K*K-tap unrolled conv: dy slice hoisted out of the dx loop,
            # 4 partial accumulators (pooled map x dx parity) for VALU ILP.
            accs = [jnp.zeros((H, W), jnp.float32) for _ in range(4)]
            for m in range(2):                           # 0: avg (1/C in w), 1: max
                pooled = pp_ref[m]                       # (Hp, Wpad)
                for dy in range(K):
                    rows = pooled[dy:dy + H, :]          # one sublane slice per dy
                    for dx in range(K):
                        wv = w_ref[(m * K + dy) * K + dx]        # scalar from SMEM
                        a = 2 * m + (dx & 1)
                        accs[a] = accs[a] + rows[:, dx:dx + W] * wv
            conv = (accs[0] + accs[1]) + (accs[2] + accs[3])
            o_ref[b, 0] = jax.nn.sigmoid(conv).astype(o_ref.dtype)


def _default_budget():
    """(block_target_bytes, vmem_limit_bytes), tuned per TPU generation."""
    try:
        vmem = int(pltpu.get_tpu_info().vmem_capacity_bytes)
    except Exception:
        vmem = 64 * 1024 * 1024                          # assume smallest (v7x-like)
    if vmem >= 100 * 1024 * 1024:                        # v5e / v6e: 128 MiB VMEM
        return 16 * 1024 * 1024, 64 * 1024 * 1024
    return 8 * 1024 * 1024, 44 * 1024 * 1024             # v7x: 64 MiB VMEM


def _pick_tiles(B, C, HW, itemsize, target_bytes, max_batch_tile=32):
    """Pick (Bt, Ct).  Ct is a sublane multiple or == C (keeps the (8,128) block
    rule); Bt > 1 only when the whole channel dim fits in one block, so small
    C*HW stages still get multi-MiB DMAs per grid step."""
    sub = max(8, 32 // max(1, itemsize))                 # 8 f32 / 16 bf16 / 32 i8
    chan_bytes = HW * itemsize

    if C * chan_bytes <= target_bytes or C <= sub:
        Ct = C
    else:
        cands = [d for d in range(sub, C + 1, sub)
                 if C % d == 0 and d * chan_bytes <= target_bytes]
        Ct = max(cands) if cands else C

    Bt = 1
    if Ct == C and B > 1:
        per_b = C * chan_bytes
        cands = [d for d in range(1, min(B, max_batch_tile) + 1)
                 if B % d == 0 and d * per_b <= target_bytes]
        if cands:
            Bt = max(cands)
        if B // Bt < 2:          # keep >=2 blocks on the parallel axis (megacore)
            halves = [d for d in range(1, B // 2 + 1) if B % d == 0]
            if halves:
                Bt = max(halves)
    return Bt, Ct


def spatial_attention(x: jax.Array, weight: jax.Array, kernel_size: int = 7,
                      *, channel_tile_bytes: int | None = None,
                      vmem_limit_bytes: int | None = None) -> jax.Array:
    """x: (B, C, H, W) NCHW; weight: (1, 2, K, K) Conv2d(2, 1, K, bias=False)."""
    B, C, H, W = x.shape
    K = kernel_size
    pad = K // 2
    HW = H * W
    Hp, Wp = H + 2 * pad, W + 2 * pad
    Wpad = ((Wp + 127) // 128) * 128                     # 128-lane-padded pp width

    tgt, lim = _default_budget()
    target_bytes = channel_tile_bytes if channel_tile_bytes is not None else tgt
    vmem_limit = vmem_limit_bytes if vmem_limit_bytes is not None else lim

    # Spatial flatten is a free relabel of contiguous NCHW memory.
    x_flat = x.reshape(B, C, HW)

    # Fold the 1/C mean factor into the avg-branch weights; flatten (m, ky, kx).
    w = weight.astype(jnp.float32).reshape(2, K, K)
    w = w.at[0].multiply(1.0 / C)
    w_flat = w.reshape(-1)                               # (2*K*K,)

    itemsize = jnp.dtype(x.dtype).itemsize
    Bt, Ct = _pick_tiles(B, C, HW, itemsize, target_bytes)
    nB, nC = B // Bt, C // Ct
    sub = max(8, 32 // max(1, itemsize))
    SUB = sub if Ct % sub == 0 else (8 if Ct % 8 == 0 else 1)

    kernel = functools.partial(_spatial_attn_kernel, K=K, H=H, W=W, SUB=SUB)
    cost = pl.CostEstimate(
        flops=int(B * (2 * C * HW + 2 * 2 * K * K * HW)),
        transcendentals=int(B * HW),
        bytes_accessed=int(B * C * HW * itemsize + B * HW * itemsize + 2 * K * K * 4))

    return pl.pallas_call(
        kernel,
        out_shape=jax.ShapeDtypeStruct((B, 1, H, W), x.dtype),
        grid=(nB, nC),
        in_specs=[
            pl.BlockSpec(memory_space=pltpu.MemorySpace.SMEM),      # conv weights
            pl.BlockSpec((Bt, Ct, HW), lambda b, c: (b, c, 0)),     # x tile
        ],
        out_specs=pl.BlockSpec((Bt, 1, H, W), lambda b, c: (b, 0, 0, 0)),
        scratch_shapes=[
            pltpu.VMEM((Bt, SUB, HW), jnp.float32),      # running partial sums
            pltpu.VMEM((Bt, SUB, HW), jnp.float32),      # running partial maxes
            pltpu.VMEM((2, Hp, Wpad), jnp.float32),      # zero-padded pooled maps
        ],
        compiler_params=pltpu.CompilerParams(
            dimension_semantics=("parallel", "arbitrary"),
            vmem_limit_bytes=int(vmem_limit)),
        cost_estimate=cost,
    )(w_flat, x_flat)


def _reference(x, weight, kernel_size=7):
    """Pure-JAX reference mirroring the PyTorch module."""
    pad = kernel_size // 2
    avg = jnp.mean(x, axis=1, keepdims=True)
    mx = jnp.max(x, axis=1, keepdims=True)
    pooled = jnp.concatenate([avg, mx], axis=1)          # (B, 2, H, W)
    conv = jax.lax.conv_general_dilated(
        pooled, weight, window_strides=(1, 1),
        padding=[(pad, pad), (pad, pad)],
        dimension_numbers=("NCHW", "OIHW", "NCHW"))
    return jax.nn.sigmoid(conv)


def _run_case(key, B, C, H, W, K, **kw):
    kx, kw_key = jax.random.split(key)
    x = jax.random.normal(kx, (B, C, H, W), dtype=jnp.float32)
    fan_in = 2 * K * K
    bound = 1.0 / jnp.sqrt(fan_in)
    weight = jax.random.uniform(kw_key, (1, 2, K, K), jnp.float32, -bound, bound)

    out = jax.block_until_ready(spatial_attention(x, weight, kernel_size=K, **kw))
    ref = _reference(x, weight, kernel_size=K)
    assert out.shape == (B, 1, H, W), out.shape
    assert jnp.allclose(out, ref, atol=1e-5, rtol=1e-5), (
        (B, C, H, W), float(jnp.max(jnp.abs(out - ref))))


if __name__ == "__main__":
    key = jax.random.PRNGKey(0)
    k1, k2, k3 = jax.random.split(key, 3)

    # Case 1: small C (single channel step, SUB=1 path), B-parallel grid.
    _run_case(k1, B=2, C=4, H=16, W=16, K=7)
    # Case 2: force Ct=8 < C=32 -> exercises the accumulate branch, cross-tile
    # max and the SUB=8 sublane-partial accumulators.
    _run_case(k2, B=2, C=32, H=16, W=16, K=7, channel_tile_bytes=8 * 1024)
    # Case 3: small per-batch payload -> batch tiling (Bt=2) in one grid step.
    _run_case(k3, B=4, C=8, H=8, W=8, K=7)

    print("KERNEL_OK")
</pallas_src>

<mosaic_0001>
module attributes {stable_mosaic.version = 11 : i64} {
  func.func @_spatial_attn_kernel(%arg0: i32, %arg1: i32, %arg2: memref<98xf32, #tpu.memory_space<smem>>, %arg3: memref<1x4x256xf32, #tpu.memory_space<vmem>>, %arg4: memref<1x1x16x16xf32, #tpu.memory_space<vmem>>, %arg5: memref<1x1x256xf32, #tpu.memory_space<vmem>>, %arg6: memref<1x1x256xf32, #tpu.memory_space<vmem>>, %arg7: memref<2x22x128xf32, #tpu.memory_space<vmem>>) attributes {dimension_semantics = [#tpu.dimension_semantics<parallel>, #tpu.dimension_semantics<arbitrary>], iteration_bounds = array<i64: 2, 1>, scalar_prefetch = 0 : i64, scratch_operands = 3 : i64, tpu.core_type = #tpu.core_type<tc>, window_params = [{transform_indices = @transform_0, window_bounds = array<i64: 98>}, {transform_indices = @transform_1, window_bounds = array<i64: 1, 4, 256>}, {transform_indices = @transform_2, window_bounds = array<i64: 1, 1, 16, 16>}]} {
    %c0 = arith.constant 0 : index
    %c0_0 = arith.constant 0 : index
    %c0_1 = arith.constant 0 : index
    %0 = vector.load %arg3[%c0, %c0_0, %c0_1] : memref<1x4x256xf32, #tpu.memory_space<vmem>>, vector<1x4x256xf32>
    %cst = arith.constant dense<0.000000e+00> : vector<1x256xf32>
    %1 = vector.multi_reduction <add>, %0, %cst [1] : vector<1x4x256xf32> to vector<1x256xf32>
    %2 = vector.shape_cast %1 : vector<1x256xf32> to vector<1x1x256xf32>
    %cst_2 = arith.constant dense<0xFF800000> : vector<1x256xf32>
    %3 = vector.multi_reduction <maximumf>, %0, %cst_2 [1] : vector<1x4x256xf32> to vector<1x256xf32>
    %4 = vector.shape_cast %3 : vector<1x256xf32> to vector<1x1x256xf32>
    %c0_i32 = arith.constant 0 : i32
    %5 = arith.cmpi eq, %arg1, %c0_i32 : i32
    %6 = arith.extui %5 : i1 to i32
    %c0_i32_3 = arith.constant 0 : i32
    %7 = arith.cmpi ne, %6, %c0_i32_3 : i32
    scf.if %7 {
      %c0_8 = arith.constant 0 : index
      %c0_9 = arith.constant 0 : index
      %c0_10 = arith.constant 0 : index
      %14 = vector.load %arg5[%c0_8, %c0_9, %c0_10] : memref<1x1x256xf32, #tpu.memory_space<vmem>>, vector<1x1x256xf32>
      tpu.vector_store %arg5[%c0_8, %c0_9, %c0_10], %2 {strides = array<i32>} : memref<1x1x256xf32, #tpu.memory_space<vmem>>, vector<1x1x256xf32>,
      %c0_11 = arith.constant 0 : index
      %c0_12 = arith.constant 0 : index
      %c0_13 = arith.constant 0 : index
      %15 = vector.load %arg6[%c0_11, %c0_12, %c0_13] : memref<1x1x256xf32, #tpu.memory_space<vmem>>, vector<1x1x256xf32>
      tpu.vector_store %arg6[%c0_11, %c0_12, %c0_13], %4 {strides = array<i32>} : memref<1x1x256xf32, #tpu.memory_space<vmem>>, vector<1x1x256xf32>,
    } else {
    }
    %c0_i32_4 = arith.constant 0 : i32
    %8 = arith.cmpi sgt, %arg1, %c0_i32_4 : i32
    %9 = arith.extui %8 : i1 to i32
    %c0_i32_5 = arith.constant 0 : i32
    %10 = arith.cmpi ne, %9, %c0_i32_5 : i32
    scf.if %10 {
      %c0_8 = arith.constant 0 : index
      %c0_9 = arith.constant 0 : index
      %c0_10 = arith.constant 0 : index
      %14 = vector.load %arg5[%c0_8, %c0_9, %c0_10] : memref<1x1x256xf32, #tpu.memory_space<vmem>>, vector<1x1x256xf32>
      %15 = arith.addf %14, %2 : vector<1x1x256xf32>
      %c0_11 = arith.constant 0 : index
      %c0_12 = arith.constant 0 : index
      %c0_13 = arith.constant 0 : index
      %16 = vector.load %arg5[%c0_11, %c0_12, %c0_13] : memref<1x1x256xf32, #tpu.memory_space<vmem>>, vector<1x1x256xf32>
      tpu.vector_store %arg5[%c0_11, %c0_12, %c0_13], %15 {strides = array<i32>} : memref<1x1x256xf32, #tpu.memory_space<vmem>>, vector<1x1x256xf32>,
      %c0_14 = arith.constant 0 : index
      %c0_15 = arith.constant 0 : index
      %c0_16 = arith.constant 0 : index
      %17 = vector.load %arg6[%c0_14, %c0_15, %c0_16] : memref<1x1x256xf32, #tpu.memory_space<vmem>>, vector<1x1x256xf32>
      %18 = arith.maximumf %17, %4 : vector<1x1x256xf32>
      %c0_17 = arith.constant 0 : index
      %c0_18 = arith.constant 0 : index
      %c0_19 = arith.constant 0 : index
      %19 = vector.load %arg6[%c0_17, %c0_18, %c0_19] : memref<1x1x256xf32, #tpu.memory_space<vmem>>, vector<1x1x256xf32>
      tpu.vector_store %arg6[%c0_17, %c0_18, %c0_19], %18 {strides = array<i32>} : memref<1x1x256xf32, #tpu.memory_space<vmem>>, vector<1x1x256xf32>,
    } else {
    }
    %c0_i32_6 = arith.constant 0 : i32
    %11 = arith.cmpi eq, %arg1, %c0_i32_6 : i32
    %12 = arith.extui %11 : i1 to i32
    %c0_i32_7 = arith.constant 0 : i32
    %13 = arith.cmpi ne, %12, %c0_i32_7 : i32
    scf.if %13 {
      %cst_8 = arith.constant 0.000000e+00 : f32
      %14 = vector.broadcast %cst_8 : f32 to vector<2x22x128xf32>
      %c0_9 = arith.constant 0 : index
      %c0_10 = arith.constant 0 : index
      %c0_11 = arith.constant 0 : index
      %15 = vector.load %arg7[%c0_9, %c0_10, %c0_11] : memref<2x22x128xf32, #tpu.memory_space<vmem>>, vector<2x22x128xf32>
      tpu.vector_store %arg7[%c0_9, %c0_10, %c0_11], %14 {strides = array<i32>} : memref<2x22x128xf32, #tpu.memory_space<vmem>>, vector<2x22x128xf32>,
      %c0_12 = arith.constant 0 : index
      %c0_13 = arith.constant 0 : index
      %c0_14 = arith.constant 0 : index
      %16 = vector.load %arg5[%c0_12, %c0_13, %c0_14] : memref<1x1x256xf32, #tpu.memory_space<vmem>>, vector<1x1x256xf32>
      %17 = vector.shape_cast %16 : vector<1x1x256xf32> to vector<1x256xf32>
      %cst_15 = arith.constant dense<0.000000e+00> : vector<256xf32>
      %18 = vector.multi_reduction <add>, %17, %cst_15 [0] : vector<1x256xf32> to vector<256xf32>
      %19 = vector.shape_cast %18 : vector<256xf32> to vector<1x256xf32>
      %c0_16 = arith.constant 0 : index
      %c0_17 = arith.constant 0 : index
      %c0_18 = arith.constant 0 : index
      %20 = vector.load %arg6[%c0_16, %c0_17, %c0_18] : memref<1x1x256xf32, #tpu.memory_space<vmem>>, vector<1x1x256xf32>
      %21 = vector.shape_cast %20 : vector<1x1x256xf32> to vector<1x256xf32>
      %cst_19 = arith.constant dense<0xFF800000> : vector<256xf32>
      %22 = vector.multi_reduction <maximumf>, %21, %cst_19 [0] : vector<1x256xf32> to vector<256xf32>
      %23 = vector.shape_cast %22 : vector<256xf32> to vector<1x256xf32>
      %24 = vector.extract_strided_slice %19 {offsets = [0, 0], sizes = [1, 16], strides = [1, 1]} : vector<1x256xf32> to vector<1x16xf32>
      %25 = vector.shape_cast %24 : vector<1x16xf32> to vector<16xf32>
      %c0_20 = arith.constant 0 : index
      %c3 = arith.constant 3 : index
      %c3_21 = arith.constant 3 : index
      %26 = vector.load %arg7[%c0_20, %c3, %c3_21] : memref<2x22x128xf32, #tpu.memory_space<vmem>>, vector<1x1x16xf32>
      %27 = vector.shape_cast %26 : vector<1x1x16xf32> to vector<16xf32>
      %28 = vector.shape_cast %25 : vector<16xf32> to vector<1x1x16xf32>
      tpu.vector_store %arg7[%c0_20, %c3, %c3_21], %28 {strides = array<i32>} : memref<2x22x128xf32, #tpu.memory_space<vmem>>, vector<1x1x16xf32>,
      %29 = vector.extract_strided_slice %19 {offsets = [0, 16], sizes = [1, 16], strides = [1, 1]} : vector<1x256xf32> to vector<1x16xf32>
      %30 = vector.shape_cast %29 : vector<1x16xf32> to vector<16xf32>
      %c0_22 = arith.constant 0 : index
      %c4 = arith.constant 4 : index
      %c3_23 = arith.constant 3 : index
      %31 = vector.load %arg7[%c0_22, %c4, %c3_23] : memref<2x22x128xf32, #tpu.memory_space<vmem>>, vector<1x1x16xf32>
      %32 = vector.shape_cast %31 : vector<1x1x16xf32> to vector<16xf32>
      %33 = vector.shape_cast %30 : vector<16xf32> to vector<1x1x16xf32>
      tpu.vector_store %arg7[%c0_22, %c4, %c3_23], %33 {strides = array<i32>} : memref<2x22x128xf32, #tpu.memory_space<vmem>>, vector<1x1x16xf32>,
      %34 = vector.extract_strided_slice %19 {offsets = [0, 32], sizes = [1, 16], strides = [1, 1]} : vector<1x256xf32> to vector<1x16xf32>
      %35 = vector.shape_cast %34 : vector<1x16xf32> to vector<16xf32>
      %c0_24 = arith.constant 0 : index
      %c5 = arith.constant 5 : index
      %c3_25 = arith.constant 3 : index
      %36 = vector.load %arg7[%c0_24, %c5, %c3_25] : memref<2x22x128xf32, #tpu.memory_space<vmem>>, vector<1x1x16xf32>
      %37 = vector.shape_cast %36 : vector<1x1x16xf32> to vector<16xf32>
      %38 = vector.shape_cast %35 : vector<16xf32> to vector<1x1x16xf32>
      tpu.vector_store %arg7[%c0_24, %c5, %c3_25], %38 {strides = array<i32>} : memref<2x22x128xf32, #tpu.memory_space<vmem>>, vector<1x1x16xf32>,
      %39 = vector.extract_strided_slice %19 {offsets = [0, 48], sizes = [1, 16], strides = [1, 1]} : vector<1x256xf32> to vector<1x16xf32>
      %40 = vector.shape_cast %39 : vector<1x16xf32> to vector<16xf32>
      %c0_26 = arith.constant 0 : index
      %c6 = arith.constant 6 : index
      %c3_27 = arith.constant 3 : index
      %41 = vector.load %arg7[%c0_26, %c6, %c3_27] : memref<2x22x128xf32, #tpu.memory_space<vmem>>, vector<1x1x16xf32>
      %42 = vector.shape_cast %41 : vector<1x1x16xf32> to vector<16xf32>
      %43 = vector.shape_cast %40 : vector<16xf32> to vector<1x1x16xf32>
      tpu.vector_store %arg7[%c0_26, %c6, %c3_27], %43 {strides = array<i32>} : memref<2x22x128xf32, #tpu.memory_space<vmem>>, vector<1x1x16xf32>,
      %44 = vector.extract_strided_slice %19 {offsets = [0, 64], sizes = [1, 16], strides = [1, 1]} : vector<1x256xf32> to vector<1x16xf32>
      %45 = vector.shape_cast %44 : vector<1x16xf32> to vector<16xf32>
      %c0_28 = arith.constant 0 : index
      %c7 = arith.constant 7 : index
      %c3_29 = arith.constant 3 : index
      %46 = vector.load %arg7[%c0_28, %c7, %c3_29] : memref<2x22x128xf32, #tpu.memory_space<vmem>>, vector<1x1x16xf32>
      %47 = vector.shape_cast %46 : vector<1x1x16xf32> to vector<16xf32>
      %48 = vector.shape_cast %45 : vector<16xf32> to vector<1x1x16xf32>
      tpu.vector_store %arg7[%c0_28, %c7, %c3_29], %48 {strides = array<i32>} : memref<2x22x128xf32, #tpu.memory_space<vmem>>, vector<1x1x16xf32>,
      %49 = vector.extract_strided_slice %19 {offsets = [0, 80], sizes = [1, 16], strides = [1, 1]} : vector<1x256xf32> to vector<1x16xf32>
      %50 = vector.shape_cast %49 : vector<1x16xf32> to vector<16xf32>
      %c0_30 = arith.constant 0 : index
      %c8 = arith.constant 8 : index
      %c3_31 = arith.constant 3 : index
      %51 = vector.load %arg7[%c0_30, %c8, %c3_31] : memref<2x22x128xf32, #tpu.memory_space<vmem>>, vector<1x1x16xf32>
      %52 = vector.shape_cast %51 : vector<1x1x16xf32> to vector<16xf32>
      %53 = vector.shape_cast %50 : vector<16xf32> to vector<1x1x16xf32>
      tpu.vector_store %arg7[%c0_30, %c8, %c3_31], %53 {strides = array<i32>} : memref<2x22x128xf32, #tpu.memory_space<vmem>>, vector<1x1x16xf32>,
      %54 = vector.extract_strided_slice %19 {offsets = [0, 96], sizes = [1, 16], strides = [1, 1]} : vector<1x256xf32> to vector<1x16xf32>
      %55 = vector.shape_cast %54 : vector<1x16xf32> to vector<16xf32>
      %c0_32 = arith.constant 0 : index
      %c9 = arith.constant 9 : index
      %c3_33 = arith.constant 3 : index
      %56 = vector.load %arg7[%c0_32, %c9, %c3_33] : memref<2x22x128xf32, #tpu.memory_space<vmem>>, vector<1x1x16xf32>
      %57 = vector.shape_cast %56 : vector<1x1x16xf32> to vector<16xf32>
      %58 = vector.shape_cast %55 : vector<16xf32> to vector<1x1x16xf32>
      tpu.vector_store %arg7[%c0_32, %c9, %c3_33], %58 {strides = array<i32>} : memref<2x22x128xf32, #tpu.memory_space<vmem>>, vector<1x1x16xf32>,
      %59 = vector.extract_strided_slice %19 {offsets = [0, 112], sizes = [1, 16], strides = [1, 1]} : vector<1x256xf32> to vector<1x16xf32>
      %60 = vector.shape_cast %59 : vector<1x16xf32> to vector<16xf32>
      %c0_34 = arith.constant 0 : index
      %c10 = arith.constant 10 : index
      %c3_35 = arith.constant 3 : index
      %61 = vector.load %arg7[%c0_34, %c10, %c3_35] : memref<2x22x128xf32, #tpu.memory_space<vmem>>, vector<1x1x16xf32>
      %62 = vector.shape_cast %61 : vector<1x1x16xf32> to vector<16xf32>
      %63 = vector.shape_cast %60 : vector<16xf32> to vector<1x1x16xf32>
      tpu.vector_store %arg7[%c0_34, %c10, %c3_35], %63 {strides = array<i32>} : memref<2x22x128xf32, #tpu.memory_space<vmem>>, vector<1x1x16xf32>,
      %64 = vector.extract_strided_slice %19 {offsets = [0, 128], sizes = [1, 16], strides = [1, 1]} : vector<1x256xf32> to vector<1x16xf32>
      %65 = vector.shape_cast %64 : vector<1x16xf32> to vector<16xf32>
      %c0_36 = arith.constant 0 : index
      %c11 = arith.constant 11 : index
      %c3_37 = arith.constant 3 : index
      %66 = vector.load %arg7[%c0_36, %c11, %c3_37] : memref<2x22x128xf32, #tpu.memory_space<vmem>>, vector<1x1x16xf32>
      %67 = vector.shape_cast %66 : vector<1x1x16xf32> to vector<16xf32>
      %68 = vector.shape_cast %65 : vector<16xf32> to vector<1x1x16xf32>
      tpu.vector_store %arg7[%c0_36, %c11, %c3_37], %68 {strides = array<i32>} : memref<2x22x128xf32, #tpu.memory_space<vmem>>, vector<1x1x16xf32>,
      %69 = vector.extract_strided_slice %19 {offsets = [0, 144], sizes = [1, 16], strides = [1, 1]} : vector<1x256xf32> to vector<1x16xf32>
      %70 = vector.shape_cast %69 : vector<1x16xf32> to vector<16xf32>
      %c0_38 = arith.constant 0 : index
      %c12 = arith.constant 12 : index
      %c3_39 = arith.constant 3 : index
      %71 = vector.load %arg7[%c0_38, %c12, %c3_39] : memref<2x22x128xf32, #tpu.memory_space<vmem>>, vector<1x1x16xf32>
      %72 = vector.shape_cast %71 : vector<1x1x16xf32> to vector<16xf32>
      %73 = vector.shape_cast %70 : vector<16xf32> to vector<1x1x16xf32>
      tpu.vector_store %arg7[%c0_38, %c12, %c3_39], %73 {strides = array<i32>} : memref<2x22x128xf32, #tpu.memory_space<vmem>>, vector<1x1x16xf32>,
      %74 = vector.extract_strided_slice %19 {offsets = [0, 160], sizes = [1, 16], strides = [1, 1]} : vector<1x256xf32> to vector<1x16xf32>
      %75 = vector.shape_cast %74 : vector<1x16xf32> to vector<16xf32>
      %c0_40 = arith.constant 0 : index
      %c13 = arith.constant 13 : index
      %c3_41 = arith.constant 3 : index
      %76 = vector.load %arg7[%c0_40, %c13, %c3_41] : memref<2x22x128xf32, #tpu.memory_space<vmem>>, vector<1x1x16xf32>
      %77 = vector.shape_cast %76 : vector<1x1x16xf32> to vector<16xf32>
      %78 = vector.shape_cast %75 : vector<16xf32> to vector<1x1x16xf32>
      tpu.vector_store %arg7[%c0_40, %c13, %c3_41], %78 {strides = array<i32>} : memref<2x22x128xf32, #tpu.memory_space<vmem>>, vector<1x1x16xf32>,
      %79 = vector.extract_strided_slice %19 {offsets = [0, 176], sizes = [1, 16], strides = [1, 1]} : vector<1x256xf32> to vector<1x16xf32>
      %80 = vector.shape_cast %79 : vector<1x16xf32> to vector<16xf32>
      %c0_42 = arith.constant 0 : index
      %c14 = arith.constant 14 : index
      %c3_43 = arith.constant 3 : index
      %81 = vector.load %arg7[%c0_42, %c14, %c3_43] : memref<2x22x128xf32, #tpu.memory_space<vmem>>, vector<1x1x16xf32>
      %82 = vector.shape_cast %81 : vector<1x1x16xf32> to vector<16xf32>
      %83 = vector.shape_cast %80 : vector<16xf32> to vector<1x1x16xf32>
      tpu.vector_store %arg7[%c0_42, %c14, %c3_43], %83 {strides = array<i32>} : memref<2x22x128xf32, #tpu.memory_space<vmem>>, vector<1x1x16xf32>,
      %84 = vector.extract_strided_slice %19 {offsets = [0, 192], sizes = [1, 16], strides = [1, 1]} : vector<1x256xf32> to vector<1x16xf32>
      %85 = vector.shape_cast %84 : vector<1x16xf32> to vector<16xf32>
      %c0_44 = arith.constant 0 : index
      %c15 = arith.constant 15 : index
      %c3_45 = arith.constant 3 : index
      %86 = vector.load %arg7[%c0_44, %c15, %c3_45] : memref<2x22x128xf32, #tpu.memory_space<vmem>>, vector<1x1x16xf32>
      %87 = vector.shape_cast %86 : vector<1x1x16xf32> to vector<16xf32>
      %88 = vector.shape_cast %85 : vector<16xf32> to vector<1x1x16xf32>
      tpu.vector_store %arg7[%c0_44, %c15, %c3_45], %88 {strides = array<i32>} : memref<2x22x128xf32, #tpu.memory_space<vmem>>, vector<1x1x16xf32>,
      %89 = vector.extract_strided_slice %19 {offsets = [0, 208], sizes = [1, 16], strides = [1, 1]} : vector<1x256xf32> to vector<1x16xf32>
      %90 = vector.shape_cast %89 : vector<1x16xf32> to vector<16xf32>
      %c0_46 = arith.constant 0 : index
      %c16 = arith.constant 16 : index
      %c3_47 = arith.constant 3 : index
      %91 = vector.load %arg7[%c0_46, %c16, %c3_47] : memref<2x22x128xf32, #tpu.memory_space<vmem>>, vector<1x1x16xf32>
      %92 = vector.shape_cast %91 : vector<1x1x16xf32> to vector<16xf32>
      %93 = vector.shape_cast %90 : vector<16xf32> to vector<1x1x16xf32>
      tpu.vector_store %arg7[%c0_46, %c16, %c3_47], %93 {strides = array<i32>} : memref<2x22x128xf32, #tpu.memory_space<vmem>>, vector<1x1x16xf32>,
      %94 = vector.extract_strided_slice %19 {offsets = [0, 224], sizes = [1, 16], strides = [1, 1]} : vector<1x256xf32> to vector<1x16xf32>
      %95 = vector.shape_cast %94 : vector<1x16xf32> to vector<16xf32>
      %c0_48 = arith.constant 0 : index
      %c17 = arith.constant 17 : index
      %c3_49 = arith.constant 3 : index
      %96 = vector.load %arg7[%c0_48, %c17, %c3_49] : memref<2x22x128xf32, #tpu.memory_space<vmem>>, vector<1x1x16xf32>
      %97 = vector.shape_cast %96 : vector<1x1x16xf32> to vector<16xf32>
      %98 = vector.shape_cast %95 : vector<16xf32> to vector<1x1x16xf32>
      tpu.vector_store %arg7[%c0_48, %c17, %c3_49], %98 {strides = array<i32>} : memref<2x22x128xf32, #tpu.memory_space<vmem>>, vector<1x1x16xf32>,
      %99 = vector.extract_strided_slice %19 {offsets = [0, 240], sizes = [1, 16], strides = [1, 1]} : vector<1x256xf32> to vector<1x16xf32>
      %100 = vector.shape_cast %99 : vector<1x16xf32> to vector<16xf32>
      %c0_50 = arith.constant 0 : index
      %c18 = arith.constant 18 : index
      %c3_51 = arith.constant 3 : index
      %101 = vector.load %arg7[%c0_50, %c18, %c3_51] : memref<2x22x128xf32, #tpu.memory_space<vmem>>, vector<1x1x16xf32>
      %102 = vector.shape_cast %101 : vector<1x1x16xf32> to vector<16xf32>
      %103 = vector.shape_cast %100 : vector<16xf32> to vector<1x1x16xf32>
      tpu.vector_store %arg7[%c0_50, %c18, %c3_51], %103 {strides = array<i32>} : memref<2x22x128xf32, #tpu.memory_space<vmem>>, vector<1x1x16xf32>,
      %104 = vector.extract_strided_slice %23 {offsets = [0, 0], sizes = [1, 16], strides = [1, 1]} : vector<1x256xf32> to vector<1x16xf32>
      %105 = vector.shape_cast %104 : vector<1x16xf32> to vector<16xf32>
      %c1 = arith.constant 1 : index
      %c3_52 = arith.constant 3 : index
      %c3_53 = arith.constant 3 : index
      %106 = vector.load %arg7[%c1, %c3_52, %c3_53] : memref<2x22x128xf32, #tpu.memory_space<vmem>>, vector<1x1x16xf32>
      %107 = vector.shape_cast %106 : vector<1x1x16xf32> to vector<16xf32>
      %108 = vector.shape_cast %105 : vector<16xf32> to vector<1x1x16xf32>
      tpu.vector_store %arg7[%c1, %c3_52, %c3_53], %108 {strides = array<i32>} : memref<2x22x128xf32, #tpu.memory_space<vmem>>, vector<1x1x16xf32>,
      %109 = vector.extract_strided_slice %23 {offsets = [0, 16], sizes = [1, 16], strides = [1, 1]} : vector<1x256xf32> to vector<1x16xf32>
      %110 = vector.shape_cast %109 : vector<1x16xf32> to vector<16xf32>
      %c1_54 = arith.constant 1 : index
      %c4_55 = arith.constant 4 : index
      %c3_56 = arith.constant 3 : index
      %111 = vector.load %arg7[%c1_54, %c4_55, %c3_56] : memref<2x22x128xf32, #tpu.memory_space<vmem>>, vector<1x1x16xf32>
      %112 = vector.shape_cast %111 : vector<1x1x16xf32> to vector<16xf32>
      %113 = vector.shape_cast %110 : vector<16xf32> to vector<1x1x16xf32>
      tpu.vector_store %arg7[%c1_54, %c4_55, %c3_56], %113 {strides = array<i32>} : memref<2x22x128xf32, #tpu.memory_space<vmem>>, vector<1x1x16xf32>,
      %114 = vector.extract_strided_slice %23 {offsets = [0, 32], sizes = [1, 16], strides = [1, 1]} : vector<1x256xf32> to vector<1x16xf32>
      %115 = vector.shape_cast %114 : vector<1x16xf32> to vector<16xf32>
      %c1_57 = arith.constant 1 : index
      %c5_58 = arith.constant 5 : index
      %c3_59 = arith.constant 3 : index
      %116 = vector.load %arg7[%c1_57, %c5_58, %c3_59] : memref<2x22x128xf32, #tpu.memory_space<vmem>>, vector<1x1x16xf32>
      %117 = vector.shape_cast %116 : vector<1x1x16xf32> to vector<16xf32>
      %118 = vector.shape_cast %115 : vector<16xf32> to vector<1x1x16xf32>
      tpu.vector_store %arg7[%c1_57, %c5_58, %c3_59], %118 {strides = array<i32>} : memref<2x22x128xf32, #tpu.memory_space<vmem>>, vector<1x1x16xf32>,
      %119 = vector.extract_strided_slice %23 {offsets = [0, 48], sizes = [1, 16], strides = [1, 1]} : vector<1x256xf32> to vector<1x16xf32>
      %120 = vector.shape_cast %119 : vector<1x16xf32> to vector<16xf32>
      %c1_60 = arith.constant 1 : index
      %c6_61 = arith.constant 6 : index
      %c3_62 = arith.constant 3 : index
      %121 = vector.load %arg7[%c1_60, %c6_61, %c3_62] : memref<2x22x128xf32, #tpu.memory_space<vmem>>, vector<1x1x16xf32>
      %122 = vector.shape_cast %121 : vector<1x1x16xf32> to vector<16xf32>
      %123 = vector.shape_cast %120 : vector<16xf32> to vector<1x1x16xf32>
      tpu.vector_store %arg7[%c1_60, %c6_61, %c3_62], %123 {strides = array<i32>} : memref<2x22x128xf32, #tpu.memory_space<vmem>>, vector<1x1x16xf32>,
      %124 = vector.extract_strided_slice %23 {offsets = [0, 64], sizes = [1, 16], strides = [1, 1]} : vector<1x256xf32> to vector<1x16xf32>
      %125 = vector.shape_cast %124 : vector<1x16xf32> to vector<16xf32>
      %c1_63 = arith.constant 1 : index
      %c7_64 = arith.constant 7 : index
      %c3_65 = arith.constant 3 : index
      %126 = vector.load %arg7[%c1_63, %c7_64, %c3_65] : memref<2x22x128xf32, #tpu.memory_space<vmem>>, vector<1x1x16xf32>
      %127 = vector.shape_cast %126 : vector<1x1x16xf32> to vector<16xf32>
      %128 = vector.shape_cast %125 : vector<16xf32> to vector<1x1x16xf32>
      tpu.vector_store %arg7[%c1_63, %c7_64, %c3_65], %128 {strides = array<i32>} : memref<2x22x128xf32, #tpu.memory_space<vmem>>, vector<1x1x16xf32>,
      %129 = vector.extract_strided_slice %23 {offsets = [0, 80], sizes = [1, 16], strides = [1, 1]} : vector<1x256xf32> to vector<1x16xf32>
      %130 = vector.shape_cast %129 : vector<1x16xf32> to vector<16xf32>
      %c1_66 = arith.constant 1 : index
      %c8_67 = arith.constant 8 : index
      %c3_68 = arith.constant 3 : index
      %131 = vector.load %arg7[%c1_66, %c8_67, %c3_68] : memref<2x22x128xf32, #tpu.memory_space<vmem>>, vector<1x1x16xf32>
      %132 = vector.shape_cast %131 : vector<1x1x16xf32> to vector<16xf32>
      %133 = vector.shape_cast %130 : vector<16xf32> to vector<1x1x16xf32>
      tpu.vector_store %arg7[%c1_66, %c8_67, %c3_68], %133 {strides = array<i32>} : memref<2x22x128xf32, #tpu.memory_space<vmem>>, vector<1x1x16xf32>,
      %134 = vector.extract_strided_slice %23 {offsets = [0, 96], sizes = [1, 16], strides = [1, 1]} : vector<1x256xf32> to vector<1x16xf32>
      %135 = vector.shape_cast %134 : vector<1x16xf32> to vector<16xf32>
      %c1_69 = arith.constant 1 : index
      %c9_70 = arith.constant 9 : index
      %c3_71 = arith.constant 3 : index
      %136 = vector.load %arg7[%c1_69, %c9_70, %c3_71] : memref<2x22x128xf32, #tpu.memory_space<vmem>>, vector<1x1x16xf32>
      %137 = vector.shape_cast %136 : vector<1x1x16xf32> to vector<16xf32>
      %138 = vector.shape_cast %135 : vector<16xf32> to vector<1x1x16xf32>
      tpu.vector_store %arg7[%c1_69, %c9_70, %c3_71], %138 {strides = array<i32>} : memref<2x22x128xf32, #tpu.memory_space<vmem>>, vector<1x1x16xf32>,
      %139 = vector.extract_strided_slice %23 {offsets = [0, 112], sizes = [1, 16], strides = [1, 1]} : vector<1x256xf32> to vector<1x16xf32>
      %140 = vector.shape_cast %139 : vector<1x16xf32> to vector<16xf32>
      %c1_72 = arith.constant 1 : index
      %c10_73 = arith.constant 10 : index
      %c3_74 = arith.constant 3 : index
      %141 = vector.load %arg7[%c1_72, %c10_73, %c3_74] : memref<2x22x128xf32, #tpu.memory_space<vmem>>, vector<1x1x16xf32>
      %142 = vector.shape_cast %141 : vector<1x1x16xf32> to vector<16xf32>
      %143 = vector.shape_cast %140 : vector<16xf32> to vector<1x1x16xf32>
      tpu.vector_store %arg7[%c1_72, %c10_73, %c3_74], %143 {strides = array<i32>} : memref<2x22x128xf32, #tpu.memory_space<vmem>>, vector<1x1x16xf32>,
      %144 = vector.extract_strided_slice %23 {offsets = [0, 128], sizes = [1, 16], strides = [1, 1]} : vector<1x256xf32> to vector<1x16xf32>
      %145 = vector.shape_cast %144 : vector<1x16xf32> to vector<16xf32>
      %c1_75 = arith.constant 1 : index
      %c11_76 = arith.constant 11 : index
      %c3_77 = arith.constant 3 : index
      %146 = vector.load %arg7[%c1_75, %c11_76, %c3_77] : memref<2x22x128xf32, #tpu.memory_space<vmem>>, vector<1x1x16xf32>
      %147 = vector.shape_cast %146 : vector<1x1x16xf32> to vector<16xf32>
      %148 = vector.shape_cast %145 : vector<16xf32> to vector<1x1x16xf32>
      tpu.vector_store %arg7[%c1_75, %c11_76, %c3_77], %148 {strides = array<i32>} : memref<2x22x128xf32, #tpu.memory_space<vmem>>, vector<1x1x16xf32>,
      %149 = vector.extract_strided_slice %23 {offsets = [0, 144], sizes = [1, 16], strides = [1, 1]} : vector<1x256xf32> to vector<1x16xf32>
      %150 = vector.shape_cast %149 : vector<1x16xf32> to vector<16xf32>
      %c1_78 = arith.constant 1 : index
      %c12_79 = arith.constant 12 : index
      %c3_80 = arith.constant 3 : index
      %151 = vector.load %arg7[%c1_78, %c12_79, %c3_80] : memref<2x22x128xf32, #tpu.memory_space<vmem>>, vector<1x1x16xf32>
      %152 = vector.shape_cast %151 : vector<1x1x16xf32> to vector<16xf32>
      %153 = vector.shape_cast %150 : vector<16xf32> to vector<1x1x16xf32>
      tpu.vector_store %arg7[%c1_78, %c12_79, %c3_80], %153 {strides = array<i32>} : memref<2x22x128xf32, #tpu.memory_space<vmem>>, vector<1x1x16xf32>,
      %154 = vector.extract_strided_slice %23 {offsets = [0, 160], sizes = [1, 16], strides = [1, 1]} : vector<1x256xf32> to vector<1x16xf32>
      %155 = vector.shape_cast %154 : vector<1x16xf32> to vector<16xf32>
      %c1_81 = arith.constant 1 : index
      %c13_82 = arith.constant 13 : index
      %c3_83 = arith.constant 3 : index
      %156 = vector.load %arg7[%c1_81, %c13_82, %c3_83] : memref<2x22x128xf32, #tpu.memory_space<vmem>>, vector<1x1x16xf32>
      %157 = vector.shape_cast %156 : vector<1x1x16xf32> to vector<16xf32>
      %158 = vector.shape_cast %155 : vector<16xf32> to vector<1x1x16xf32>
      tpu.vector_store %arg7[%c1_81, %c13_82, %c3_83], %158 {strides = array<i32>} : memref<2x22x128xf32, #tpu.memory_space<vmem>>, vector<1x1x16xf32>,
      %159 = vector.extract_strided_slice %23 {offsets = [0, 176], sizes = [1, 16], strides = [1, 1]} : vector<1x256xf32> to vector<1x16xf32>
      %160 = vector.shape_cast %159 : vector<1x16xf32> to vector<16xf32>
      %c1_84 = arith.constant 1 : index
      %c14_85 = arith.constant 14 : index
      %c3_86 = arith.constant 3 : index
      %161 = vector.load %arg7[%c1_84, %c14_85, %c3_86] : memref<2x22x128xf32, #tpu.memory_space<vmem>>, vector<1x1x16xf32>
      %162 = vector.shape_cast %161 : vector<1x1x16xf32> to vector<16xf32>
      %163 = vector.shape_cast %160 : vector<16xf32> to vector<1x1x16xf32>
      tpu.vector_store %arg7[%c1_84, %c14_85, %c3_86], %163 {strides = array<i32>} : memref<2x22x128xf32, #tpu.memory_space<vmem>>, vector<1x1x16xf32>,
      %164 = vector.extract_strided_slice %23 {offsets = [0, 192], sizes = [1, 16], strides = [1, 1]} : vector<1x256xf32> to vector<1x16xf32>
      %165 = vector.shape_cast %164 : vector<1x16xf32> to vector<16xf32>
      %c1_87 = arith.constant 1 : index
      %c15_88 = arith.constant 15 : index
      %c3_89 = arith.constant 3 : index
      %166 = vector.load %arg7[%c1_87, %c15_88, %c3_89] : memref<2x22x128xf32, #tpu.memory_space<vmem>>, vector<1x1x16xf32>
      %167 = vector.shape_cast %166 : vector<1x1x16xf32> to vector<16xf32>
      %168 = vector.shape_cast %165 : vector<16xf32> to vector<1x1x16xf32>
      tpu.vector_store %arg7[%c1_87, %c15_88, %c3_89], %168 {strides = array<i32>} : memref<2x22x128xf32, #tpu.memory_space<vmem>>, vector<1x1x16xf32>,
      %169 = vector.extract_strided_slice %23 {offsets = [0, 208], sizes = [1, 16], strides = [1, 1]} : vector<1x256xf32> to vector<1x16xf32>
      %170 = vector.shape_cast %169 : vector<1x16xf32> to vector<16xf32>
      %c1_90 = arith.constant 1 : index
      %c16_91 = arith.constant 16 : index
      %c3_92 = arith.constant 3 : index
      %171 = vector.load %arg7[%c1_90, %c16_91, %c3_92] : memref<2x22x128xf32, #tpu.memory_space<vmem>>, vector<1x1x16xf32>
      %172 = vector.shape_cast %171 : vector<1x1x16xf32> to vector<16xf32>
      %173 = vector.shape_cast %170 : vector<16xf32> to vector<1x1x16xf32>
      tpu.vector_store %arg7[%c1_90, %c16_91, %c3_92], %173 {strides = array<i32>} : memref<2x22x128xf32, #tpu.memory_space<vmem>>, vector<1x1x16xf32>,
      %174 = vector.extract_strided_slice %23 {offsets = [0, 224], sizes = [1, 16], strides = [1, 1]} : vector<1x256xf32> to vector<1x16xf32>
      %175 = vector.shape_cast %174 : vector<1x16xf32> to vector<16xf32>
      %c1_93 = arith.constant 1 : index
      %c17_94 = arith.constant 17 : index
      %c3_95 = arith.constant 3 : index
      %176 = vector.load %arg7[%c1_93, %c17_94, %c3_95] : memref<2x22x128xf32, #tpu.memory_space<vmem>>, vector<1x1x16xf32>
      %177 = vector.shape_cast %176 : vector<1x1x16xf32> to vector<16xf32>
      %178 = vector.shape_cast %175 : vector<16xf32> to vector<1x1x16xf32>
      tpu.vector_store %arg7[%c1_93, %c17_94, %c3_95], %178 {strides = array<i32>} : memref<2x22x128xf32, #tpu.memory_space<vmem>>, vector<1x1x16xf32>,
      %179 = vector.extract_strided_slice %23 {offsets = [0, 240], sizes = [1, 16], strides = [1, 1]} : vector<1x256xf32> to vector<1x16xf32>
      %180 = vector.shape_cast %179 : vector<1x16xf32> to vector<16xf32>
      %c1_96 = arith.constant 1 : index
      %c18_97 = arith.constant 18 : index
      %c3_98 = arith.constant 3 : index
      %181 = vector.load %arg7[%c1_96, %c18_97, %c3_98] : memref<2x22x128xf32, #tpu.memory_space<vmem>>, vector<1x1x16xf32>
      %182 = vector.shape_cast %181 : vector<1x1x16xf32> to vector<16xf32>
      %183 = vector.shape_cast %180 : vector<16xf32> to vector<1x1x16xf32>
      tpu.vector_store %arg7[%c1_96, %c18_97, %c3_98], %183 {strides = array<i32>} : memref<2x22x128xf32, #tpu.memory_space<vmem>>, vector<1x1x16xf32>,
      %cst_99 = arith.constant 0.000000e+00 : f32
      %184 = vector.broadcast %cst_99 : f32 to vector<16x16xf32>
      %cst_100 = arith.constant 0.000000e+00 : f32
      %185 = vector.broadcast %cst_100 : f32 to vector<16x16xf32>
      %cst_101 = arith.constant 0.000000e+00 : f32
      %186 = vector.broadcast %cst_101 : f32 to vector<16x16xf32>
      %cst_102 = arith.constant 0.000000e+00 : f32
      %187 = vector.broadcast %cst_102 : f32 to vector<16x16xf32>
      %c0_103 = arith.constant 0 : index
      %c0_104 = arith.constant 0 : index
      %c0_105 = arith.constant 0 : index
      %188 = vector.load %arg7[%c0_103, %c0_104, %c0_105] : memref<2x22x128xf32, #tpu.memory_space<vmem>>, vector<1x22x128xf32>
      %189 = vector.shape_cast %188 : vector<1x22x128xf32> to vector<22x128xf32>
      %190 = vector.extract_strided_slice %189 {offsets = [0, 0], sizes = [16, 128], strides = [1, 1]} : vector<22x128xf32> to vector<16x128xf32>
      %c0_106 = arith.constant 0 : index
      %191 = memref.load %arg2[%c0_106] : memref<98xf32, #tpu.memory_space<smem>>
      %192 = vector.extract_strided_slice %190 {offsets = [0, 0], sizes = [16, 16], strides = [1, 1]} : vector<16x128xf32> to vector<16x16xf32>
      %193 = vector.broadcast %191 : f32 to vector<16x16xf32>
      %194 = arith.mulf %192, %193 : vector<16x16xf32>
      %195 = arith.addf %184, %194 : vector<16x16xf32>
      %c1_107 = arith.constant 1 : index
      %196 = memref.load %arg2[%c1_107] : memref<98xf32, #tpu.memory_space<smem>>
      %197 = vector.extract_strided_slice %190 {offsets = [0, 1], sizes = [16, 16], strides = [1, 1]} : vector<16x128xf32> to vector<16x16xf32>
      %198 = vector.broadcast %196 : f32 to vector<16x16xf32>
      %199 = arith.mulf %197, %198 : vector<16x16xf32>
      %200 = arith.addf %185, %199 : vector<16x16xf32>
      %c2 = arith.constant 2 : index
      %201 = memref.load %arg2[%c2] : memref<98xf32, #tpu.memory_space<smem>>
      %202 = vector.extract_strided_slice %190 {offsets = [0, 2], sizes = [16, 16], strides = [1, 1]} : vector<16x128xf32> to vector<16x16xf32>
      %203 = vector.broadcast %201 : f32 to vector<16x16xf32>
      %204 = arith.mulf %202, %203 : vector<16x16xf32>
      %205 = arith.addf %195, %204 : vector<16x16xf32>
      %c3_108 = arith.constant 3 : index
      %206 = memref.load %arg2[%c3_108] : memref<98xf32, #tpu.memory_space<smem>>
      %207 = vector.extract_strided_slice %190 {offsets = [0, 3], sizes = [16, 16], strides = [1, 1]} : vector<16x128xf32> to vector<16x16xf32>
      %208 = vector.broadcast %206 : f32 to vector<16x16xf32>
      %209 = arith.mulf %207, %208 : vector<16x16xf32>
      %210 = arith.addf %200, %209 : vector<16x16xf32>
      %c4_109 = arith.constant 4 : index
      %211 = memref.load %arg2[%c4_109] : memref<98xf32, #tpu.memory_space<smem>>
      %212 = vector.extract_strided_slice %190 {offsets = [0, 4], sizes = [16, 16], strides = [1, 1]} : vector<16x128xf32> to vector<16x16xf32>
      %213 = vector.broadcast %211 : f32 to vector<16x16xf32>
      %214 = arith.mulf %212, %213 : vector<16x16xf32>
      %215 = arith.addf %205, %214 : vector<16x16xf32>
      %c5_110 = arith.constant 5 : index
      %216 = memref.load %arg2[%c5_110] : memref<98xf32, #tpu.memory_space<smem>>
      %217 = vector.extract_strided_slice %190 {offsets = [0, 5], sizes = [16, 16], strides = [1, 1]} : vector<16x128xf32> to vector<16x16xf32>
      %218 = vector.broadcast %216 : f32 to vector<16x16xf32>
      %219 = arith.mulf %217, %218 : vector<16x16xf32>
      %220 = arith.addf %210, %219 : vector<16x16xf32>
      %c6_111 = arith.constant 6 : index
      %221 = memref.load %arg2[%c6_111] : memref<98xf32, #tpu.memory_space<smem>>
      %222 = vector.extract_strided_slice %190 {offsets = [0, 6], sizes = [16, 16], strides = [1, 1]} : vector<16x128xf32> to vector<16x16xf32>
      %223 = vector.broadcast %221 : f32 to vector<16x16xf32>
      %224 = arith.mulf %222, %223 : vector<16x16xf32>
      %225 = arith.addf %215, %224 : vector<16x16xf32>
      %226 = vector.extract_strided_slice %189 {offsets = [1, 0], sizes = [16, 128], strides = [1, 1]} : vector<22x128xf32> to vector<16x128xf32>
      %c7_112 = arith.constant 7 : index
      %227 = memref.load %arg2[%c7_112] : memref<98xf32, #tpu.memory_space<smem>>
      %228 = vector.extract_strided_slice %226 {offsets = [0, 0], sizes = [16, 16], strides = [1, 1]} : vector<16x128xf32> to vector<16x16xf32>
      %229 = vector.broadcast %227 : f32 to vector<16x16xf32>
      %230 = arith.mulf %228, %229 : vector<16x16xf32>
      %231 = arith.addf %225, %230 : vector<16x16xf32>
      %c8_113 = arith.constant 8 : index
      %232 = memref.load %arg2[%c8_113] : memref<98xf32, #tpu.memory_space<smem>>
      %233 = vector.extract_strided_slice %226 {offsets = [0, 1], sizes = [16, 16], strides = [1, 1]} : vector<16x128xf32> to vector<16x16xf32>
      %234 = vector.broadcast %232 : f32 to vector<16x16xf32>
      %235 = arith.mulf %233, %234 : vector<16x16xf32>
      %236 = arith.addf %220, %235 : vector<16x16xf32>
      %c9_114 = arith.constant 9 : index
      %237 = memref.load %arg2[%c9_114] : memref<98xf32, #tpu.memory_space<smem>>
      %238 = vector.extract_strided_slice %226 {offsets = [0, 2], sizes = [16, 16], strides = [1, 1]} : vector<16x128xf32> to vector<16x16xf32>
      %239 = vector.broadcast %237 : f32 to vector<16x16xf32>
      %240 = arith.mulf %238, %239 : vector<16x16xf32>
      %241 = arith.addf %231, %240 : vector<16x16xf32>
      %c10_115 = arith.constant 10 : index
      %242 = memref.load %arg2[%c10_115] : memref<98xf32, #tpu.memory_space<smem>>
      %243 = vector.extract_strided_slice %226 {offsets = [0, 3], sizes = [16, 16], strides = [1, 1]} : vector<16x128xf32> to vector<16x16xf32>
      %244 = vector.broadcast %242 : f32 to vector<16x16xf32>
      %245 = arith.mulf %243, %244 : vector<16x16xf32>
      %246 = arith.addf %236, %245 : vector<16x16xf32>
      %c11_116 = arith.constant 11 : index
      %247 = memref.load %arg2[%c11_116] : memref<98xf32, #tpu.memory_space<smem>>
      %248 = vector.extract_strided_slice %226 {offsets = [0, 4], sizes = [16, 16], strides = [1, 1]} : vector<16x128xf32> to vector<16x16xf32>
      %249 = vector.broadcast %247 : f32 to vector<16x16xf32>
      %250 = arith.mulf %248, %249 : vector<16x16xf32>
      %251 = arith.addf %241, %250 : vector<16x16xf32>
      %c12_117 = arith.constant 12 : index
      %252 = memref.load %arg2[%c12_117] : memref<98xf32, #tpu.memory_space<smem>>
      %253 = vector.extract_strided_slice %226 {offsets = [0, 5], sizes = [16, 16], strides = [1, 1]} : vector<16x128xf32> to vector<16x16xf32>
      %254 = vector.broadcast %252 : f32 to vector<16x16xf32>
      %255 = arith.mulf %253, %254 : vector<16x16xf32>
      %256 = arith.addf %246, %255 : vector<16x16xf32>
      %c13_118 = arith.constant 13 : index
      %257 = memref.load %arg2[%c13_118] : memref<98xf32, #tpu.memory_space<smem>>
      %258 = vector.extract_strided_slice %226 {offsets = [0, 6], sizes = [16, 16], strides = [1, 1]} : vector<16x128xf32> to vector<16x16xf32>
      %259 = vector.broadcast %257 : f32 to vector<16x16xf32>
      %260 = arith.mulf %258, %259 : vector<16x16xf32>
      %261 = arith.addf %251, %260 : vector<16x16xf32>
      %262 = vector.extract_strided_slice %189 {offsets = [2, 0], sizes = [16, 128], strides = [1, 1]} : vector<22x128xf32> to vector<16x128xf32>
      %c14_119 = arith.constant 14 : index
      %263 = memref.load %arg2[%c14_119] : memref<98xf32, #tpu.memory_space<smem>>
      %264 = vector.extract_strided_slice %262 {offsets = [0, 0], sizes = [16, 16], strides = [1, 1]} : vector<16x128xf32> to vector<16x16xf32>
      %265 = vector.broadcast %263 : f32 to vector<16x16xf32>
      %266 = arith.mulf %264, %265 : vector<16x16xf32>
      %267 = arith.addf %261, %266 : vector<16x16xf32>
      %c15_120 = arith.constant 15 : index
      %268 = memref.load %arg2[%c15_120] : memref<98xf32, #tpu.memory_space<smem>>
      %269 = vector.extract_strided_slice %262 {offsets = [0, 1], sizes = [16, 16], strides = [1, 1]} : vector<16x128xf32> to vector<16x16xf32>
      %270 = vector.broadcast %268 : f32 to vector<16x16xf32>
      %271 = arith.mulf %269, %270 : vector<16x16xf32>
      %272 = arith.addf %256, %271 : vector<16x16xf32>
      %c16_121 = arith.constant 16 : index
      %273 = memref.load %arg2[%c16_121] : memref<98xf32, #tpu.memory_space<smem>>
      %274 = vector.extract_strided_slice %262 {offsets = [0, 2], sizes = [16, 16], strides = [1, 1]} : vector<16x128xf32> to vector<16x16xf32>
      %275 = vector.broadcast %273 : f32 to vector<16x16xf32>
      %276 = arith.mulf %274, %275 : vector<16x16xf32>
      %277 = arith.addf %267, %276 : vector<16x16xf32>
      %c17_122 = arith.constant 17 : index
      %278 = memref.load %arg2[%c17_122] : memref<98xf32, #tpu.memory_space<smem>>
      %279 = vector.extract_strided_slice %262 {offsets = [0, 3], sizes = [16, 16], strides = [1, 1]} : vector<16x128xf32> to vector<16x16xf32>
      %280 = vector.broadcast %278 : f32 to vector<16x16xf32>
      %281 = arith.mulf %279, %280 : vector<16x16xf32>
      %282 = arith.addf %272, %281 : vector<16x16xf32>
      %c18_123 = arith.constant 18 : index
      %283 = memref.load %arg2[%c18_123] : memref<98xf32, #tpu.memory_space<smem>>
      %284 = vector.extract_strided_slice %262 {offsets = [0, 4], sizes = [16, 16], strides = [1, 1]} : vector<16x128xf32> to vector<16x16xf32>
      %285 = vector.broadcast %283 : f32 to vector<16x16xf32>
      %286 = arith.mulf %284, %285 : vector<16x16xf32>
      %287 = arith.addf %277, %286 : vector<16x16xf32>
      %c19 = arith.constant 19 : index
      %288 = memref.load %arg2[%c19] : memref<98xf32, #tpu.memory_space<smem>>
      %289 = vector.extract_strided_slice %262 {offsets = [0, 5], sizes = [16, 16], strides = [1, 1]} : vector<16x128xf32> to vector<16x16xf32>
      %290 = vector.broadcast %288 : f32 to vector<16x16xf32>
      %291 = arith.mulf %289, %290 : vector<16x16xf32>
      %292 = arith.addf %282, %291 : vector<16x16xf32>
      %c20 = arith.constant 20 : index
      %293 = memref.load %arg2[%c20] : memref<98xf32, #tpu.memory_space<smem>>
      %294 = vector.extract_strided_slice %262 {offsets = [0, 6], sizes = [16, 16], strides = [1, 1]} : vector<16x128xf32> to vector<16x16xf32>
      %295 = vector.broadcast %293 : f32 to vector<16x16xf32>
      %296 = arith.mulf %294, %295 : vector<16x16xf32>
      %297 = arith.addf %287, %296 : vector<16x16xf32>
      %298 = vector.extract_strided_slice %189 {offsets = [3, 0], sizes = [16, 128], strides = [1, 1]} : vector<22x128xf32> to vector<16x128xf32>
      %c21 = arith.constant 21 : index
      %299 = memref.load %arg2[%c21] : memref<98xf32, #tpu.memory_space<smem>>
      %300 = vector.extract_strided_slice %298 {offsets = [0, 0], sizes = [16, 16], strides = [1, 1]} : vector<16x128xf32> to vector<16x16xf32>
      %301 = vector.broadcast %299 : f32 to vector<16x16xf32>
      %302 = arith.mulf %300, %301 : vector<16x16xf32>
      %303 = arith.addf %297, %302 : vector<16x16xf32>
      %c22 = arith.constant 22 : index
      %304 = memref.load %arg2[%c22] : memref<98xf32, #tpu.memory_space<smem>>
      %305 = vector.extract_strided_slice %298 {offsets = [0, 1], sizes = [16, 16], strides = [1, 1]} : vector<16x128xf32> to vector<16x16xf32>
      %306 = vector.broadcast %304 : f32 to vector<16x16xf32>
      %307 = arith.mulf %305, %306 : vector<16x16xf32>
      %308 = arith.addf %292, %307 : vector<16x16xf32>
      %c23 = arith.constant 23 : index
      %309 = memref.load %arg2[%c23] : memref<98xf32, #tpu.memory_space<smem>>
      %310 = vector.extract_strided_slice %298 {offsets = [0, 2], sizes = [16, 16], strides = [1, 1]} : vector<16x128xf32> to vector<16x16xf32>
      %311 = vector.broadcast %309 : f32 to vector<16x16xf32>
      %312 = arith.mulf %310, %311 : vector<16x16xf32>
      %313 = arith.addf %303, %312 : vector<16x16xf32>
      %c24 = arith.constant 24 : index
      %314 = memref.load %arg2[%c24] : memref<98xf32, #tpu.memory_space<smem>>
      %315 = vector.extract_strided_slice %298 {offsets = [0, 3], sizes = [16, 16], strides = [1, 1]} : vector<16x128xf32> to vector<16x16xf32>
      %316 = vector.broadcast %314 : f32 to vector<16x16xf32>
      %317 = arith.mulf %315, %316 : vector<16x16xf32>
      %318 = arith.addf %308, %317 : vector<16x16xf32>
      %c25 = arith.constant 25 : index
      %319 = memref.load %arg2[%c25] : memref<98xf32, #tpu.memory_space<smem>>
      %320 = vector.extract_strided_slice %298 {offsets = [0, 4], sizes = [16, 16], strides = [1, 1]} : vector<16x128xf32> to vector<16x16xf32>
      %321 = vector.broadcast %319 : f32 to vector<16x16xf32>
      %322 = arith.mulf %320, %321 : vector<16x16xf32>
      %323 = arith.addf %313, %322 : vector<16x16xf32>
      %c26 = arith.constant 26 : index
      %324 = memref.load %arg2[%c26] : memref<98xf32, #tpu.memory_space<smem>>
      %325 = vector.extract_strided_slice %298 {offsets = [0, 5], sizes = [16, 16], strides = [1, 1]} : vector<16x128xf32> to vector<16x16xf32>
      %326 = vector.broadcast %324 : f32 to vector<16x16xf32>
      %327 = arith.mulf %325, %326 : vector<16x16xf32>
      %328 = arith.addf %318, %327 : vector<16x16xf32>
      %c27 = arith.constant 27 : index
      %329 = memref.load %arg2[%c27] : memref<98xf32, #tpu.memory_space<smem>>
      %330 = vector.extract_strided_slice %298 {offsets = [0, 6], sizes = [16, 16], strides = [1, 1]} : vector<16x128xf32> to vector<16x16xf32>
      %331 = vector.broadcast %329 : f32 to vector<16x16xf32>
      %332 = arith.mulf %330, %331 : vector<16x16xf32>
      %333 = arith.addf %323, %332 : vector<16x16xf32>
      %334 = vector.extract_strided_slice %189 {offsets = [4, 0], sizes = [16, 128], strides = [1, 1]} : vector<22x128xf32> to vector<16x128xf32>
      %c28 = arith.constant 28 : index
      %335 = memref.load %arg2[%c28] : memref<98xf32, #tpu.memory_space<smem>>
      %336 = vector.extract_strided_slice %334 {offsets = [0, 0], sizes = [16, 16], strides = [1, 1]} : vector<16x128xf32> to vector<16x16xf32>
      %337 = vector.broadcast %335 : f32 to vector<16x16xf32>
      %338 = arith.mulf %336, %337 : vector<16x16xf32>
      %339 = arith.addf %333, %338 : vector<16x16xf32>
      %c29 = arith.constant 29 : index
      %340 = memref.load %arg2[%c29] : memref<98xf32, #tpu.memory_space<smem>>
      %341 = vector.extract_strided_slice %334 {offsets = [0, 1], sizes = [16, 16], strides = [1, 1]} : vector<16x128xf32> to vector<16x16xf32>
      %342 = vector.broadcast %340 : f32 to vector<16x16xf32>
      %343 = arith.mulf %341, %342 : vector<16x16xf32>
      %344 = arith.addf %328, %343 : vector<16x16xf32>
      %c30 = arith.constant 30 : index
      %345 = memref.load %arg2[%c30] : memref<98xf32, #tpu.memory_space<smem>>
      %346 = vector.extract_strided_slice %334 {offsets = [0, 2], sizes = [16, 16], strides = [1, 1]} : vector<16x128xf32> to vector<16x16xf32>
      %347 = vector.broadcast %345 : f32 to vector<16x16xf32>
      %348 = arith.mulf %346, %347 : vector<16x16xf32>
      %349 = arith.addf %339, %348 : vector<16x16xf32>
      %c31 = arith.constant 31 : index
      %350 = memref.load %arg2[%c31] : memref<98xf32, #tpu.memory_space<smem>>
      %351 = vector.extract_strided_slice %334 {offsets = [0, 3], sizes = [16, 16], strides = [1, 1]} : vector<16x128xf32> to vector<16x16xf32>
      %352 = vector.broadcast %350 : f32 to vector<16x16xf32>
      %353 = arith.mulf %351, %352 : vector<16x16xf32>
      %354 = arith.addf %344, %353 : vector<16x16xf32>
      %c32 = arith.constant 32 : index
      %355 = memref.load %arg2[%c32] : memref<98xf32, #tpu.memory_space<smem>>
      %356 = vector.extract_strided_slice %334 {offsets = [0, 4], sizes = [16, 16], strides = [1, 1]} : vector<16x128xf32> to vector<16x16xf32>
      %357 = vector.broadcast %355 : f32 to vector<16x16xf32>
      %358 = arith.mulf %356, %357 : vector<16x16xf32>
      %359 = arith.addf %349, %358 : vector<16x16xf32>
      %c33 = arith.constant 33 : index
      %360 = memref.load %arg2[%c33] : memref<98xf32, #tpu.memory_space<smem>>
      %361 = vector.extract_strided_slice %334 {offsets = [0, 5], sizes = [16, 16], strides = [1, 1]} : vector<16x128xf32> to vector<16x16xf32>
      %362 = vector.broadcast %360 : f32 to vector<16x16xf32>
      %363 = arith.mulf %361, %362 : vector<16x16xf32>
      %364 = arith.addf %354, %363 : vector<16x16xf32>
      %c34 = arith.constant 34 : index
      %365 = memref.load %arg2[%c34] : memref<98xf32, #tpu.memory_space<smem>>
      %366 = vector.extract_strided_slice %334 {offsets = [0, 6], sizes = [16, 16], strides = [1, 1]} : vector<16x128xf32> to vector<16x16xf32>
      %367 = vector.broadcast %365 : f32 to vector<16x16xf32>
      %368 = arith.mulf %366, %367 : vector<16x16xf32>
      %369 = arith.addf %359, %368 : vector<16x16xf32>
      %370 = vector.extract_strided_slice %189 {offsets = [5, 0], sizes = [16, 128], strides = [1, 1]} : vector<22x128xf32> to vector<16x128xf32>
      %c35 = arith.constant 35 : index
      %371 = memref.load %arg2[%c35] : memref<98xf32, #tpu.memory_space<smem>>
      %372 = vector.extract_strided_slice %370 {offsets = [0, 0], sizes = [16, 16], strides = [1, 1]} : vector<16x128xf32> to vector<16x16xf32>
      %373 = vector.broadcast %371 : f32 to vector<16x16xf32>
      %374 = arith.mulf %372, %373 : vector<16x16xf32>
      %375 = arith.addf %369, %374 : vector<16x16xf32>
      %c36 = arith.constant 36 : index
      %376 = memref.load %arg2[%c36] : memref<98xf32, #tpu.memory_space<smem>>
      %377 = vector.extract_strided_slice %370 {offsets = [0, 1], sizes = [16, 16], strides = [1, 1]} : vector<16x128xf32> to vector<16x16xf32>
      %378 = vector.broadcast %376 : f32 to vector<16x16xf32>
      %379 = arith.mulf %377, %378 : vector<16x16xf32>
      %380 = arith.addf %364, %379 : vector<16x16xf32>
      %c37 = arith.constant 37 : index
      %381 = memref.load %arg2[%c37] : memref<98xf32, #tpu.memory_space<smem>>
      %382 = vector.extract_strided_slice %370 {offsets = [0, 2], sizes = [16, 16], strides = [1, 1]} : vector<16x128xf32> to vector<16x16xf32>
      %383 = vector.broadcast %381 : f32 to vector<16x16xf32>
      %384 = arith.mulf %382, %383 : vector<16x16xf32>
      %385 = arith.addf %375, %384 : vector<16x16xf32>
      %c38 = arith.constant 38 : index
      %386 = memref.load %arg2[%c38] : memref<98xf32, #tpu.memory_space<smem>>
      %387 = vector.extract_strided_slice %370 {offsets = [0, 3], sizes = [16, 16], strides = [1, 1]} : vector<16x128xf32> to vector<16x16xf32>
      %388 = vector.broadcast %386 : f32 to vector<16x16xf32>
      %389 = arith.mulf %387, %388 : vector<16x16xf32>
      %390 = arith.addf %380, %389 : vector<16x16xf32>
      %c39 = arith.constant 39 : index
      %391 = memref.load %arg2[%c39] : memref<98xf32, #tpu.memory_space<smem>>
      %392 = vector.extract_strided_slice %370 {offsets = [0, 4], sizes = [16, 16], strides = [1, 1]} : vector<16x128xf32> to vector<16x16xf32>
      %393 = vector.broadcast %391 : f32 to vector<16x16xf32>
      %394 = arith.mulf %392, %393 : vector<16x16xf32>
      %395 = arith.addf %385, %394 : vector<16x16xf32>
      %c40 = arith.constant 40 : index
      %396 = memref.load %arg2[%c40] : memref<98xf32, #tpu.memory_space<smem>>
      %397 = vector.extract_strided_slice %370 {offsets = [0, 5], sizes = [16, 16], strides = [1, 1]} : vector<16x128xf32> to vector<16x16xf32>
      %398 = vector.broadcast %396 : f32 to vector<16x16xf32>
      %399 = arith.mulf %397, %398 : vector<16x16xf32>
      %400 = arith.addf %390, %399 : vector<16x16xf32>
      %c41 = arith.constant 41 : index
      %401 = memref.load %arg2[%c41] : memref<98xf32, #tpu.memory_space<smem>>
      %402 = vector.extract_strided_slice %370 {offsets = [0, 6], sizes = [16, 16], strides = [1, 1]} : vector<16x128xf32> to vector<16x16xf32>
      %403 = vector.broadcast %401 : f32 to vector<16x16xf32>
      %404 = arith.mulf %402, %403 : vector<16x16xf32>
      %405 = arith.addf %395, %404 : vector<16x16xf32>
      %406 = vector.extract_strided_slice %189 {offsets = [6, 0], sizes = [16, 128], strides = [1, 1]} : vector<22x128xf32> to vector<16x128xf32>
      %c42 = arith.constant 42 : index
      %407 = memref.load %arg2[%c42] : memref<98xf32, #tpu.memory_space<smem>>
      %408 = vector.extract_strided_slice %406 {offsets = [0, 0], sizes = [16, 16], strides = [1, 1]} : vector<16x128xf32> to vector<16x16xf32>
      %409 = vector.broadcast %407 : f32 to vector<16x16xf32>
      %410 = arith.mulf %408, %409 : vector<16x16xf32>
      %411 = arith.addf %405, %410 : vector<16x16xf32>
      %c43 = arith.constant 43 : index
      %412 = memref.load %arg2[%c43] : memref<98xf32, #tpu.memory_space<smem>>
      %413 = vector.extract_strided_slice %406 {offsets = [0, 1], sizes = [16, 16], strides = [1, 1]} : vector<16x128xf32> to vector<16x16xf32>
      %414 = vector.broadcast %412 : f32 to vector<16x16xf32>
      %415 = arith.mulf %413, %414 : vector<16x16xf32>
      %416 = arith.addf %400, %415 : vector<16x16xf32>
      %c44 = arith.constant 44 : index
      %417 = memref.load %arg2[%c44] : memref<98xf32, #tpu.memory_space<smem>>
      %418 = vector.extract_strided_slice %406 {offsets = [0, 2], sizes = [16, 16], strides = [1, 1]} : vector<16x128xf32> to vector<16x16xf32>
      %419 = vector.broadcast %417 : f32 to vector<16x16xf32>
      %420 = arith.mulf %418, %419 : vector<16x16xf32>
      %421 = arith.addf %411, %420 : vector<16x16xf32>
      %c45 = arith.constant 45 : index
      %422 = memref.load %arg2[%c45] : memref<98xf32, #tpu.memory_space<smem>>
      %423 = vector.extract_strided_slice %406 {offsets = [0, 3], sizes = [16, 16], strides = [1, 1]} : vector<16x128xf32> to vector<16x16xf32>
      %424 = vector.broadcast %422 : f32 to vector<16x16xf32>
      %425 = arith.mulf %423, %424 : vector<16x16xf32>
      %426 = arith.addf %416, %425 : vector<16x16xf32>
      %c46 = arith.constant 46 : index
      %427 = memref.load %arg2[%c46] : memref<98xf32, #tpu.memory_space<smem>>
      %428 = vector.extract_strided_slice %406 {offsets = [0, 4], sizes = [16, 16], strides = [1, 1]} : vector<16x128xf32> to vector<16x16xf32>
      %429 = vector.broadcast %427 : f32 to vector<16x16xf32>
      %430 = arith.mulf %428, %429 : vector<16x16xf32>
      %431 = arith.addf %421, %430 : vector<16x16xf32>
      %c47 = arith.constant 47 : index
      %432 = memref.load %arg2[%c47] : memref<98xf32, #tpu.memory_space<smem>>
      %433 = vector.extract_strided_slice %406 {offsets = [0, 5], sizes = [16, 16], strides = [1, 1]} : vector<16x128xf32> to vector<16x16xf32>
      %434 = vector.broadcast %432 : f32 to vector<16x16xf32>
      %435 = arith.mulf %433, %434 : vector<16x16xf32>
      %436 = arith.addf %426, %435 : vector<16x16xf32>
      %c48 = arith.constant 48 : index
      %437 = memref.load %arg2[%c48] : memref<98xf32, #tpu.memory_space<smem>>
      %438 = vector.extract_strided_slice %406 {offsets = [0, 6], sizes = [16, 16], strides = [1, 1]} : vector<16x128xf32> to vector<16x16xf32>
      %439 = vector.broadcast %437 : f32 to vector<16x16xf32>
      %440 = arith.mulf %438, %439 : vector<16x16xf32>
      %441 = arith.addf %431, %440 : vector<16x16xf32>
      %c1_124 = arith.constant 1 : index
      %c0_125 = arith.constant 0 : index
      %c0_126 = arith.constant 0 : index
      %442 = vector.load %arg7[%c1_124, %c0_125, %c0_126] : memref<2x22x128xf32, #tpu.memory_space<vmem>>, vector<1x22x128xf32>
      %443 = vector.shape_cast %442 : vector<1x22x128xf32> to vector<22x128xf32>
      %444 = vector.extract_strided_slice %443 {offsets = [0, 0], sizes = [16, 128], strides = [1, 1]} : vector<22x128xf32> to vector<16x128xf32>
      %c49 = arith.constant 49 : index
      %445 = memref.load %arg2[%c49] : memref<98xf32, #tpu.memory_space<smem>>
      %446 = vector.extract_strided_slice %444 {offsets = [0, 0], sizes = [16, 16], strides = [1, 1]} : vector<16x128xf32> to vector<16x16xf32>
      %447 = vector.broadcast %445 : f32 to vector<16x16xf32>
      %448 = arith.mulf %446, %447 : vector<16x16xf32>
      %449 = arith.addf %186, %448 : vector<16x16xf32>
      %c50 = arith.constant 50 : index
      %450 = memref.load %arg2[%c50] : memref<98xf32, #tpu.memory_space<smem>>
      %451 = vector.extract_strided_slice %444 {offsets = [0, 1], sizes = [16, 16], strides = [1, 1]} : vector<16x128xf32> to vector<16x16xf32>
      %452 = vector.broadcast %450 : f32 to vector<16x16xf32>
      %453 = arith.mulf %451, %452 : vector<16x16xf32>
      %454 = arith.addf %187, %453 : vector<16x16xf32>
      %c51 = arith.constant 51 : index
      %455 = memref.load %arg2[%c51] : memref<98xf32, #tpu.memory_space<smem>>
      %456 = vector.extract_strided_slice %444 {offsets = [0, 2], sizes = [16, 16], strides = [1, 1]} : vector<16x128xf32> to vector<16x16xf32>
      %457 = vector.broadcast %455 : f32 to vector<16x16xf32>
      %458 = arith.mulf %456, %457 : vector<16x16xf32>
      %459 = arith.addf %449, %458 : vector<16x16xf32>
      %c52 = arith.constant 52 : index
      %460 = memref.load %arg2[%c52] : memref<98xf32, #tpu.memory_space<smem>>
      %461 = vector.extract_strided_slice %444 {offsets = [0, 3], sizes = [16, 16], strides = [1, 1]} : vector<16x128xf32> to vector<16x16xf32>
      %462 = vector.broadcast %460 : f32 to vector<16x16xf32>
      %463 = arith.mulf %461, %462 : vector<16x16xf32>
      %464 = arith.addf %454, %463 : vector<16x16xf32>
      %c53 = arith.constant 53 : index
      %465 = memref.load %arg2[%c53] : memref<98xf32, #tpu.memory_space<smem>>
      %466 = vector.extract_strided_slice %444 {offsets = [0, 4], sizes = [16, 16], strides = [1, 1]} : vector<16x128xf32> to vector<16x16xf32>
      %467 = vector.broadcast %465 : f32 to vector<16x16xf32>
      %468 = arith.mulf %466, %467 : vector<16x16xf32>
      %469 = arith.addf %459, %468 : vector<16x16xf32>
      %c54 = arith.constant 54 : index
      %470 = memref.load %arg2[%c54] : memref<98xf32, #tpu.memory_space<smem>>
      %471 = vector.extract_strided_slice %444 {offsets = [0, 5], sizes = [16, 16], strides = [1, 1]} : vector<16x128xf32> to vector<16x16xf32>
      %472 = vector.broadcast %470 : f32 to vector<16x16xf32>
      %473 = arith.mulf %471, %472 : vector<16x16xf32>
      %474 = arith.addf %464, %473 : vector<16x16xf32>
      %c55 = arith.constant 55 : index
      %475 = memref.load %arg2[%c55] : memref<98xf32, #tpu.memory_space<smem>>
      %476 = vector.extract_strided_slice %444 {offsets = [0, 6], sizes = [16, 16], strides = [1, 1]} : vector<16x128xf32> to vector<16x16xf32>
      %477 = vector.broadcast %475 : f32 to vector<16x16xf32>
      %478 = arith.mulf %476, %477 : vector<16x16xf32>
      %479 = arith.addf %469, %478 : vector<16x16xf32>
      %480 = vector.extract_strided_slice %443 {offsets = [1, 0], sizes = [16, 128], strides = [1, 1]} : vector<22x128xf32> to vector<16x128xf32>
      %c56 = arith.constant 56 : index
      %481 = memref.load %arg2[%c56] : memref<98xf32, #tpu.memory_space<smem>>
      %482 = vector.extract_strided_slice %480 {offsets = [0, 0], sizes = [16, 16], strides = [1, 1]} : vector<16x128xf32> to vector<16x16xf32>
      %483 = vector.broadcast %481 : f32 to vector<16x16xf32>
      %484 = arith.mulf %482, %483 : vector<16x16xf32>
      %485 = arith.addf %479, %484 : vector<16x16xf32>
      %c57 = arith.constant 57 : index
      %486 = memref.load %arg2[%c57] : memref<98xf32, #tpu.memory_space<smem>>
      %487 = vector.extract_strided_slice %480 {offsets = [0, 1], sizes = [16, 16], strides = [1, 1]} : vector<16x128xf32> to vector<16x16xf32>
      %488 = vector.broadcast %486 : f32 to vector<16x16xf32>
      %489 = arith.mulf %487, %488 : vector<16x16xf32>
      %490 = arith.addf %474, %489 : vector<16x16xf32>
      %c58 = arith.constant 58 : index
      %491 = memref.load %arg2[%c58] : memref<98xf32, #tpu.memory_space<smem>>
      %492 = vector.extract_strided_slice %480 {offsets = [0, 2], sizes = [16, 16], strides = [1, 1]} : vector<16x128xf32> to vector<16x16xf32>
      %493 = vector.broadcast %491 : f32 to vector<16x16xf32>
      %494 = arith.mulf %492, %493 : vector<16x16xf32>
      %495 = arith.addf %485, %494 : vector<16x16xf32>
      %c59 = arith.constant 59 : index
      %496 = memref.load %arg2[%c59] : memref<98xf32, #tpu.memory_space<smem>>
      %497 = vector.extract_strided_slice %480 {offsets = [0, 3], sizes = [16, 16], strides = [1, 1]} : vector<16x128xf32> to vector<16x16xf32>
      %498 = vector.broadcast %496 : f32 to vector<16x16xf32>
      %499 = arith.mulf %497, %498 : vector<16x16xf32>
      %500 = arith.addf %490, %499 : vector<16x16xf32>
      %c60 = arith.constant 60 : index
      %501 = memref.load %arg2[%c60] : memref<98xf32, #tpu.memory_space<smem>>
      %502 = vector.extract_strided_slice %480 {offsets = [0, 4], sizes = [16, 16], strides = [1, 1]} : vector<16x128xf32> to vector<16x16xf32>
      %503 = vector.broadcast %501 : f32 to vector<16x16xf32>
      %504 = arith.mulf %502, %503 : vector<16x16xf32>
      %505 = arith.addf %495, %504 : vector<16x16xf32>
      %c61 = arith.constant 61 : index
      %506 = memref.load %arg2[%c61] : memref<98xf32, #tpu.memory_space<smem>>
      %507 = vector.extract_strided_slice %480 {offsets = [0, 5], sizes = [16, 16], strides = [1, 1]} : vector<16x128xf32> to vector<16x16xf32>
      %508 = vector.broadcast %506 : f32 to vector<16x16xf32>
      %509 = arith.mulf %507, %508 : vector<16x16xf32>
      %510 = arith.addf %500, %509 : vector<16x16xf32>
      %c62 = arith.constant 62 : index
      %511 = memref.load %arg2[%c62] : memref<98xf32, #tpu.memory_space<smem>>
      %512 = vector.extract_strided_slice %480 {offsets = [0, 6], sizes = [16, 16], strides = [1, 1]} : vector<16x128xf32> to vector<16x16xf32>
      %513 = vector.broadcast %511 : f32 to vector<16x16xf32>
      %514 = arith.mulf %512, %513 : vector<16x16xf32>
      %515 = arith.addf %505, %514 : vector<16x16xf32>
      %516 = vector.extract_strided_slice %443 {offsets = [2, 0], sizes = [16, 128], strides = [1, 1]} : vector<22x128xf32> to vector<16x128xf32>
      %c63 = arith.constant 63 : index
      %517 = memref.load %arg2[%c63] : memref<98xf32, #tpu.memory_space<smem>>
      %518 = vector.extract_strided_slice %516 {offsets = [0, 0], sizes = [16, 16], strides = [1, 1]} : vector<16x128xf32> to vector<16x16xf32>
      %519 = vector.broadcast %517 : f32 to vector<16x16xf32>
      %520 = arith.mulf %518, %519 : vector<16x16xf32>
      %521 = arith.addf %515, %520 : vector<16x16xf32>
      %c64 = arith.constant 64 : index
      %522 = memref.load %arg2[%c64] : memref<98xf32, #tpu.memory_space<smem>>
      %523 = vector.extract_strided_slice %516 {offsets = [0, 1], sizes = [16, 16], strides = [1, 1]} : vector<16x128xf32> to vector<16x16xf32>
      %524 = vector.broadcast %522 : f32 to vector<16x16xf32>
      %525 = arith.mulf %523, %524 : vector<16x16xf32>
      %526 = arith.addf %510, %525 : vector<16x16xf32>
      %c65 = arith.constant 65 : index
      %527 = memref.load %arg2[%c65] : memref<98xf32, #tpu.memory_space<smem>>
      %528 = vector.extract_strided_slice %516 {offsets = [0, 2], sizes = [16, 16], strides = [1, 1]} : vector<16x128xf32> to vector<16x16xf32>
      %529 = vector.broadcast %527 : f32 to vector<16x16xf32>
      %530 = arith.mulf %528, %529 : vector<16x16xf32>
      %531 = arith.addf %521, %530 : vector<16x16xf32>
      %c66 = arith.constant 66 : index
      %532 = memref.load %arg2[%c66] : memref<98xf32, #tpu.memory_space<smem>>
      %533 = vector.extract_strided_slice %516 {offsets = [0, 3], sizes = [16, 16], strides = [1, 1]} : vector<16x128xf32> to vector<16x16xf32>
      %534 = vector.broadcast %532 : f32 to vector<16x16xf32>
      %535 = arith.mulf %533, %534 : vector<16x16xf32>
      %536 = arith.addf %526, %535 : vector<16x16xf32>
      %c67 = arith.constant 67 : index
      %537 = memref.load %arg2[%c67] : memref<98xf32, #tpu.memory_space<smem>>
      %538 = vector.extract_strided_slice %516 {offsets = [0, 4], sizes = [16, 16], strides = [1, 1]} : vector<16x128xf32> to vector<16x16xf32>
      %539 = vector.broadcast %537 : f32 to vector<16x16xf32>
      %540 = arith.mulf %538, %539 : vector<16x16xf32>
      %541 = arith.addf %531, %540 : vector<16x16xf32>
      %c68 = arith.constant 68 : index
      %542 = memref.load %arg2[%c68] : memref<98xf32, #tpu.memory_space<smem>>
      %543 = vector.extract_strided_slice %516 {offsets = [0, 5], sizes = [16, 16], strides = [1, 1]} : vector<16x128xf32> to vector<16x16xf32>
      %544 = vector.broadcast %542 : f32 to vector<16x16xf32>
      %545 = arith.mulf %543, %544 : vector<16x16xf32>
      %546 = arith.addf %536, %545 : vector<16x16xf32>
      %c69 = arith.constant 69 : index
      %547 = memref.load %arg2[%c69] : memref<98xf32, #tpu.memory_space<smem>>
      %548 = vector.extract_strided_slice %516 {offsets = [0, 6], sizes = [16, 16], strides = [1, 1]} : vector<16x128xf32> to vector<16x16xf32>
      %549 = vector.broadcast %547 : f32 to vector<16x16xf32>
      %550 = arith.mulf %548, %549 : vector<16x16xf32>
      %551 = arith.addf %541, %550 : vector<16x16xf32>
      %552 = vector.extract_strided_slice %443 {offsets = [3, 0], sizes = [16, 128], strides = [1, 1]} : vector<22x128xf32> to vector<16x128xf32>
      %c70 = arith.constant 70 : index
      %553 = memref.load %arg2[%c70] : memref<98xf32, #tpu.memory_space<smem>>
      %554 = vector.extract_strided_slice %552 {offsets = [0, 0], sizes = [16, 16], strides = [1, 1]} : vector<16x128xf32> to vector<16x16xf32>
      %555 = vector.broadcast %553 : f32 to vector<16x16xf32>
      %556 = arith.mulf %554, %555 : vector<16x16xf32>
      %557 = arith.addf %551, %556 : vector<16x16xf32>
      %c71 = arith.constant 71 : index
      %558 = memref.load %arg2[%c71] : memref<98xf32, #tpu.memory_space<smem>>
      %559 = vector.extract_strided_slice %552 {offsets = [0, 1], sizes = [16, 16], strides = [1, 1]} : vector<16x128xf32> to vector<16x16xf32>
      %560 = vector.broadcast %558 : f32 to vector<16x16xf32>
      %561 = arith.mulf %559, %560 : vector<16x16xf32>
      %562 = arith.addf %546, %561 : vector<16x16xf32>
      %c72 = arith.constant 72 : index
      %563 = memref.load %arg2[%c72] : memref<98xf32, #tpu.memory_space<smem>>
      %564 = vector.extract_strided_slice %552 {offsets = [0, 2], sizes = [16, 16], strides = [1, 1]} : vector<16x128xf32> to vector<16x16xf32>
      %565 = vector.broadcast %563 : f32 to vector<16x16xf32>
      %566 = arith.mulf %564, %565 : vector<16x16xf32>
      %567 = arith.addf %557, %566 : vector<16x16xf32>
      %c73 = arith.constant 73 : index
      %568 = memref.load %arg2[%c73] : memref<98xf32, #tpu.memory_space<smem>>
      %569 = vector.extract_strided_slice %552 {offsets = [0, 3], sizes = [16, 16], strides = [1, 1]} : vector<16x128xf32> to vector<16x16xf32>
      %570 = vector.broadcast %568 : f32 to vector<16x16xf32>
      %571 = arith.mulf %569, %570 : vector<16x16xf32>
      %572 = arith.addf %562, %571 : vector<16x16xf32>
      %c74 = arith.constant 74 : index
      %573 = memref.load %arg2[%c74] : memref<98xf32, #tpu.memory_space<smem>>
      %574 = vector.extract_strided_slice %552 {offsets = [0, 4], sizes = [16, 16], strides = [1, 1]} : vector<16x128xf32> to vector<16x16xf32>
      %575 = vector.broadcast %573 : f32 to vector<16x16xf32>
      %576 = arith.mulf %574, %575 : vector<16x16xf32>
      %577 = arith.addf %567, %576 : vector<16x16xf32>
      %c75 = arith.constant 75 : index
      %578 = memref.load %arg2[%c75] : memref<98xf32, #tpu.memory_space<smem>>
      %579 = vector.extract_strided_slice %552 {offsets = [0, 5], sizes = [16, 16], strides = [1, 1]} : vector<16x128xf32> to vector<16x16xf32>
      %580 = vector.broadcast %578 : f32 to vector<16x16xf32>
      %581 = arith.mulf %579, %580 : vector<16x16xf32>
      %582 = arith.addf %572, %581 : vector<16x16xf32>
      %c76 = arith.constant 76 : index
      %583 = memref.load %arg2[%c76] : memref<98xf32, #tpu.memory_space<smem>>
      %584 = vector.extract_strided_slice %552 {offsets = [0, 6], sizes = [16, 16], strides = [1, 1]} : vector<16x128xf32> to vector<16x16xf32>
      %585 = vector.broadcast %583 : f32 to vector<16x16xf32>
      %586 = arith.mulf %584, %585 : vector<16x16xf32>
      %587 = arith.addf %577, %586 : vector<16x16xf32>
      %588 = vector.extract_strided_slice %443 {offsets = [4, 0], sizes = [16, 128], strides = [1, 1]} : vector<22x128xf32> to vector<16x128xf32>
      %c77 = arith.constant 77 : index
      %589 = memref.load %arg2[%c77] : memref<98xf32, #tpu.memory_space<smem>>
      %590 = vector.extract_strided_slice %588 {offsets = [0, 0], sizes = [16, 16], strides = [1, 1]} : vector<16x128xf32> to vector<16x16xf32>
      %591 = vector.broadcast %589 : f32 to vector<16x16xf32>
      %592 = arith.mulf %590, %591 : vector<16x16xf32>
      %593 = arith.addf %587, %592 : vector<16x16xf32>
      %c78 = arith.constant 78 : index
      %594 = memref.load %arg2[%c78] : memref<98xf32, #tpu.memory_space<smem>>
      %595 = vector.extract_strided_slice %588 {offsets = [0, 1], sizes = [16, 16], strides = [1, 1]} : vector<16x128xf32> to vector<16x16xf32>
      %596 = vector.broadcast %594 : f32 to vector<16x16xf32>
      %597 = arith.mulf %595, %596 : vector<16x16xf32>
      %598 = arith.addf %582, %597 : vector<16x16xf32>
      %c79 = arith.constant 79 : index
      %599 = memref.load %arg2[%c79] : memref<98xf32, #tpu.memory_space<smem>>
      %600 = vector.extract_strided_slice %588 {offsets = [0, 2], sizes = [16, 16], strides = [1, 1]} : vector<16x128xf32> to vector<16x16xf32>
      %601 = vector.broadcast %599 : f32 to vector<16x16xf32>
      %602 = arith.mulf %600, %601 : vector<16x16xf32>
      %603 = arith.addf %593, %602 : vector<16x16xf32>
      %c80 = arith.constant 80 : index
      %604 = memref.load %arg2[%c80] : memref<98xf32, #tpu.memory_space<smem>>
      %605 = vector.extract_strided_slice %588 {offsets = [0, 3], sizes = [16, 16], strides = [1, 1]} : vector<16x128xf32> to vector<16x16xf32>
      %606 = vector.broadcast %604 : f32 to vector<16x16xf32>
      %607 = arith.mulf %605, %606 : vector<16x16xf32>
      %608 = arith.addf %598, %607 : vector<16x16xf32>
      %c81 = arith.constant 81 : index
      %609 = memref.load %arg2[%c81] : memref<98xf32, #tpu.memory_space<smem>>
      %610 = vector.extract_strided_slice %588 {offsets = [0, 4], sizes = [16, 16], strides = [1, 1]} : vector<16x128xf32> to vector<16x16xf32>
      %611 = vector.broadcast %609 : f32 to vector<16x16xf32>
      %612 = arith.mulf %610, %611 : vector<16x16xf32>
      %613 = arith.addf %603, %612 : vector<16x16xf32>
      %c82 = arith.constant 82 : index
      %614 = memref.load %arg2[%c82] : memref<98xf32, #tpu.memory_space<smem>>
      %615 = vector.extract_strided_slice %588 {offsets = [0, 5], sizes = [16, 16], strides = [1, 1]} : vector<16x128xf32> to vector<16x16xf32>
      %616 = vector.broadcast %614 : f32 to vector<16x16xf32>
      %617 = arith.mulf %615, %616 : vector<16x16xf32>
      %618 = arith.addf %608, %617 : vector<16x16xf32>
      %c83 = arith.constant 83 : index
      %619 = memref.load %arg2[%c83] : memref<98xf32, #tpu.memory_space<smem>>
      %620 = vector.extract_strided_slice %588 {offsets = [0, 6], sizes = [16, 16], strides = [1, 1]} : vector<16x128xf32> to vector<16x16xf32>
      %621 = vector.broadcast %619 : f32 to vector<16x16xf32>
      %622 = arith.mulf %620, %621 : vector<16x16xf32>
      %623 = arith.addf %613, %622 : vector<16x16xf32>
      %624 = vector.extract_strided_slice %443 {offsets = [5, 0], sizes = [16, 128], strides = [1, 1]} : vector<22x128xf32> to vector<16x128xf32>
      %c84 = arith.constant 84 : index
      %625 = memref.load %arg2[%c84] : memref<98xf32, #tpu.memory_space<smem>>
      %626 = vector.extract_strided_slice %624 {offsets = [0, 0], sizes = [16, 16], strides = [1, 1]} : vector<16x128xf32> to vector<16x16xf32>
      %627 = vector.broadcast %625 : f32 to vector<16x16xf32>
      %628 = arith.mulf %626, %627 : vector<16x16xf32>
      %629 = arith.addf %623, %628 : vector<16x16xf32>
      %c85 = arith.constant 85 : index
      %630 = memref.load %arg2[%c85] : memref<98xf32, #tpu.memory_space<smem>>
      %631 = vector.extract_strided_slice %624 {offsets = [0, 1], sizes = [16, 16], strides = [1, 1]} : vector<16x128xf32> to vector<16x16xf32>
      %632 = vector.broadcast %630 : f32 to vector<16x16xf32>
      %633 = arith.mulf %631, %632 : vector<16x16xf32>
      %634 = arith.addf %618, %633 : vector<16x16xf32>
      %c86 = arith.constant 86 : index
      %635 = memref.load %arg2[%c86] : memref<98xf32, #tpu.memory_space<smem>>
      %636 = vector.extract_strided_slice %624 {offsets = [0, 2], sizes = [16, 16], strides = [1, 1]} : vector<16x128xf32> to vector<16x16xf32>
      %637 = vector.broadcast %635 : f32 to vector<16x16xf32>
      %638 = arith.mulf %636, %637 : vector<16x16xf32>
      %639 = arith.addf %629, %638 : vector<16x16xf32>
      %c87 = arith.constant 87 : index
      %640 = memref.load %arg2[%c87] : memref<98xf32, #tpu.memory_space<smem>>
      %641 = vector.extract_strided_slice %624 {offsets = [0, 3], sizes = [16, 16], strides = [1, 1]} : vector<16x128xf32> to vector<16x16xf32>
      %642 = vector.broadcast %640 : f32 to vector<16x16xf32>
      %643 = arith.mulf %641, %642 : vector<16x16xf32>
      %644 = arith.addf %634, %643 : vector<16x16xf32>
      %c88 = arith.constant 88 : index
      %645 = memref.load %arg2[%c88] : memref<98xf32, #tpu.memory_space<smem>>
      %646 = vector.extract_strided_slice %624 {offsets = [0, 4], sizes = [16, 16], strides = [1, 1]} : vector<16x128xf32> to vector<16x16xf32>
      %647 = vector.broadcast %645 : f32 to vector<16x16xf32>
      %648 = arith.mulf %646, %647 : vector<16x16xf32>
      %649 = arith.addf %639, %648 : vector<16x16xf32>
      %c89 = arith.constant 89 : index
      %650 = memref.load %arg2[%c89] : memref<98xf32, #tpu.memory_space<smem>>
      %651 = vector.extract_strided_slice %624 {offsets = [0, 5], sizes = [16, 16], strides = [1, 1]} : vector<16x128xf32> to vector<16x16xf32>
      %652 = vector.broadcast %650 : f32 to vector<16x16xf32>
      %653 = arith.mulf %651, %652 : vector<16x16xf32>
      %654 = arith.addf %644, %653 : vector<16x16xf32>
      %c90 = arith.constant 90 : index
      %655 = memref.load %arg2[%c90] : memref<98xf32, #tpu.memory_space<smem>>
      %656 = vector.extract_strided_slice %624 {offsets = [0, 6], sizes = [16, 16], strides = [1, 1]} : vector<16x128xf32> to vector<16x16xf32>
      %657 = vector.broadcast %655 : f32 to vector<16x16xf32>
      %658 = arith.mulf %656, %657 : vector<16x16xf32>
      %659 = arith.addf %649, %658 : vector<16x16xf32>
      %660 = vector.extract_strided_slice %443 {offsets = [6, 0], sizes = [16, 128], strides = [1, 1]} : vector<22x128xf32> to vector<16x128xf32>
      %c91 = arith.constant 91 : index
      %661 = memref.load %arg2[%c91] : memref<98xf32, #tpu.memory_space<smem>>
      %662 = vector.extract_strided_slice %660 {offsets = [0, 0], sizes = [16, 16], strides = [1, 1]} : vector<16x128xf32> to vector<16x16xf32>
      %663 = vector.broadcast %661 : f32 to vector<16x16xf32>
      %664 = arith.mulf %662, %663 : vector<16x16xf32>
      %665 = arith.addf %659, %664 : vector<16x16xf32>
      %c92 = arith.constant 92 : index
      %666 = memref.load %arg2[%c92] : memref<98xf32, #tpu.memory_space<smem>>
      %667 = vector.extract_strided_slice %660 {offsets = [0, 1], sizes = [16, 16], strides = [1, 1]} : vector<16x128xf32> to vector<16x16xf32>
      %668 = vector.broadcast %666 : f32 to vector<16x16xf32>
      %669 = arith.mulf %667, %668 : vector<16x16xf32>
      %670 = arith.addf %654, %669 : vector<16x16xf32>
      %c93 = arith.constant 93 : index
      %671 = memref.load %arg2[%c93] : memref<98xf32, #tpu.memory_space<smem>>
      %672 = vector.extract_strided_slice %660 {offsets = [0, 2], sizes = [16, 16], strides = [1, 1]} : vector<16x128xf32> to vector<16x16xf32>
      %673 = vector.broadcast %671 : f32 to vector<16x16xf32>
      %674 = arith.mulf %672, %673 : vector<16x16xf32>
      %675 = arith.addf %665, %674 : vector<16x16xf32>
      %c94 = arith.constant 94 : index
      %676 = memref.load %arg2[%c94] : memref<98xf32, #tpu.memory_space<smem>>
      %677 = vector.extract_strided_slice %660 {offsets = [0, 3], sizes = [16, 16], strides = [1, 1]} : vector<16x128xf32> to vector<16x16xf32>
      %678 = vector.broadcast %676 : f32 to vector<16x16xf32>
      %679 = arith.mulf %677, %678 : vector<16x16xf32>
      %680 = arith.addf %670, %679 : vector<16x16xf32>
      %c95 = arith.constant 95 : index
      %681 = memref.load %arg2[%c95] : memref<98xf32, #tpu.memory_space<smem>>
      %682 = vector.extract_strided_slice %660 {offsets = [0, 4], sizes = [16, 16], strides = [1, 1]} : vector<16x128xf32> to vector<16x16xf32>
      %683 = vector.broadcast %681 : f32 to vector<16x16xf32>
      %684 = arith.mulf %682, %683 : vector<16x16xf32>
      %685 = arith.addf %675, %684 : vector<16x16xf32>
      %c96 = arith.constant 96 : index
      %686 = memref.load %arg2[%c96] : memref<98xf32, #tpu.memory_space<smem>>
      %687 = vector.extract_strided_slice %660 {offsets = [0, 5], sizes = [16, 16], strides = [1, 1]} : vector<16x128xf32> to vector<16x16xf32>
      %688 = vector.broadcast %686 : f32 to vector<16x16xf32>
      %689 = arith.mulf %687, %688 : vector<16x16xf32>
      %690 = arith.addf %680, %689 : vector<16x16xf32>
      %c97 = arith.constant 97 : index
      %691 = memref.load %arg2[%c97] : memref<98xf32, #tpu.memory_space<smem>>
      %692 = vector.extract_strided_slice %660 {offsets = [0, 6], sizes = [16, 16], strides = [1, 1]} : vector<16x128xf32> to vector<16x16xf32>
      %693 = vector.broadcast %691 : f32 to vector<16x16xf32>
      %694 = arith.mulf %692, %693 : vector<16x16xf32>
      %695 = arith.addf %685, %694 : vector<16x16xf32>
      %696 = arith.addf %441, %436 : vector<16x16xf32>
      %697 = arith.addf %695, %690 : vector<16x16xf32>
      %698 = arith.addf %696, %697 : vector<16x16xf32>
      %699 = arith.negf %698 : vector<16x16xf32>
      %700 = math.exp %699 : vector<16x16xf32>
      %cst_127 = arith.constant 1.000000e+00 : f32
      %701 = vector.broadcast %cst_127 : f32 to vector<16x16xf32>
      %702 = arith.addf %701, %700 : vector<16x16xf32>
      %703 = arith.divf %701, %702 : vector<16x16xf32>
      %c0_128 = arith.constant 0 : index
      %c0_129 = arith.constant 0 : index
      %c0_130 = arith.constant 0 : index
      %c0_131 = arith.constant 0 : index
      %704 = vector.load %arg4[%c0_128, %c0_129, %c0_130, %c0_131] : memref<1x1x16x16xf32, #tpu.memory_space<vmem>>, vector<1x1x16x16xf32>
      %705 = vector.shape_cast %704 : vector<1x1x16x16xf32> to vector<16x16xf32>
      %706 = vector.shape_cast %703 : vector<16x16xf32> to vector<1x1x16x16xf32>
      tpu.vector_store %arg4[%c0_128, %c0_129, %c0_130, %c0_131], %706 {strides = array<i32>} : memref<1x1x16x16xf32, #tpu.memory_space<vmem>>, vector<1x1x16x16xf32>,
    } else {
    }
    return
  }
  func.func @transform_0(%arg0: i32, %arg1: i32) -> i32 {
    %c0_i32 = arith.constant 0 : i32
    %c0_i32_0 = arith.constant 0 : i32
    return %c0_i32 : i32
  }
  func.func @transform_1(%arg0: i32, %arg1: i32) -> (i32, i32, i32) {
    %c0_i32 = arith.constant 0 : i32
    %c0_i32_0 = arith.constant 0 : i32
    return %arg0, %arg1, %c0_i32 : i32, i32, i32
  }
  func.func @transform_2(%arg0: i32, %arg1: i32) -> (i32, i32, i32, i32) {
    %c0_i32 = arith.constant 0 : i32
    %c0_i32_0 = arith.constant 0 : i32
    %c0_i32_1 = arith.constant 0 : i32
    %c0_i32_2 = arith.constant 0 : i32
    return %arg0, %c0_i32, %c0_i32_0, %c0_i32_1 : i32, i32, i32, i32
  }
}

</mosaic_0001>

<bundles_post_ra>
// kernel: tpu_custom_call.1
= control target key start
LH: loop header
LB: loop body
LE: loop exit
PB: predicated region body
PF: predicated region fallthrough
CT: control target
= control target key end

     0   :  { %7 = vsyncpa [#allocation8], 0  ;;  %s5293_s0 = inlined_call_operand.hbm [shape: f32[98], index: 0, kind: input, shape index: {}]   ;;  %s5294_s1 = inlined_call_operand.hbm [shape: f32[2,4,256], index: 1, kind: input, shape index: {}]   ;;  %s5295_s2 = inlined_call_operand.hbm [shape: f32[2,1,16,16], index: 2, kind: output, shape index: {}]  }
   0x1   :  { %8 = vsyncpa [#allocation6], 0 }
   0x2   :  { %10 = vsyncpa [#allocation6 + $0x1], 0 }
   0x3   :  { %11 = vsyncpa [#allocation7], 0 }
   0x4   :  { %13 = vsyncpa [#allocation7 + $0x1], 0  ;;  %s2973_s9 = smov 0   ;;  %s2975_s10 = smov 0  }
   0x5   :  { %s2977_s11 = smov 0   ;;  %s2979_s12 = smov 0  }
   0x6   :  { %s2981_s13 = smov 0   ;;  %s2983_s14 = smov 0  }
   0x7 LB: > { %s2567_s15 = sadd.s32 4294967295, %s2930_s14   ;;  %s2568_s16 = sadd.s32 4294967294, %s2930_s14   ;;  %s2930_s14 = sphi %s2983_s14, %s19_s14   ;;  %s2926_s13 = sphi %s2981_s13, %s5529_s13   ;;  %s2922_s12 = sphi %s2979_s12, %s5528_s12   ;;  %s2918_s11 = sphi %s2977_s11, %s5527_s11   ;;  %s2914_s10 = sphi %s2975_s10, %s5526_s10   ;;  %s2910_s9 = sphi %s2973_s9, %s5525_s9  }
   0x8   : > { %p74_p0 = scmp.ne.s32.totalorder %s2914_s10, %s2910_s9  ;;  %p3007_p1 = scmp.eq.s32.totalorder %s2567_s15, 0 }
   0x9   : > { %p3011_p2 = scmp.eq.s32.totalorder %s2567_s15, 1  ;;  %p104_p3 = scmp.eq.s32.totalorder %s2568_s16, 1 }
   0xa   : > { %s5361_s17 = scalar_select %p3007_p1, 1, 0 }
   0xb   : > { %p3017_p4 = por %p3007_p1, %p74_p0  ;;  %p2569_p5 = scmp.ge.s32.totalorder %s2930_s14, 1 }
   0xc   : > { %p3022_p6 = por %p104_p3, %p74_p0  ;;  %p111_p7 = scmp.lt.s32.totalorder %s2930_s14, 3 }
   0xd   : > { %s5363_s19 = scalar_select %p3017_p4, 1, 0 }
   0xe   : > { %s5364_s20 = scalar_select %p3022_p6, 1, 0 }
   0xf   : > { %p3027_p8 = pnand %p2569_p5, %p111_p7  ;;  %s31_s22 = sadd.s32 1, %s2926_s13 }
  0x10   : > { %p3041_p12 = scmp.ge.s32.totalorder %s31_s22, 2  ;;  %s61_s25 = sadd.s32 1, %s2918_s11 }
  0x11   : > { %p2693_p10 = pneg %p3027_p8  ;;  %p68_p13 = scmp.ne.s32.totalorder %s2918_s11, %s2914_s10 }
  0x12   : > { %p69_p0 = scmp.eq.s32.totalorder %s2930_s14, 0  ;;  %s2801_s28 = scalar_lea.hbm %s5293_s0, 16 }
  0x13   : > { %p3037_p11 = pnand %p2693_p10, %p3007_p1  ;;  %p2802_p3 = scmp.ne.s32.totalorder %s5293_s0, %s2801_s28 }
  0x14   : > { %p2808_p9 = scmp.lt.u32.totalorder %s2801_s28, %s5293_s0 }
  0x15   : > { %p2803_p5 = pneg %p3037_p11 }
  0x17   : > { %p2804_p7 = pnand %p2803_p5, %p2802_p3 }
  0x19   : > { %p2805_p10 = pneg %p2804_p7 }
  0x1b   : > { %p2810_p6 = pnand %p2808_p9, %p2805_p10 }
  0x1d   : > { %2813 = shalt.err (!%p2810_p6)
}
  0x1e   : > { %s2932_s5 = smov [#allocation5]   ;;  %s5531_s22 = smov (%p3041_p12, %s31_s22), 0 }
  0x1f   : > { %2696 = dma.hbm_to_smem (!%p3037_p11), %s5293_s0, 16, %s2932_s5, [#allocation8]  }
  0x20   : > { %p3072_p6 = por %p69_p0, %p68_p13  ;;  %p3081_p9 = por %p3011_p2, %p68_p13 }
  0x21   : > { %s56_s16 = ssub.s32 %s2926_s13, %s5531_s22  ;;  %p2706_p3 = scmp.lt.s32.totalorder %s2930_s14, 2 }
  0x22   : > { %s5369_s15 = scalar_select %p3081_p9, 1, 0 }
  0x23   : > { %p59_p5 = scmp.eq.s32.totalorder %s56_s16, 0  ;;  %s133_s23 = sand.u32 1, %s2918_s11  }
  0x24   : > { %s2572_s24 = sshll.u32 %s133_s23, 3  ;;  %s2683_s27 = sshll.u32 %s2926_s13, 7 }
  0x25   : > { %s3090_s26 = scalar_select %p59_p5, %s2918_s11, %s61_s25  }
  0x26   : > { %s3096_s30 = scalar_lea.hbm %s5294_s1, %s2683_s27  ;;  %s137_s18 = scalar_lea.vmem [#allocation9], %s2572_s24 }
  0x27   : > { %s147_s3 = sshll.u32 %s137_s18, 4  ;;  %p3102_p2 = pnand %p2706_p3, %p3072_p6  ;;  %s3098_s3 = int_to_ptr.vmem [resolvable:$true] %s147_s3 }
  0x28   : > { %s134_s25 = scalar_lea.sflag [#allocation6], %s133_s23  ;;  %s2814_s5 = scalar_lea.hbm %s3096_s30, 128 }
  0x29   : > { %p2815_p11 = scmp.ne.s32.totalorder %s3096_s30, %s2814_s5  ;;  %p2816_p12 = pneg %p3102_p2 }
  0x2a   : > { %s2819_s16 = scalar_lea.hbm %s5294_s1, 256  ;;  %p2820_p7 = scmp.lt.u32.totalorder %s3096_s30, %s5294_s1 }
  0x2b   : > { %p2817_p13 = pnand %p2816_p12, %p2815_p11  ;;  %p2821_p10 = scmp.lt.u32.totalorder %s2819_s16, %s2814_s5 }
  0x2c   : > { %p2823_p3 = scmp.lt.u32.totalorder %s2814_s5, %s3096_s30 }
  0x2d   : > { %p2818_p0 = pneg %p2817_p13  ;;  %p2822_p6 = por %p2821_p10, %p2820_p7 }
  0x2f   : > { %p2824_p5 = por %p2823_p3, %p2822_p6 }
  0x31   : > { %p2825_p9 = pnand %p2824_p5, %p2818_p0 }
  0x33   : > { %2828 = shalt.err (!%p2825_p9)
}
  0x34   : > { %s2829_s23 = scalar_lea.vmem %s3098_s3, 128  ;;  %s2933_s27 = smov [#allocation9]  }
  0x35   : > { %p2830_p11 = scmp.ne.s32.totalorder %s3098_s3, %s2829_s23  ;;  %s2834_s28 = sshll.u32 %s2933_s27, 4  ;;  %s2835_s28 = int_to_ptr.vmem [resolvable:$false] %s2834_s28 }
  0x36   : > { %s2836_s29 = scalar_lea.vmem %s2835_s28, 256  ;;  %p2837_p1 = scmp.lt.s32.totalorder %s3098_s3, %s2835_s28 }
  0x37   : > { %p2832_p13 = pnand %p2830_p11, %p2816_p12  ;;  %p2838_p7 = scmp.lt.s32.totalorder %s2836_s29, %s2829_s23 }
  0x39   : > { %p2833_p4 = pneg %p2832_p13  ;;  %p2839_p10 = por %p2838_p7, %p2837_p1 }
  0x3b   : > { %p2840_p6 = pnand %p2839_p10, %p2833_p4 }
  0x3d   : > { %2843 = shalt.err (!%p2840_p6)
}
  0x3e   : > { %2700 = dma.hbm_to_vmem [thread:$0]  (!%p3102_p2), %s3096_s30, 128, %s3098_s3, %s134_s25  }
  0x3f   : > { %156 = sbr.rel (%p3027_p8) target bundleno = 864 (0x360), region = 28 }
  0x46   : > { %p5371_p9 = scmp.ne.s32.totalorder %s5361_s17, 0 }
  0x48   : > { %2897 = dma.done.wait (%p5371_p9), [#allocation8], 16  }
  0x49   : > { %2899 = vsyncadd (%p5371_p9), [#allocation8], 4294967280  ;;  %s3138_s18 = sand.u32 1, %s2914_s10   ;;  %p5372_p1 = scmp.ne.s32.totalorder %s5363_s19, 0 }
  0x4a   : > { %s2577_s5 = sshll.u32 %s3138_s18, 3  ;;  %s163_s4 = scalar_lea.sflag [#allocation6], %s3138_s18 }
  0x4b   : > { %s166_s6 = scalar_lea.vmem [#allocation9], %s2577_s5 }
  0x4c   : > { %2901 = dma.done.wait (%p5372_p1), %s163_s4, 128  }
  0x4d   : > { %2903 = vsyncadd (%p5372_p1), %s163_s4, 4294967168 }
  0x4e   : > { %171 = sfence }
  0x4f   : > { %v188_v0 = vld [vmem:[%s166_s6] sm:$0xff]  ;;  %vm192_vm0 = vcmask 1043456   ;;  %v2934_v12 = vmov 1966171168   ;;  %v231_v14 = vlaneseq  ;;  %v2935_v42 = vmov 0.0   ;;  %s2936_s17 = smov 112  }
  0x50   : > { %v190_v1 = vcombine.high %v188_v0, %v188_v0  ;;  %v193_v2 = vsel %vm192_vm0, %v188_v0, 0.0  ;;  %v207_v3 = vsel %vm192_vm0, %v188_v0, -inf  ;;  %v229_v13 = vunpack.c.l.s4 %v2934_v12  ;;  %320 = vst [vmem:[#allocation4] sm:$0xff] %v2935_v42  ;;  %321 = vst [vmem:[#allocation4 + $0x8] sm:$0xff] %v2935_v42  ;;  %s2937_s19 = smov 3   ;;  %s2938_s21 = smov 96  }
  0x51   : > { %v194_v4 = vrot.slane %v193_v2, 4  ;;  %v208_v5 = vrot.slane %v207_v3, 4  ;;  %v232_v24 = vshrl.u32 %v231_v14, 7  ;;  %vm245_vm1 = vcmp.lt.s32.totalorder %v231_v14, 256  ;;  %322 = vst [vmem:[#allocation4 + $0x10] sm:$0x3f] %v2935_v42 }
  0x52   : > { %v200_v6 = vsel %vm192_vm0, %v190_v1, 0.0  ;;  %v214_v7 = vsel %vm192_vm0, %v190_v1, -inf  ;;  %v230_v23 = vunpack.c.0.s8 %v229_v13  ;;  %323 = vst [vmem:[#allocation4 + $0x18] sm:$0xff] %v2935_v42  ;;  %324 = vst [vmem:[#allocation4 + $0x20] sm:$0xff] %v2935_v42  ;;  %s2939_s30 = smov 115   ;;  %s2940_s3 = smov 80  }
  0x53   : > { %v195_v8 = vadd.f32 %v194_v4, %v193_v2  ;;  %v201_v9 = vrot.slane %v200_v6, 4  ;;  %v209_v10 = vmax.f32 %v207_v3, %v208_v5  ;;  %v215_v11 = vrot.slane %v214_v7, 4  ;;  %325 = vst [vmem:[#allocation4 + $0x28] sm:$0x3f] %v2935_v42  ;;  %s2941_s25 = smov 67   ;;  %s2942_s7 = smov 64  }
  0x54   : > { %v233_v35 = vsub.s32 %v230_v23, %v232_v24  ;;  %v3150_v43 = vsub.s32 0, %v232_v24  ;;  %s2943_s16 = smov 35   ;;  %s2944_s8 = smov 48   ;;  %vm337_vm2 = vcmask 147480   ;;  %vm670_vm3 = vcmask 1046528  }
  0x55   : > { %v196_v15 = vrot.slane %v195_v8, 2  ;;  %v202_v16 = vadd.f32 %v201_v9, %v200_v6  ;;  %v210_v17 = vrot.slane %v209_v10, 2  ;;  %v216_v18 = vmax.f32 %v214_v7, %v215_v11  ;;  %s2945_s24 = smov 99   ;;  %s2946_s23 = smov 83  }
  0x56   : > { %s2947_s27 = smov 51   ;;  %s2948_s28 = smov 19   ;;  %vm810_vm4 = vcmask 1045504   ;;  %vm950_vm5 = vcmask 1044480   ;;  %vm1229_vm6 = vcmask 1042432   ;;  %vm1369_vm7 = vcmask 1041408  }
  0x57   : > { %v197_v19 = vadd.f32 %v196_v15, %v195_v8  ;;  %v203_v20 = vrot.slane %v202_v16, 2  ;;  %v211_v21 = vmax.f32 %v209_v10, %v210_v17  ;;  %v217_v22 = vrot.slane %v216_v18, 2  ;;  %s2949_s29 = smov 32   ;;  %s2950_s5 = smov 16  }
  0x58   : > { %s3206_s4 = sld [smem:[#allocation5 + $0x34]]  ;;  %s3211_s6 = sld [smem:[#allocation5 + $0x36]]  ;;  %vm2454_vm8 = vcmask 130048  }
  0x59   : > { %v198_v25 = vrot.slane %v197_v19, 1  ;;  %v204_v26 = vadd.f32 %v203_v20, %v202_v16  ;;  %v212_v27 = vrot.slane %v211_v21, 1  ;;  %v218_v28 = vmax.f32 %v216_v18, %v217_v22  ;;  %p5522_p8 = scmp.ne.s32.totalorder %s5369_s15, 0 }
  0x5b   : > { %v199_v29 = vadd.f32 %v198_v25, %v197_v19  ;;  %v205_v30 = vrot.slane %v204_v26, 1  ;;  %v213_v31 = vmax.f32 %v211_v21, %v212_v27  ;;  %v219_v32 = vrot.slane %v218_v28, 1 }
  0x5d   : > { %v206_v33 = vadd.f32 %v205_v30, %v204_v26  ;;  %v220_v34 = vmax.f32 %v218_v28, %v219_v32 }
  0x5e   : > { %v1559_v42 = vstv %s3211_s6  ;;  %s2604_s6 = sld [smem:[#allocation5 + $0x1a]] }
  0x5f   : > { %v227_v36 = vcombine.low %v199_v29, %v206_v33  ;;  %v250_v37 = vcombine.low %v213_v31, %v220_v34 }
  0x61   : > { %v234_v38 = vrot.slane %v227_v36, %v233_v35  ;;  %v257_v39 = vrot.slane %v250_v37, %v233_v35 }
  0x63   : > { %v241_v40 = vrot.slane %v234_v38, %v233_v35  ;;  %v264_v41 = vrot.slane %v257_v39, %v233_v35  ;;  %v1531_v38 = vstv %s3206_s4  ;;  %s2603_s4 = sld [smem:[#allocation5 + $0x19]] }
  0x65   : > { %247 = vst.msk [vmem:[#allocation2] sm:$0x3] %vm245_vm1, %v241_v40  ;;  %266 = vst.msk [vmem:[#allocation3] sm:$0x3] %vm245_vm1, %v264_v41 }
  0x6c   : > { %v326_v44 = vld [vmem:[#allocation2] sm:$0x3]  ;;  %v328_v46 = vld [vmem:[#allocation3] sm:$0x3] }
  0x6d   : > { %376 = vrot.lane.b32.xlu1 %v326_v44, %s2936_s17  ;;  %v333_v45 = vrot.slane %v326_v44, %v3150_v43  ;;  %v457_v47 = vrot.slane %v328_v46, %v3150_v43  ;;  %v367_v48 = vrot.slane %v326_v44, 1  ;;  %v491_v50 = vrot.slane %v328_v46, 1 }
  0x6f   : > { %334 = vrot.lane.b32.xlu0 %v333_v45, %s2937_s19  ;;  %v371_v49 = vrot.slane %v367_v48, %v3150_v43  ;;  %v495_v51 = vrot.slane %v491_v50, %v3150_v43 }
  0x71   : > { %387 = vrot.lane.b32.xlu1 %v326_v44, %s2938_s21 }
  0x73   : > { %339 = vrot.lane.b32.xlu0 %v333_v45, %s2939_s30 }
  0x75   : > { %398 = vrot.lane.b32.xlu1 %v326_v44, %s2940_s3 }
  0x77   : > { %351 = vrot.lane.b32.xlu0 %v333_v45, %s2941_s25 }
  0x79   : > { %409 = vrot.lane.b32.xlu1 %v326_v44, %s2942_s7 }
  0x7b   : > { %359 = vrot.lane.b32.xlu0 %v333_v45, %s2943_s16 }
  0x7d   : > { %420 = vrot.lane.b32.xlu1 %v326_v44, %s2944_s8 }
  0x7f   : > { %463 = vrot.lane.b32.xlu0 %v457_v47, %s2939_s30  ;;  %s2951_s30 = smov 126  }
  0x81   : > { %343 = vrot.lane.b32.xlu1 %v333_v45, %s2945_s24 }
  0x83   : > { %471 = vrot.lane.b32.xlu0 %v457_v47, %s2946_s23 }
  0x85   : > { %347 = vrot.lane.b32.xlu1 %v333_v45, %s2946_s23  ;;  %s3266_s23 = sld [smem:[#allocation5 + $0x5]] }
  0x87   : > { %479 = vrot.lane.b32.xlu0 %v457_v47, %s2947_s27 }
  0x89   : > { %355 = vrot.lane.b32.xlu1 %v333_v45, %s2947_s27  ;;  %s3271_s27 = sld [smem:[#allocation5 + $0x6]] }
  0x8b   : > { %487 = vrot.lane.b32.xlu0 %v457_v47, %s2948_s28 }
  0x8d   : > { %363 = vrot.lane.b32.xlu1 %v333_v45, %s2948_s28  ;;  %s2588_s28 = sld [smem:[#allocation5 + $0xa]] }
  0x8f   : > { %372 = vrot.lane.b32.xlu0 %v371_v49, %s2937_s19 }
  0x91   : > { %431 = vrot.lane.b32.xlu1 %v326_v44, %s2949_s29 }
  0x93   : > { %500 = vrot.lane.b32.xlu0 %v328_v46, %s2936_s17  ;;  %s3216_s17 = sld [smem:[#allocation5 + $0x33]] }
  0x95   : > { %442 = vrot.lane.b32.xlu1 %v326_v44, %s2950_s5 }
  0x97   : > { %522 = vrot.lane.b32.xlu0 %v328_v46, %s2940_s3  ;;  %s3232_s3 = sld [smem:[#allocation5 + $0x37]] }
  0x99   : > { %458 = vrot.lane.b32.xlu1 %v457_v47, %s2937_s19 }
  0x9b   : > { %544 = vrot.lane.b32.xlu0 %v328_v46, %s2944_s8  ;;  %s3257_s8 = sld [smem:[#allocation5 + $0x4]] }
  0x9d   : > { %467 = vrot.lane.b32.xlu1 %v457_v47, %s2945_s24  ;;  %s2953_s24 = smov 122  }
  0x9f   : > { %566 = vrot.lane.b32.xlu0 %v328_v46, %s2950_s5  ;;  %s2590_s5 = sld [smem:[#allocation5 + $0xc]] }
  0xa1   : > { %475 = vrot.lane.b32.xlu1 %v457_v47, %s2941_s25  ;;  %s2952_s25 = smov 124  }
  0xa5   : > { %483 = vrot.lane.b32.xlu1 %v457_v47, %s2943_s16  ;;  %v1517_v47 = vstv %s3216_s17  ;;  %s3245_s16 = sld [smem:[#allocation5 + $0x3]] }
  0xa6   : > { %s2605_s17 = sld [smem:[#allocation5 + $0x1b]] }
  0xa9   : > { %496 = vrot.lane.b32.xlu1 %v495_v51, %s2937_s19 }
  0xad   : > { %511 = vrot.lane.b32.xlu1 %v328_v46, %s2938_s21  ;;  %s3225_s21 = sld [smem:[#allocation5 + $0x35]] }
  0xb1   : > { %533 = vrot.lane.b32.xlu1 %v328_v46, %s2942_s7  ;;  %s3236_s7 = sld [smem:[#allocation5 + $0x2]] }
  0xb5   : > { %555 = vrot.lane.b32.xlu1 %v328_v46, %s2949_s29  ;;  %s2589_s29 = sld [smem:[#allocation5 + $0xb]] }
  0xdf   : > { %v377_v52 = vpop.permute.xlu1 %376 }
  0xe0   : > { %v378_v53 = vrot.slane %v377_v52, 1  ;;  %v1545_v52 = vstv %s3225_s21  ;;  %s2608_s21 = sld [smem:[#allocation5 + $0x1e]] }
  0xe1   : > { %v335_v54 = vpop.permute.xlu0 %334 }
  0xe2   : > { %v382_v55 = vrot.slane %v378_v53, %v3150_v43  ;;  %338 = vst.msk [vmem:[#allocation4 + $0x3] sm:$0x1] %vm337_vm2, %v335_v54 }
  0xe3   : > { %v388_v56 = vpop.permute.xlu1 %387 }
  0xe4   : > { %v389_v57 = vrot.slane %v388_v56, 1  ;;  %383 = vrot.lane.b32.xlu0 %v382_v55, %s2937_s19 }
  0xe5   : > { %v340_v58 = vpop.permute.xlu0 %339 }
  0xe6   : > { %v393_v59 = vrot.slane %v389_v57, %v3150_v43  ;;  %342 = vst.msk [vmem:[#allocation4 + $0x4] sm:$0x1] %vm337_vm2, %v340_v58  ;;  %v1573_v57 = vstv %s3232_s3  ;;  %s2609_s3 = sld [smem:[#allocation5 + $0x1f]] }
  0xe7   : > { %v399_v60 = vpop.permute.xlu1 %398 }
  0xe8   : > { %v400_v61 = vrot.slane %v399_v60, 1  ;;  %394 = vrot.lane.b32.xlu0 %v393_v59, %s2937_s19  ;;  %v593_v60 = vstv %s3236_s7  ;;  %s2591_s7 = sld [smem:[#allocation5 + $0xd]] }
  0xe9   : > { %v352_v62 = vpop.permute.xlu0 %351 }
  0xea   : > { %v404_v63 = vrot.slane %v400_v61, %v3150_v43  ;;  %354 = vst.msk [vmem:[#allocation4 + $0x7] sm:$0x1] %vm337_vm2, %v352_v62 }
  0xeb   : > { %v410_v0 = vpop.permute.xlu1 %409 }
  0xec   : > { %v411_v1 = vrot.slane %v410_v0, 1  ;;  %405 = vrot.lane.b32.xlu0 %v404_v63, %s2937_s19  ;;  %v607_v63 = vstv %s3245_s16  ;;  %v621_v0 = vstv %s3257_s8  ;;  %s2594_s16 = sld [smem:[#allocation5 + $0x10]]  ;;  %s2595_s8 = sld [smem:[#allocation5 + $0x11]] }
  0xed   : > { %v360_v2 = vpop.permute.xlu0 %359 }
  0xee   : > { %v415_v3 = vrot.slane %v411_v1, %v3150_v43  ;;  %362 = vst.msk [vmem:[#allocation4 + $0x9] sm:$0x1] %vm337_vm2, %v360_v2  ;;  %v635_v2 = vstv %s3266_s23  ;;  %s2596_s23 = sld [smem:[#allocation5 + $0x12]] }
  0xef   : > { %v421_v4 = vpop.permute.xlu1 %420 }
  0xf0   : > { %v422_v5 = vrot.slane %v421_v4, 1  ;;  %416 = vrot.lane.b32.xlu0 %v415_v3, %s2937_s19  ;;  %v649_v4 = vstv %s3271_s27  ;;  %s2597_s27 = sld [smem:[#allocation5 + $0x13]] }
  0xf1   : > { %v464_v6 = vpop.permute.xlu0 %463 }
  0xf2   : > { %v426_v7 = vrot.slane %v422_v5, %v3150_v43  ;;  %466 = vst.msk [vmem:[#allocation4 + $0x1c] sm:$0x1] %vm337_vm2, %v464_v6 }
  0xf3   : > { %v344_v8 = vpop.permute.xlu1 %343 }
  0xf4   : > { %346 = vst.msk [vmem:[#allocation4 + $0x5] sm:$0x1] %vm337_vm2, %v344_v8  ;;  %427 = vrot.lane.b32.xlu0 %v426_v7, %s2937_s19 }
  0xf5   : > { %v472_v9 = vpop.permute.xlu0 %471 }
  0xf6   : > { %474 = vst.msk [vmem:[#allocation4 + $0x1e] sm:$0x1] %vm337_vm2, %v472_v9 }
  0xf7   : > { %v348_v10 = vpop.permute.xlu1 %347 }
  0xf8   : > { %350 = vst.msk [vmem:[#allocation4 + $0x6] sm:$0x1] %vm337_vm2, %v348_v10 }
  0xf9   : > { %v480_v11 = vpop.permute.xlu0 %479 }
  0xfa   : > { %482 = vst.msk [vmem:[#allocation4 + $0x20] sm:$0x1] %vm337_vm2, %v480_v11 }
  0xfb   : > { %v356_v12 = vpop.permute.xlu1 %355 }
  0xfc   : > { %358 = vst.msk [vmem:[#allocation4 + $0x8] sm:$0x1] %vm337_vm2, %v356_v12 }
  0xfd   : > { %v488_v13 = vpop.permute.xlu0 %487 }
  0xfe   : > { %490 = vst.msk [vmem:[#allocation4 + $0x22] sm:$0x1] %vm337_vm2, %v488_v13 }
  0xff   : > { %v364_v14 = vpop.permute.xlu1 %363  ;;  %v3254_v59 = vld [vmem:[#allocation4] sm:$0xff] }
 0x100   : > { %366 = vst.msk [vmem:[#allocation4 + $0xa] sm:$0x1] %vm337_vm2, %v364_v14  ;;  %v594_v62 = vmul.f32 %v593_v60, %v3254_v59  ;;  %v622_v1 = vmul.f32 %v621_v0, %v3254_v59  ;;  %v636_v3 = vmul.f32 %v635_v2, %v3254_v59  ;;  %v650_v5 = vmul.f32 %v649_v4, %v3254_v59 }
 0x101   : > { %v373_v15 = vpop.permute.xlu0 %372 }
 0x102   : > { %375 = vst.msk [vmem:[#allocation4 + $0xb] sm:$0x1] %vm337_vm2, %v373_v15 }
 0x103   : > { %v432_v16 = vpop.permute.xlu1 %431 }
 0x104   : > { %v433_v17 = vrot.slane %v432_v16, 1 }
 0x105   : > { %v501_v18 = vpop.permute.xlu0 %500 }
 0x106   : > { %v437_v19 = vrot.slane %v433_v17, %v3150_v43  ;;  %v502_v20 = vrot.slane %v501_v18, 1 }
 0x107   : > { %v443_v21 = vpop.permute.xlu1 %442 }
 0x108   : > { %v444_v22 = vrot.slane %v443_v21, 1  ;;  %438 = vrot.lane.b32.xlu0 %v437_v19, %s2937_s19  ;;  %v506_v23 = vrot.slane %v502_v20, %v3150_v43 }
 0x109   : > { %v523_v24 = vpop.permute.xlu0 %522 }
 0x10a   : > { %v448_v25 = vrot.slane %v444_v22, %v3150_v43  ;;  %v524_v26 = vrot.slane %v523_v24, 1  ;;  %507 = vrot.lane.b32.xlu1 %v506_v23, %s2937_s19 }
 0x10b   : > { %v459_v27 = vpop.permute.xlu1 %458 }
 0x10c   : > { %462 = vst.msk [vmem:[#allocation4 + $0x1b] sm:$0x1] %vm337_vm2, %v459_v27  ;;  %449 = vrot.lane.b32.xlu0 %v448_v25, %s2937_s19  ;;  %v528_v28 = vrot.slane %v524_v26, %v3150_v43  ;;  %v3312_v25 = vstv %s2588_s28  ;;  %s2601_s28 = sld [smem:[#allocation5 + $0x17]] }
 0x10d   : > { %v545_v29 = vpop.permute.xlu0 %544 }
 0x10e   : > { %v546_v30 = vrot.slane %v545_v29, 1  ;;  %529 = vrot.lane.b32.xlu1 %v528_v28, %s2937_s19 }
 0x10f   : > { %v468_v31 = vpop.permute.xlu1 %467 }
 0x110   : > { %470 = vst.msk [vmem:[#allocation4 + $0x1d] sm:$0x1] %vm337_vm2, %v468_v31  ;;  %v550_v32 = vrot.slane %v546_v30, %v3150_v43 }
 0x111   : > { %v567_v33 = vpop.permute.xlu0 %566 }
 0x112   : > { %v568_v34 = vrot.slane %v567_v33, 1  ;;  %551 = vrot.lane.b32.xlu1 %v550_v32, %s2937_s19  ;;  %v3324_v32 = vstv %s2589_s29  ;;  %s2602_s29 = sld [smem:[#allocation5 + $0x18]] }
 0x113   : > { %v476_v35 = vpop.permute.xlu1 %475 }
 0x114   : > { %478 = vst.msk [vmem:[#allocation4 + $0x1f] sm:$0x1] %vm337_vm2, %v476_v35  ;;  %v572_v36 = vrot.slane %v568_v34, %v3150_v43 }
 0x116   : > { %573 = vrot.lane.b32.xlu1 %v572_v36, %s2937_s19 }
 0x117   : > { %v484_v37 = vpop.permute.xlu1 %483 }
 0x118   : > { %486 = vst.msk [vmem:[#allocation4 + $0x21] sm:$0x1] %vm337_vm2, %v484_v37 }
 0x11b   : > { %v3218_v39 = vld [vmem:[#allocation4 + $0x18] sm:$0xff]  ;;  %v497_v40 = vpop.permute.xlu1 %496 }
 0x11c   : > { %499 = vst.msk [vmem:[#allocation4 + $0x23] sm:$0x1] %vm337_vm2, %v497_v40  ;;  %v1532_v41 = vmul.f32 %v1531_v38, %v3218_v39  ;;  %v1560_v46 = vmul.f32 %v1559_v42, %v3218_v39  ;;  %v1518_v51 = vmul.f32 %v1517_v47, %v3218_v39  ;;  %v1546_v56 = vmul.f32 %v1545_v52, %v3218_v39 }
 0x11d   : > { %v1574_v61 = vmul.f32 %v1573_v57, %v3218_v39  ;;  %v3337_v40 = vstv %s2590_s5  ;;  %s2610_s5 = sld [smem:[#allocation5 + $0x20]] }
 0x11e   : > { %1536 = vrot.lane.b32.xlu1 %v1532_v41, %s2951_s30 }
 0x11f   : > { %v512_v44 = vpop.permute.xlu1 %511 }
 0x120   : > { %v513_v45 = vrot.slane %v512_v44, 1 }
 0x122   : > { %v517_v48 = vrot.slane %v513_v45, %v3150_v43  ;;  %1564 = vrot.lane.b32.xlu1 %v1560_v46, %s2952_s25 }
 0x123   : > { %v534_v49 = vpop.permute.xlu1 %533 }
 0x124   : > { %v535_v50 = vrot.slane %v534_v49, 1  ;;  %518 = vrot.lane.b32.xlu0 %v517_v48, %s2937_s19  ;;  %v3350_v49 = vstv %s2591_s7  ;;  %s2611_s7 = sld [smem:[#allocation5 + $0x21]] }
 0x126   : > { %v539_v53 = vrot.slane %v535_v50, %v3150_v43  ;;  %1522 = vrot.lane.b32.xlu1 %v1518_v51, %s2951_s30 }
 0x127   : > { %v556_v54 = vpop.permute.xlu1 %555 }
 0x128   : > { %v557_v55 = vrot.slane %v556_v54, 1  ;;  %540 = vrot.lane.b32.xlu0 %v539_v53, %s2937_s19 }
 0x12a   : > { %v561_v58 = vrot.slane %v557_v55, %v3150_v43  ;;  %1550 = vrot.lane.b32.xlu1 %v1546_v56, %s2952_s25  ;;  %v608_v43 = vmul.f32 %v607_v63, %v3254_v59 }
 0x12c   : > { %562 = vrot.lane.b32.xlu0 %v561_v58, %s2937_s19  ;;  %s2587_s19 = sld [smem:[#allocation5 + $0x9]]  ;;  %v3363_v58 = vstv %s2594_s16  ;;  %s2612_s16 = sld [smem:[#allocation5 + $0x22]] }
 0x12e   : > { %1578 = vrot.lane.b32.xlu1 %v1574_v61, %s2953_s24 }
 0x130   : > { %598 = vrot.lane.b32.xlu0 %v594_v62, %s2951_s30 }
 0x132   : > { %v3303_v22 = vstv %s2587_s19  ;;  %s2598_s19 = sld [smem:[#allocation5 + $0x14]] }
 0x134   : > { %612 = vrot.lane.b32.xlu0 %v608_v43, %s2951_s30 }
 0x138   : > { %626 = vrot.lane.b32.xlu0 %v622_v1, %s2952_s25  ;;  %v3377_v1 = vstv %s2595_s8  ;;  %s2637_s8 = sld [smem:[#allocation5 + $0x3b]] }
 0x13c   : > { %640 = vrot.lane.b32.xlu0 %v636_v3, %s2952_s25 }
 0x140   : > { %654 = vrot.lane.b32.xlu0 %v650_v5, %s2953_s24 }
 0x156   : > { %v384_v6 = vpop.permute.xlu0 %383 }
 0x157   : > { %386 = vst.msk [vmem:[#allocation4 + $0xc] sm:$0x1] %vm337_vm2, %v384_v6 }
 0x15a   : > { %v395_v7 = vpop.permute.xlu0 %394 }
 0x15b   : > { %397 = vst.msk [vmem:[#allocation4 + $0xd] sm:$0x1] %vm337_vm2, %v395_v7 }
 0x15e   : > { %v406_v8 = vpop.permute.xlu0 %405 }
 0x15f   : > { %408 = vst.msk [vmem:[#allocation4 + $0xe] sm:$0x1] %vm337_vm2, %v406_v8  ;;  %v3391_v8 = vstv %s2596_s23  ;;  %s2639_s23 = sld [smem:[#allocation5 + $0x3d]] }
 0x162   : > { %v417_v9 = vpop.permute.xlu0 %416 }
 0x163   : > { %419 = vst.msk [vmem:[#allocation4 + $0xf] sm:$0x1] %vm337_vm2, %v417_v9 }
 0x166   : > { %v428_v10 = vpop.permute.xlu0 %427 }
 0x167   : > { %430 = vst.msk [vmem:[#allocation4 + $0x10] sm:$0x1] %vm337_vm2, %v428_v10 }
 0x16a   : > { %v3287_v11 = vld [vmem:[#allocation4 + $0x8] sm:$0xff] }
 0x16b   : > { %v595_v12 = vmul.f32 %v593_v60, %v3287_v11  ;;  %v609_v13 = vmul.f32 %v607_v63, %v3287_v11  ;;  %v623_v14 = vmul.f32 %v621_v0, %v3287_v11  ;;  %v637_v15 = vmul.f32 %v635_v2, %v3287_v11 }
 0x16c   : > { %v651_v17 = vmul.f32 %v649_v4, %v3287_v11  ;;  %v3308_v23 = vmul.f32 %v3303_v22, %v3287_v11  ;;  %v3322_v31 = vmul.f32 %v3312_v25, %v3287_v11  ;;  %v3335_v37 = vmul.f32 %v3324_v32, %v3287_v11 }
 0x16d   : > { %600 = vrot.lane.b32.xlu1 %v595_v12, %s2951_s30  ;;  %v3348_v48 = vmul.f32 %v3337_v40, %v3287_v11  ;;  %v3361_v55 = vmul.f32 %v3350_v49, %v3287_v11  ;;  %v3375_v43 = vmul.f32 %v3363_v58, %v3287_v11  ;;  %v3389_v6 = vmul.f32 %v3377_v1, %v3287_v11 }
 0x16e   : > { %v706_v29 = vrot.slane %v3308_v23, 1  ;;  %v727_v36 = vrot.slane %v3322_v31, 1  ;;  %v748_v46 = vrot.slane %v3335_v37, 1 }
 0x16f   : > { %v769_v54 = vrot.slane %v3348_v48, 1  ;;  %v790_v63 = vrot.slane %v3361_v55, 1  ;;  %v846_v5 = vrot.slane %v3375_v43, 2 }
 0x171   : > { %614 = vrot.lane.b32.xlu1 %v609_v13, %s2951_s30  ;;  %v867_v13 = vrot.slane %v3389_v6, 2 }
 0x175   : > { %628 = vrot.lane.b32.xlu1 %v623_v14, %s2952_s25  ;;  %v3403_v14 = vmul.f32 %v3391_v8, %v3287_v11 }
 0x179   : > { %642 = vrot.lane.b32.xlu1 %v637_v15, %s2952_s25 }
 0x17a   : > { %v439_v16 = vpop.permute.xlu0 %438 }
 0x17b   : > { %441 = vst.msk [vmem:[#allocation4 + $0x11] sm:$0x1] %vm337_vm2, %v439_v16  ;;  %v3407_v16 = vstv %s2597_s27  ;;  %s2644_s27 = sld [smem:[#allocation5 + $0x42]] }
 0x17c   : > { %v508_v18 = vpop.permute.xlu1 %507 }
 0x17d   : > { %656 = vrot.lane.b32.xlu1 %v651_v17, %s2953_s24  ;;  %510 = vst.msk [vmem:[#allocation4 + $0x24] sm:$0x1] %vm337_vm2, %v508_v18 }
 0x17e   : > { %v450_v19 = vpop.permute.xlu0 %449 }
 0x17f   : > { %452 = vst.msk [vmem:[#allocation4 + $0x12] sm:$0x1] %vm337_vm2, %v450_v19 }
 0x180   : > { %v530_v20 = vpop.permute.xlu1 %529 }
 0x181   : > { %532 = vst.msk [vmem:[#allocation4 + $0x26] sm:$0x1] %vm337_vm2, %v530_v20 }
 0x184   : > { %v552_v21 = vpop.permute.xlu1 %551 }
 0x185   : > { %554 = vst.msk [vmem:[#allocation4 + $0x28] sm:$0x1] %vm337_vm2, %v552_v21  ;;  %v888_v21 = vrot.slane %v3403_v14, 2 }
 0x186   : > { %v3310_v24 = vld [vmem:[#allocation4 + $0x10] sm:$0x3f] }
 0x187   : > { %v701_v26 = vmul.f32 %v3303_v22, %v3310_v24  ;;  %v722_v27 = vmul.f32 %v3312_v25, %v3310_v24  ;;  %v743_v35 = vmul.f32 %v3324_v32, %v3310_v24  ;;  %v764_v45 = vmul.f32 %v3337_v40, %v3310_v24 }
 0x188   : > { %v574_v28 = vpop.permute.xlu1 %573  ;;  %v785_v53 = vmul.f32 %v3350_v49, %v3310_v24  ;;  %v841_v62 = vmul.f32 %v3363_v58, %v3310_v24  ;;  %v862_v4 = vmul.f32 %v3377_v1, %v3310_v24  ;;  %v883_v12 = vmul.f32 %v3391_v8, %v3310_v24 }
 0x189   : > { %576 = vst.msk [vmem:[#allocation4 + $0x2a] sm:$0x1] %vm337_vm2, %v574_v28  ;;  %v708_v30 = vrot.slane %v701_v26, 1  ;;  %v729_v34 = vrot.slane %v722_v27, 1  ;;  %v750_v44 = vrot.slane %v743_v35, 1  ;;  %v771_v51 = vrot.slane %v764_v45, 1 }
 0x18a   : > { %v792_v61 = vrot.slane %v785_v53, 1  ;;  %v848_v3 = vrot.slane %v841_v62, 2  ;;  %v869_v10 = vrot.slane %v862_v4, 2  ;;  %v890_v19 = vrot.slane %v883_v12, 2 }
 0x18b   : > { %v709_v33 = vsel %vm670_vm3, %v706_v29, %v708_v30  ;;  %v730_v41 = vsel %vm670_vm3, %v727_v36, %v729_v34  ;;  %v751_v50 = vsel %vm670_vm3, %v748_v46, %v750_v44  ;;  %v772_v60 = vsel %vm670_vm3, %v769_v54, %v771_v51 }
 0x18c   : > { %712 = vrot.lane.b32.xlu1 %v709_v33, %s2951_s30  ;;  %v793_v2 = vsel %vm670_vm3, %v790_v63, %v792_v61  ;;  %v849_v9 = vsel %vm810_vm4, %v846_v5, %v848_v3  ;;  %v870_v17 = vsel %vm810_vm4, %v867_v13, %v869_v10  ;;  %v904_v20 = vmul.f32 %v3407_v16, %v3310_v24 }
 0x18d   : > { %v3422_v26 = vmul.f32 %v3407_v16, %v3287_v11  ;;  %v3424_v27 = vstv %s2598_s19  ;;  %v699_v3 = vmul.f32 %v3303_v22, %v3254_v59  ;;  %v3477_v4 = vstv %s2603_s4  ;;  %s2646_s19 = sld [smem:[#allocation5 + $0x44]]  ;;  %s2658_s4 = sld [smem:[#allocation5 + $0x50]] }
 0x18e   : > { %v911_v30 = vrot.slane %v904_v20, 2  ;;  %v925_v33 = vmul.f32 %v3424_v27, %v3310_v24  ;;  %v3439_v35 = vmul.f32 %v3424_v27, %v3287_v11  ;;  %v1023_v10 = vmul.f32 %v3477_v4, %v3310_v24 }
 0x18f   : > { %v909_v34 = vrot.slane %v3422_v26, 2  ;;  %v3492_v12 = vmul.f32 %v3477_v4, %v3287_v11 }
 0x190   : > { %733 = vrot.lane.b32.xlu1 %v730_v41, %s2951_s30  ;;  %v3441_v41 = vstv %s2601_s28  ;;  %v932_v45 = vrot.slane %v925_v33, 2  ;;  %v930_v51 = vrot.slane %v3439_v35, 2  ;;  %v1030_v20 = vrot.slane %v1023_v10, 3  ;;  %s2651_s28 = sld [smem:[#allocation5 + $0x49]] }
 0x191   : > { %v3456_v53 = vmul.f32 %v3441_v41, %v3287_v11  ;;  %v783_v10 = vmul.f32 %v3350_v49, %v3254_v59 }
 0x194   : > { %754 = vrot.lane.b32.xlu1 %v751_v50, %s2952_s25  ;;  %v981_v50 = vmul.f32 %v3441_v41, %v3310_v24 }
 0x196   : > { %v519_v56 = vpop.permute.xlu0 %518  ;;  %v988_v61 = vrot.slane %v981_v50, 3 }
 0x197   : > { %521 = vst.msk [vmem:[#allocation4 + $0x25] sm:$0x1] %vm337_vm2, %v519_v56  ;;  %v3458_v56 = vstv %s2602_s29  ;;  %s2653_s29 = sld [smem:[#allocation5 + $0x4b]] }
 0x198   : > { %775 = vrot.lane.b32.xlu1 %v772_v60, %s2952_s25  ;;  %v1002_v62 = vmul.f32 %v3458_v56, %v3310_v24 }
 0x19a   : > { %v541_v0 = vpop.permute.xlu0 %540 }
 0x19b   : > { %543 = vst.msk [vmem:[#allocation4 + $0x27] sm:$0x1] %vm337_vm2, %v541_v0  ;;  %v986_v0 = vrot.slane %v3456_v53, 3 }
 0x19c   : > { %796 = vrot.lane.b32.xlu1 %v793_v2, %s2953_s24  ;;  %v3473_v2 = vmul.f32 %v3458_v56, %v3287_v11 }
 0x19e   : > { %v563_v7 = vpop.permute.xlu0 %562  ;;  %v1007_v22 = vrot.slane %v3473_v2, 3 }
 0x19f   : > { %565 = vst.msk [vmem:[#allocation4 + $0x29] sm:$0x1] %vm337_vm2, %v563_v7 }
 0x1a0   : > { %852 = vrot.lane.b32.xlu1 %v849_v9, %s2951_s30  ;;  %v1009_v9 = vrot.slane %v1002_v62, 3  ;;  %v3534_v62 = vstv %s2608_s21  ;;  %s2665_s21 = sld [smem:[#allocation5 + $0x57]] }
 0x1a2   : > { %v3405_v15 = vld [vmem:[#allocation4 + $0x20] sm:$0xff] }
 0x1a3   : > { %v1533_v18 = vmul.f32 %v1531_v38, %v3405_v15  ;;  %v891_v38 = vsel %vm810_vm4, %v888_v21, %v890_v19  ;;  %v1561_v28 = vmul.f32 %v1559_v42, %v3405_v15  ;;  %v912_v42 = vsel %vm810_vm4, %v909_v34, %v911_v30 }
 0x1a4   : > { %873 = vrot.lane.b32.xlu1 %v870_v17, %s2951_s30  ;;  %v1519_v44 = vmul.f32 %v1517_v47, %v3405_v15  ;;  %v933_v47 = vsel %vm810_vm4, %v930_v51, %v932_v45  ;;  %v1547_v60 = vmul.f32 %v1545_v52, %v3405_v15  ;;  %v989_v52 = vsel %vm950_vm5, %v986_v0, %v988_v61 }
 0x1a5   : > { %1538 = vrot.lane.b32.xlu0 %v1533_v18, %s2951_s30  ;;  %v1575_v7 = vmul.f32 %v1573_v57, %v3405_v15  ;;  %v705_v17 = vrot.slane %v699_v3, 1  ;;  %v720_v18 = vmul.f32 %v3312_v25, %v3254_v59  ;;  %v3496_v19 = vstv %s2604_s6  ;;  %s2660_s6 = sld [smem:[#allocation5 + $0x52]] }
 0x1a6   : > { %v1010_v57 = vsel %vm950_vm5, %v1007_v22, %v1009_v9  ;;  %v1028_v25 = vrot.slane %v3492_v12, 3  ;;  %v3511_v30 = vmul.f32 %v3496_v19, %v3287_v11  ;;  %v762_v61 = vmul.f32 %v3337_v40, %v3254_v59 }
 0x1a7   : > { %v726_v33 = vrot.slane %v720_v18, 1  ;;  %v1120_v3 = vmul.f32 %v3534_v62, %v3310_v24 }
 0x1a8   : > { %894 = vrot.lane.b32.xlu1 %v891_v38, %s2952_s25  ;;  %v1044_v38 = vmul.f32 %v3496_v19, %v3310_v24  ;;  %v1031_v23 = vsel %vm950_vm5, %v1028_v25, %v1030_v20  ;;  %v768_v9 = vrot.slane %v762_v61, 1  ;;  %v3593_v61 = vstv %s2611_s7  ;;  %s2615_s7 = sld [smem:[#allocation5 + $0x25]] }
 0x1a9   : > { %1566 = vrot.lane.b32.xlu0 %v1561_v28, %s2952_s25  ;;  %v707_v28 = vsel %vm670_vm3, %v705_v17, %v706_v29  ;;  %v728_v50 = vsel %vm670_vm3, %v726_v33, %v727_v36  ;;  %v3553_v17 = vstv %s2609_s3  ;;  %v839_v33 = vmul.f32 %v3363_v58, %v3254_v59  ;;  %s2618_s3 = sld [smem:[#allocation5 + $0x28]] }
 0x1aa   : > { %v1051_v29 = vrot.slane %v1044_v38, 3  ;;  %v1141_v18 = vmul.f32 %v3553_v17, %v3310_v24  ;;  %v3568_v20 = vmul.f32 %v3553_v17, %v3287_v11  ;;  %v3570_v38 = vpop.permute.xlu1 %1536 }
 0x1ab   : > { %5373 = vst [vmem:[#allocation14_spill] sm:$0xff] %v3570_v38 }
 0x1ac   : > { %915 = vrot.lane.b32.xlu1 %v912_v42, %s2952_s25  ;;  %v741_v42 = vmul.f32 %v3324_v32, %v3254_v59  ;;  %v1049_v32 = vrot.slane %v3511_v30, 3  ;;  %v1146_v58 = vrot.slane %v3568_v20, 4 }
 0x1ad   : > { %1524 = vrot.lane.b32.xlu0 %v1519_v44, %s2951_s30  ;;  %v3515_v44 = vstv %s2605_s17  ;;  %s2616_s17 = sld [smem:[#allocation5 + $0x26]] }
 0x1ae   : > { %v1065_v45 = vmul.f32 %v3515_v44, %v3310_v24  ;;  %v1052_v31 = vsel %vm950_vm5, %v1049_v32, %v1051_v29 }
 0x1b0   : > { %936 = vrot.lane.b32.xlu1 %v933_v47, %s2953_s24  ;;  %v3530_v47 = vmul.f32 %v3515_v44, %v3287_v11  ;;  %v1072_v36 = vrot.slane %v1065_v45, 3 }
 0x1b1   : > { %1552 = vrot.lane.b32.xlu0 %v1547_v60, %s2952_s25  ;;  %v747_v60 = vrot.slane %v741_v42, 1  ;;  %v3574_v42 = vstv %s2610_s5  ;;  %s2667_s5 = sld [smem:[#allocation5 + $0x59]] }
 0x1b2   : > { %v1070_v40 = vrot.slane %v3530_v47, 3  ;;  %v3589_v45 = vmul.f32 %v3574_v42, %v3287_v11 }
 0x1b4   : > { %992 = vrot.lane.b32.xlu1 %v989_v52, %s2951_s30  ;;  %v749_v52 = vsel %vm670_vm3, %v747_v60, %v748_v46  ;;  %v1073_v37 = vsel %vm950_vm5, %v1070_v40, %v1072_v36  ;;  %v1127_v46 = vrot.slane %v1120_v3, 4  ;;  %v860_v60 = vmul.f32 %v3377_v1, %v3254_v59  ;;  %v3600_v36 = vpop.permute.xlu1 %1564 }
 0x1b5   : > { %1580 = vrot.lane.b32.xlu0 %v1575_v7, %s2953_s24  ;;  %v3549_v7 = vmul.f32 %v3534_v62, %v3287_v11  ;;  %5374 = vst [vmem:[#allocation15_spill] sm:$0xff] %v3600_v36  ;;  %v1167_v1 = vrot.slane %v3589_v45, 4  ;;  %v4025_v36 = vld [vmem:[#allocation4 + $0x18] sm:$0xff] }
 0x1b7   : > { %v1125_v49 = vrot.slane %v3549_v7, 4 }
 0x1b8   : > { %1013 = vrot.lane.b32.xlu1 %v1010_v57, %s2951_s30  ;;  %v770_v57 = vsel %vm670_vm3, %v768_v9, %v769_v54  ;;  %v1148_v54 = vrot.slane %v1141_v18, 4  ;;  %v866_v9 = vrot.slane %v860_v60, 2 }
 0x1b9   : > { %710 = vrot.lane.b32.xlu0 %v707_v28, %s2951_s30  ;;  %v789_v28 = vrot.slane %v783_v10, 1  ;;  %v1128_v48 = vsel %vm192_vm0, %v1125_v49, %v1127_v46  ;;  %v881_v10 = vmul.f32 %v3391_v8, %v3254_v59 }
 0x1ba   : > { %v1149_v55 = vsel %vm192_vm0, %v1146_v58, %v1148_v54  ;;  %v868_v18 = vsel %vm810_vm4, %v866_v9, %v867_v13  ;;  %v3635_v54 = vstv %s2637_s8  ;;  %s3864_s8 = sld [smem:[#allocation5 + $0x5e]] }
 0x1bb   : > { %v791_v29 = vsel %vm670_vm3, %v789_v28, %v790_v63  ;;  %v3631_v28 = vpop.permute.xlu1 %1522 }
 0x1bc   : > { %1034 = vrot.lane.b32.xlu1 %v1031_v23, %s2952_s25  ;;  %v1162_v23 = vmul.f32 %v3574_v42, %v3310_v24  ;;  %5375 = vst [vmem:[#allocation16_spill] sm:$0xff] %v3631_v28 }
 0x1bd   : > { %731 = vrot.lane.b32.xlu0 %v728_v50, %s2951_s30  ;;  %v845_v50 = vrot.slane %v839_v33, 2  ;;  %v887_v33 = vrot.slane %v881_v10, 2 }
 0x1be   : > { %v1169_v63 = vrot.slane %v1162_v23, 4  ;;  %v3642_v23 = vmul.f32 %v3635_v54, %v3405_v15 }
 0x1bf   : > { %v847_v3 = vsel %vm810_vm4, %v845_v50, %v846_v5  ;;  %v1643_v50 = vmul.f32 %v3635_v54, %v3218_v39 }
 0x1c0   : > { %1055 = vrot.lane.b32.xlu1 %v1052_v31, %s2952_s25  ;;  %v1183_v31 = vmul.f32 %v3593_v61, %v3310_v24  ;;  %v1170_v43 = vsel %vm192_vm0, %v1167_v1, %v1169_v63  ;;  %v3654_v63 = vstv %s2639_s23  ;;  %s3897_s23 = sld [smem:[#allocation5 + $0x2f]] }
 0x1c1   : > { %752 = vrot.lane.b32.xlu0 %v749_v52, %s2952_s25  ;;  %v3610_v52 = vmul.f32 %v3593_v61, %v3287_v11  ;;  %v1649_v9 = vrot.slane %v1643_v50, 1  ;;  %v1685_v10 = vmul.f32 %v3654_v63, %v3218_v39  ;;  %v3696_v50 = vstv %s2646_s19  ;;  %s3916_s19 = sld [smem:[#allocation5 + $0x1]] }
 0x1c2   : > { %v1190_v5 = vrot.slane %v1183_v31, 4  ;;  %v3662_v31 = vmul.f32 %v3654_v63, %v3405_v15 }
 0x1c3   : > { %v1188_v8 = vrot.slane %v3610_v52, 4 }
 0x1c4   : > { %1076 = vrot.lane.b32.xlu1 %v1073_v37, %s2953_s24  ;;  %v3614_v37 = vstv %s2612_s16  ;;  %v5310_v26 = vrot.slane %v3662_v31, 1  ;;  %s2623_s16 = sld [smem:[#allocation5 + $0x2d]] }
 0x1c5   : > { %773 = vrot.lane.b32.xlu0 %v770_v57, %s2952_s25  ;;  %v1204_v46 = vmul.f32 %v3614_v37, %v3310_v24  ;;  %v3629_v57 = vmul.f32 %v3614_v37, %v3287_v11  ;;  %v1191_v6 = vsel %vm192_vm0, %v1188_v8, %v1190_v5  ;;  %v979_v5 = vmul.f32 %v3441_v41, %v3254_v59 }
 0x1c6   : > { %v1691_v41 = vrot.slane %v1685_v10, 1  ;;  %v1021_v10 = vmul.f32 %v3477_v4, %v3254_v59 }
 0x1c7   : > { %v1211_v13 = vrot.slane %v1204_v46, 4  ;;  %v3675_v46 = vstv %s2644_s27  ;;  %s3914_s27 = sld [smem:[#allocation5]] }
 0x1c8   : > { %1131 = vrot.lane.b32.xlu1 %v1128_v48, %s2951_s30  ;;  %v902_v48 = vmul.f32 %v3407_v16, %v3254_v59  ;;  %v1209_v16 = vrot.slane %v3629_v57, 4  ;;  %v1693_v35 = vsel %vm670_vm3, %v1691_v41, %v5310_v26  ;;  %v1027_v41 = vrot.slane %v1021_v10, 3 }
 0x1c9   : > { %794 = vrot.lane.b32.xlu0 %v791_v29, %s2953_s24  ;;  %v889_v29 = vsel %vm810_vm4, %v887_v33, %v888_v21  ;;  %v1650_v21 = vrot.slane %v3642_v23, 1  ;;  %v3757_v10 = vstv %s2658_s4  ;;  %s3946_s4 = sld [smem:[#allocation5 + $0x8]]  ;;  %v3956_v26 = vstv %s3897_s23  ;;  %s4029_s23 = sld [smem:[#allocation5 + $0x3e]] }
 0x1ca   : > { %v908_v60 = vrot.slane %v902_v48, 2  ;;  %v1212_v14 = vsel %vm192_vm0, %v1209_v16, %v1211_v13  ;;  %v1782_v48 = vmul.f32 %v3675_v46, %v3218_v39  ;;  %v985_v13 = vrot.slane %v979_v5, 3 }
 0x1cc   : > { %1152 = vrot.lane.b32.xlu1 %v1149_v55, %s2951_s30  ;;  %v923_v55 = vmul.f32 %v3424_v27, %v3254_v59  ;;  %v910_v27 = vsel %vm810_vm4, %v908_v60, %v909_v34  ;;  %v3683_v34 = vmul.f32 %v3675_v46, %v3405_v15  ;;  %v3704_v60 = vmul.f32 %v3696_v50, %v3405_v15 }
 0x1cd   : > { %850 = vrot.lane.b32.xlu0 %v847_v3, %s2951_s30  ;;  %v3664_v3 = vpop.permute.xlu1 %1550  ;;  %v5313_v23 = vstv %s3914_s27 }
 0x1ce   : > { %5376 = vst [vmem:[#allocation17_spill] sm:$0xff] %v3664_v3 }
 0x1cf   : > { %v4022_v3 = vstv %s3946_s4  ;;  %s4114_s4 = sld [smem:[#allocation5 + $0x45]] }
 0x1d0   : > { %1173 = vrot.lane.b32.xlu1 %v1170_v43, %s2952_s25  ;;  %v929_v43 = vrot.slane %v923_v55, 2  ;;  %v987_v55 = vsel %vm950_vm5, %v985_v13, %v986_v0  ;;  %v5307_v0 = vrot.slane %v3704_v60, 2  ;;  %v3736_v13 = vstv %s2653_s29  ;;  %s3928_s29 = sld [smem:[#allocation5 + $0x60]]  ;;  %5386 = vst [vmem:[#allocation26_spill] sm:$0xff] %v4022_v3 }
 0x1d1   : > { %871 = vrot.lane.b32.xlu0 %v868_v18, %s2951_s30  ;;  %v1651_v18 = vsel %vm670_vm3, %v1649_v9, %v1650_v21 }
 0x1d2   : > { %v931_v33 = vsel %vm810_vm4, %v929_v43, %v930_v51  ;;  %v5308_v51 = vrot.slane %v3683_v34, 2  ;;  %v3717_v43 = vstv %s2651_s28  ;;  %s3921_s28 = sld [smem:[#allocation5 + $0x7]] }
 0x1d3   : > { %v3725_v5 = vmul.f32 %v3717_v43, %v3405_v15 }
 0x1d4   : > { %1194 = vrot.lane.b32.xlu1 %v1191_v6, %s2952_s25  ;;  %v3692_v6 = vpop.permute.xlu1 %1578 }
 0x1d5   : > { %892 = vrot.lane.b32.xlu0 %v889_v29, %s2952_s25  ;;  %5377 = vst [vmem:[#allocation18_spill] sm:$0xff] %v3692_v6  ;;  %v1000_v29 = vmul.f32 %v3458_v56, %v3254_v59  ;;  %v1788_v56 = vrot.slane %v1782_v48, 2  ;;  %v1042_v48 = vmul.f32 %v3496_v19, %v3254_v59  ;;  %v5305_v2 = vrot.slane %v3725_v5, 3 }
 0x1d6   : > { %v1029_v19 = vsel %vm950_vm5, %v1027_v41, %v1028_v25  ;;  %v3765_v25 = vmul.f32 %v3757_v10, %v3405_v15 }
 0x1d7   : > { %v1006_v9 = vrot.slane %v1000_v29, 3  ;;  %v1790_v53 = vsel %vm810_vm4, %v1788_v56, %v5308_v51  ;;  %v1963_v56 = vmul.f32 %v3736_v13, %v3218_v39 }
 0x1d8   : > { %1215 = vrot.lane.b32.xlu1 %v1212_v14, %s2953_s24  ;;  %v1824_v14 = vmul.f32 %v3696_v50, %v3218_v39 }
 0x1d9   : > { %913 = vrot.lane.b32.xlu0 %v910_v27, %s2952_s25 }
 0x1da   : > { %v1830_v4 = vrot.slane %v1824_v14, 2  ;;  %v1048_v14 = vrot.slane %v1042_v48, 3  ;;  %v1118_v48 = vmul.f32 %v3534_v62, %v3254_v59 }
 0x1dc   : > { %1654 = vrot.lane.b32.xlu1 %v1651_v18, %s2951_s30  ;;  %v1008_v18 = vsel %vm950_vm5, %v1006_v9, %v1007_v22  ;;  %v1832_v29 = vsel %vm810_vm4, %v1830_v4, %v5307_v0  ;;  %v3744_v22 = vmul.f32 %v3736_v13, %v3405_v15  ;;  %v1063_v9 = vmul.f32 %v3515_v44, %v3254_v59 }
 0x1dd   : > { %934 = vrot.lane.b32.xlu0 %v931_v33, %s2953_s24  ;;  %v1921_v33 = vmul.f32 %v3717_v43, %v3218_v39  ;;  %v1969_v44 = vrot.slane %v1963_v56, 3  ;;  %v2060_v4 = vmul.f32 %v3757_v10, %v3218_v39 }
 0x1de   : > { %v5304_v12 = vrot.slane %v3744_v22, 3  ;;  %v1069_v41 = vrot.slane %v1063_v9, 3  ;;  %v1139_v9 = vmul.f32 %v3553_v17, %v3254_v59 }
 0x1df   : > { %v3713_v27 = vpop.permute.xlu1 %600  ;;  %v2066_v62 = vrot.slane %v2060_v4, 4 }
 0x1e0   : > { %1696 = vrot.lane.b32.xlu1 %v1693_v35, %s2952_s25  ;;  %v1971_v30 = vsel %vm950_vm5, %v1969_v44, %v5304_v12 }
 0x1e1   : > { %990 = vrot.lane.b32.xlu0 %v987_v55, %s2951_s30  ;;  %v1927_v55 = vrot.slane %v1921_v33, 3 }
 0x1e3   : > { %v3746_v35 = vpop.permute.xlu1 %614 }
 0x1e4   : > { %1793 = vrot.lane.b32.xlu1 %v1790_v53, %s2951_s30  ;;  %v1929_v53 = vsel %vm950_vm5, %v1927_v55, %v5305_v2  ;;  %v1071_v55 = vsel %vm950_vm5, %v1069_v41, %v1070_v40 }
 0x1e5   : > { %1011 = vrot.lane.b32.xlu0 %v1008_v18, %s2951_s30  ;;  %v1050_v18 = vsel %vm950_vm5, %v1048_v14, %v1049_v32  ;;  %v5303_v32 = vrot.slane %v3765_v25, 4  ;;  %v1124_v14 = vrot.slane %v1118_v48, 4  ;;  %v1145_v48 = vrot.slane %v1139_v9, 4 }
 0x1e7   : > { %v3774_v33 = vpop.permute.xlu1 %628  ;;  %v1126_v17 = vsel %vm192_vm0, %v1124_v14, %v1125_v49 }
 0x1e8   : > { %1835 = vrot.lane.b32.xlu1 %v1832_v29, %s2952_s25  ;;  %v3778_v29 = vstv %s2660_s6  ;;  %s3951_s6 = sld [smem:[#allocation5 + $0xe]] }
 0x1e9   : > { %1032 = vrot.lane.b32.xlu0 %v1029_v19, %s2952_s25  ;;  %v3786_v19 = vmul.f32 %v3778_v29, %v3405_v15  ;;  %v2102_v56 = vmul.f32 %v3778_v29, %v3218_v39 }
 0x1eb   : > { %v5301_v47 = vrot.slane %v3786_v19, 4  ;;  %v3807_v44 = vpop.permute.xlu1 %642  ;;  %v2108_v4 = vrot.slane %v2102_v56, 4 }
 0x1ec   : > { %1932 = vrot.lane.b32.xlu1 %v1929_v53, %s2951_s30  ;;  %v3797_v53 = vstv %s2616_s17  ;;  %s3958_s17 = sld [smem:[#allocation5 + $0xf]] }
 0x1ed   : > { %1053 = vrot.lane.b32.xlu0 %v1050_v18, %s2952_s25  ;;  %v2068_v18 = vsel %vm192_vm0, %v2066_v62, %v5303_v32  ;;  %v3805_v40 = vmul.f32 %v3797_v53, %v3287_v11  ;;  %v1279_v41 = vmul.f32 %v3797_v53, %v3254_v59  ;;  %v2110_v62 = vsel %vm192_vm0, %v2108_v4, %v5301_v47 }
 0x1ee   : > { %v3839_v4 = vstv %s2618_s3  ;;  %v3862_v47 = vstv %s2667_s5  ;;  %s3981_s3 = sld [smem:[#allocation5 + $0x15]]  ;;  %s3983_s5 = sld [smem:[#allocation5 + $0x16]] }
 0x1ef   : > { %v5300_v7 = vrot.slane %v3805_v40, 5  ;;  %v1285_v56 = vrot.slane %v1279_v41, 5  ;;  %v3835_v9 = vpop.permute.xlu1 %656  ;;  %v3849_v41 = vmul.f32 %v3839_v4, %v3287_v11 }
 0x1f0   : > { %1974 = vrot.lane.b32.xlu1 %v1971_v30, %s2952_s25  ;;  %v1160_v30 = vmul.f32 %v3574_v42, %v3254_v59  ;;  %v1147_v42 = vsel %vm192_vm0, %v1145_v48, %v1146_v58 }
 0x1f1   : > { %1074 = vrot.lane.b32.xlu0 %v1071_v55, %s2953_s24  ;;  %v3818_v55 = vstv %s2665_s21  ;;  %v1287_v20 = vsel %vm1229_vm6, %v1285_v56, %v5300_v7  ;;  %v1202_v7 = vmul.f32 %v3614_v37, %v3254_v59  ;;  %s3960_s21 = sld [smem:[#allocation5 + $0x3a]] }
 0x1f2   : > { %v3826_v49 = vmul.f32 %v3818_v55, %v3405_v15  ;;  %v2199_v14 = vmul.f32 %v3818_v55, %v3218_v39 }
 0x1f4   : > { %2071 = vrot.lane.b32.xlu1 %v2068_v18, %s2951_s30  ;;  %v1166_v18 = vrot.slane %v1160_v30, 4  ;;  %v5302_v58 = vrot.slane %v3826_v49, 5  ;;  %v2205_v48 = vrot.slane %v2199_v14, 5  ;;  %v1321_v30 = vmul.f32 %v3839_v4, %v3254_v59 }
 0x1f5   : > { %1129 = vrot.lane.b32.xlu0 %v1126_v17, %s2951_s30  ;;  %v1181_v17 = vmul.f32 %v3593_v61, %v3254_v59  ;;  %v3872_v14 = vmul.f32 %v3862_v47, %v3405_v15 }
 0x1f6   : > { %v1168_v61 = vsel %vm192_vm0, %v1166_v18, %v1167_v1  ;;  %v2207_v45 = vsel %vm1229_vm6, %v2205_v48, %v5302_v58  ;;  %v5306_v1 = vrot.slane %v3849_v41, 5  ;;  %v3874_v18 = vstv %s2615_s7  ;;  %s3995_s7 = sld [smem:[#allocation5 + $0x3c]] }
 0x1f7   : > { %v1187_v56 = vrot.slane %v1181_v17, 4  ;;  %5378 = vst [vmem:[#allocation19_spill] sm:$0xff] %v3874_v18  ;;  %v3882_v17 = vmul.f32 %v3874_v18, %v3287_v11  ;;  %v1327_v48 = vrot.slane %v1321_v30, 5  ;;  %v2241_v58 = vmul.f32 %v3862_v47, %v3218_v39 }
 0x1f8   : > { %2113 = vrot.lane.b32.xlu1 %v2110_v62, %s2952_s25  ;;  %v3841_v62 = vpop.permute.xlu0 %598  ;;  %v1258_v52 = vmul.f32 %v3874_v18, %v3254_v59  ;;  %v5309_v30 = vrot.slane %v3872_v14, 5 }
 0x1f9   : > { %1150 = vrot.lane.b32.xlu0 %v1147_v42, %s2951_s30  ;;  %v1189_v37 = vsel %vm192_vm0, %v1187_v56, %v1188_v8  ;;  %5379 = vst [vmem:[#allocation20_spill] sm:$0xff] %v3882_v17  ;;  %v3895_v8 = vstv %s2623_s16  ;;  %v1329_v56 = vsel %vm1229_vm6, %v1327_v48, %v5306_v1  ;;  %v5311_v12 = vrot.slane %v3882_v17, 5  ;;  %s3997_s16 = sld [smem:[#allocation5 + $0x1c]] }
 0x1fa   : > { %v2247_v48 = vrot.slane %v2241_v58, 5  ;;  %v1419_v1 = vmul.f32 %v3895_v8, %v3254_v59 }
 0x1fc   : > { %1290 = vrot.lane.b32.xlu1 %v1287_v20, %s2951_s30  ;;  %v3884_v20 = vld [vmem:[#allocation4 + $0x28] sm:$0x3f] }
 0x1fd   : > { %1171 = vrot.lane.b32.xlu0 %v1168_v61, %s2952_s25  ;;  %v3886_v61 = vpop.permute.xlu0 %612  ;;  %v1645_v2 = vmul.f32 %v3635_v54, %v3884_v20  ;;  %v1687_v51 = vmul.f32 %v3654_v63, %v3884_v20 }
 0x1fe   : > { %v3858_v42 = vpop.permute.xlu1 %712  ;;  %5380 = vst [vmem:[#allocation21_spill] sm:$0xff] %v3886_v61 }
 0x1ff   : > { %v1652_v0 = vrot.slane %v1645_v2, 1 }
 0x200   : > { %2210 = vrot.lane.b32.xlu1 %v2207_v45, %s2951_s30  ;;  %v1208_v45 = vrot.slane %v1202_v7, 4 }
 0x201   : > { %1192 = vrot.lane.b32.xlu0 %v1189_v37, %s2952_s25  ;;  %v3905_v37 = vmul.f32 %v3895_v8, %v3287_v11  ;;  %v3930_v54 = vpop.permute.xlu0 %626 }
 0x202   : > { %v3891_v32 = vpop.permute.xlu1 %733  ;;  %v1210_v7 = vsel %vm192_vm0, %v1208_v45, %v1209_v16  ;;  %v1264_v16 = vrot.slane %v1258_v52, 5  ;;  %v3926_v45 = vstv %s3864_s8  ;;  %s4010_s8 = sld [smem:[#allocation5 + $0x1d]] }
 0x203   : > { %v5312_v58 = vrot.slane %v3905_v37, 6 }
 0x204   : > { %1332 = vrot.lane.b32.xlu1 %v1329_v56, %s2952_s25  ;;  %v2249_v56 = vsel %vm1229_vm6, %v2247_v48, %v5309_v30  ;;  %v1266_v52 = vsel %vm1229_vm6, %v1264_v16, %v5311_v12  ;;  %v1425_v48 = vrot.slane %v1419_v1, 6  ;;  %v2338_v30 = vmul.f32 %v3926_v45, %v3218_v39 }
 0x205   : > { %1213 = vrot.lane.b32.xlu0 %v1210_v7, %s2953_s24  ;;  %v3938_v7 = vmul.f32 %v3926_v45, %v3405_v15  ;;  %v3968_v39 = vmul.f32 %v3956_v26, %v3287_v11  ;;  %v1653_v1 = vsel %vm670_vm3, %v1650_v21, %v1652_v0  ;;  %v1694_v16 = vrot.slane %v1687_v51, 1  ;;  %v3976_v12 = vpop.permute.xlu0 %640 }
 0x206   : > { %v3923_v57 = vpop.permute.xlu1 %754  ;;  %v1427_v63 = vsel %vm1369_vm7, %v1425_v48, %v5312_v58  ;;  %5382 = vst [vmem:[#allocation23_spill] sm:$0xff] %v3976_v12  ;;  %v2344_v48 = vrot.slane %v2338_v30, 6  ;;  %v1461_v58 = vmul.f32 %v3956_v26, %v3254_v59  ;;  %v3988_v21 = vstv %s3921_s28  ;;  %s4046_s28 = sld [smem:[#allocation5 + $0x41]] }
 0x207   : > { %v5314_v2 = vrot.slane %v3938_v7, 6  ;;  %5381 = vst [vmem:[#allocation22_spill] sm:$0xff] %v3968_v39  ;;  %v583_v59 = vmul.f32 %v5313_v23, %v3287_v11  ;;  %v5385_v23 = vrot.slane %v3662_v31, 1  ;;  %v1826_v30 = vmul.f32 %v3696_v50, %v3884_v20 }
 0x208   : > { %2252 = vrot.lane.b32.xlu1 %v2249_v56, %s2952_s25  ;;  %v1467_v28 = vrot.slane %v1461_v58, 6  ;;  %v4033_v31 = vmul.f32 %v3988_v21, %v3287_v11 }
 0x209   : > { %1269 = vrot.lane.b32.xlu0 %v1266_v52, %s2951_s30  ;;  %v1784_v52 = vmul.f32 %v3675_v46, %v3884_v20  ;;  %v3993_v46 = vstv %s3928_s29  ;;  %v2346_v0 = vsel %vm1369_vm7, %v2344_v48, %v5314_v2  ;;  %v1695_v48 = vsel %vm670_vm3, %v5385_v23, %v1694_v16  ;;  %v4048_v58 = vpop.permute.xlu0 %654  ;;  %s4059_s29 = sld [smem:[#allocation5 + $0x43]] }
 0x20a   : > { %v3953_v56 = vpop.permute.xlu1 %775  ;;  %5383 = vst [vmem:[#allocation24_spill] sm:$0xff] %v3993_v46  ;;  %v605_v6 = vadd.f32 %v3713_v27, %v583_v59  ;;  %5387 = vst [vmem:[#allocation27_spill] sm:$0xff] %v4033_v31  ;;  %v4036_v16 = vstv %s3951_s6  ;;  %v4041_v27 = vstv %s3958_s17  ;;  %v5392_v59 = vrot.slane %v3968_v39, 6  ;;  %s4131_s6 = sld [smem:[#allocation5 + $0x48]]  ;;  %s4160_s17 = sld [smem:[#allocation5 + $0x4a]] }
 0x20b   : > { %v1791_v2 = vrot.slane %v1784_v52, 2  ;;  %5388 = vst [vmem:[#allocation28_spill] sm:$0xff] %v4036_v16  ;;  %5389 = vst [vmem:[#allocation29_spill] sm:$0xff] %v4041_v27  ;;  %v4044_v52 = vstv %s3960_s21  ;;  %v1833_v17 = vrot.slane %v1826_v30, 2  ;;  %v4081_v30 = vstv %s3983_s5  ;;  %s4230_s21 = sld [smem:[#allocation5 + $0x4c]]  ;;  %s4344_s5 = sld [smem:[#allocation5 + $0x51]] }
 0x20c   : > { %1430 = vrot.lane.b32.xlu1 %v1427_v63, %s2951_s30  ;;  %v666_v63 = vmul.f32 %v3988_v21, %v3310_v24  ;;  %5390 = vst [vmem:[#allocation30_spill] sm:$0xff] %v4044_v52  ;;  %5391 = vst [vmem:[#allocation31_spill] sm:$0xff] %v4048_v58  ;;  %v633_v23 = vadd.f32 %v3774_v33, %v605_v6  ;;  %v4057_v12 = vmul.f32 %v4044_v52, %v3405_v15 }
 0x20d   : > { %1656 = vrot.lane.b32.xlu0 %v1653_v1, %s2951_s30  ;;  %v4008_v1 = vmul.f32 %v3993_v46, %v3405_v15  ;;  %v5393_v6 = vrot.slane %v3683_v34, 2  ;;  %v1622_v39 = vmul.f32 %v4025_v36, %v4044_v52  ;;  %5395 = vst [vmem:[#allocation33_spill] sm:$0xff] %v4081_v30  ;;  %v5398_v52 = vrot.slane %v4033_v31, 1 }
 0x20e   : > { %v3990_v51 = vpop.permute.xlu1 %796  ;;  %v674_v61 = vrot.slane %v666_v63, 1  ;;  %v4072_v63 = vstv %s3981_s3  ;;  %s4267_s3 = sld [smem:[#allocation5 + $0x4f]] }
 0x20f   : > { %5384 = vst [vmem:[#allocation25_spill] sm:$0xff] %v4008_v1  ;;  %v1792_v33 = vsel %vm810_vm4, %v5393_v6, %v1791_v2  ;;  %5394 = vst [vmem:[#allocation32_spill] sm:$0xff] %v4072_v63  ;;  %v4078_v2 = vstv %s3995_s7  ;;  %v1628_v58 = vrot.slane %v1622_v39, 1  ;;  %s4376_s7 = sld [smem:[#allocation5 + $0x53]] }
 0x210   : > { %2349 = vrot.lane.b32.xlu1 %v2346_v0, %s2951_s30  ;;  %v2380_v0 = vmul.f32 %v4025_v36, %v3993_v46  ;;  %v675_v18 = vsel %vm670_vm3, %v5398_v52, %v674_v61  ;;  %v1664_v31 = vmul.f32 %v4025_v36, %v4078_v2  ;;  %v4112_v46 = vstv %s4029_s23  ;;  %s4507_s23 = sld [smem:[#allocation5 + $0x29]] }
 0x211   : > { %1698 = vrot.lane.b32.xlu0 %v1695_v48, %s2952_s25  ;;  %v1469_v48 = vsel %vm1369_vm7, %v1467_v28, %v5392_v59  ;;  %v1923_v28 = vmul.f32 %v3717_v43, %v3884_v20  ;;  %v661_v59 = vadd.f32 %v3835_v9, %v633_v23  ;;  %v4084_v43 = vstv %s3997_s16  ;;  %s4457_s16 = sld [smem:[#allocation5 + $0x27]] }
 0x212   : > { %v4038_v50 = vpop.permute.xlu1 %852  ;;  %v2386_v38 = vrot.slane %v2380_v0, 6  ;;  %v5397_v0 = vrot.slane %v4008_v1, 6  ;;  %v4129_v61 = vstv %s4046_s28  ;;  %s4536_s28 = sld [smem:[#allocation5 + $0x5a]] }
 0x213   : > { %v679_v6 = vadd.f32 %v675_v18, %v661_v59  ;;  %v4126_v18 = vmul.f32 %v4112_v46, %v3405_v15  ;;  %v4141_v59 = vstv %s4059_s29  ;;  %s4563_s29 = sld [smem:[#allocation5 + $0x2c]] }
 0x214   : > { %1472 = vrot.lane.b32.xlu1 %v1469_v48, %s2952_s25  ;;  %v2388_v23 = vsel %vm1369_vm7, %v2386_v38, %v5397_v0  ;;  %v4097_v48 = vstv %s4010_s8  ;;  %v1930_v38 = vrot.slane %v1923_v28, 3  ;;  %v1965_v0 = vmul.f32 %v3736_v13, %v3884_v20  ;;  %5403 = vst [vmem:[#allocation37_spill] sm:$0xff] %v4141_v59  ;;  %s4480_s8 = sld [smem:[#allocation5 + $0x58]] }
 0x215   : > { %1795 = vrot.lane.b32.xlu0 %v1792_v33, %s2951_s30  ;;  %v4094_v33 = vmul.f32 %v4078_v2, %v3405_v15  ;;  %5400 = vst [vmem:[#allocation35_spill] sm:$0xff] %v4126_v18  ;;  %v717_v39 = vadd.f32 %v3858_v42, %v679_v6  ;;  %v2062_v6 = vmul.f32 %v3757_v10, %v3884_v20  ;;  %v4192_v10 = vstv %s4114_s4  ;;  %s4590_s4 = sld [smem:[#allocation5 + $0x5d]] }
 0x216   : > { %v4075_v34 = vpop.permute.xlu1 %873  ;;  %v1972_v42 = vrot.slane %v1965_v0, 3 }
 0x217   : > { %v4086_v9 = vpop.permute.xlu0 %1538  ;;  %v759_v28 = vadd.f32 %v3923_v57, %v717_v39  ;;  %v5409_v57 = vrot.slane %v3744_v22, 3 }
 0x218   : > { %5396 = vst [vmem:[#allocation34_spill] sm:$0xff] %v4086_v9  ;;  %2391 = vrot.lane.b32.xlu1 %v2388_v23, %s2952_s25  ;;  %v5399_v9 = vrot.slane %v3704_v60, 2  ;;  %v4118_v60 = vmul.f32 %v4036_v16, %v3287_v11  ;;  %v5402_v11 = vrot.slane %v4057_v12, 1  ;;  %v5404_v23 = vrot.slane %v3725_v5, 3 }
 0x21a   : > { %v1834_v1 = vsel %vm810_vm4, %v5399_v9, %v1833_v17  ;;  %v806_v17 = vmul.f32 %v4036_v16, %v3310_v24  ;;  %v4122_v13 = vpop.permute.xlu1 %894  ;;  %v1630_v52 = vsel %vm670_vm3, %v1628_v58, %v5402_v11  ;;  %v684_v9 = vmul.f32 %v4022_v3, %v3310_v24 }
 0x21b   : > { %1837 = vrot.lane.b32.xlu0 %v1834_v1, %s2952_s25  ;;  %v4134_v1 = vpop.permute.xlu0 %1566  ;;  %v1931_v16 = vsel %vm950_vm5, %v5404_v23, %v1930_v38  ;;  %v5405_v58 = vstv %s3916_s19  ;;  %v1670_v24 = vrot.slane %v1664_v31, 1  ;;  %v801_v31 = vadd.f32 %v3990_v51, %v759_v28 }
 0x21c   : > { %5401 = vst [vmem:[#allocation36_spill] sm:$0xff] %v4134_v1  ;;  %1633 = vrot.lane.b32.xlu1 %v1630_v52, %s2951_s30  ;;  %v4151_v1 = vld [vmem:[#allocation4 + $0x8] sm:$0xff]  ;;  %v1706_v52 = vmul.f32 %v4025_v36, %v4112_v46  ;;  %v814_v38 = vrot.slane %v806_v17, 2  ;;  %v5408_v23 = vrot.slane %v4094_v33, 1  ;;  %v691_v17 = vrot.slane %v684_v9, 1 }
 0x21d   : > { %v589_v11 = vmul.f32 %v4151_v1, %v5405_v58  ;;  %v4164_v5 = vmul.f32 %v4151_v1, %v4022_v3  ;;  %v4179_v3 = vmul.f32 %v4129_v61, %v3405_v15  ;;  %v2104_v51 = vmul.f32 %v3778_v29, %v3884_v20 }
 0x21e   : > { %v4167_v0 = vpop.permute.xlu1 %915  ;;  %v1672_v58 = vsel %vm670_vm3, %v1670_v24, %v5408_v23  ;;  %v1712_v24 = vrot.slane %v1706_v52, 1  ;;  %v1761_v23 = vmul.f32 %v4025_v36, %v4129_v61  ;;  %v5410_v22 = vrot.slane %v4118_v60, 2 }
 0x21f   : > { %1934 = vrot.lane.b32.xlu0 %v1931_v16, %s2951_s30  ;;  %5406 = vst [vmem:[#allocation38_spill] sm:$0xff] %v4164_v5  ;;  %v619_v16 = vadd.f32 %v3746_v35, %v589_v11  ;;  %v4172_v39 = vpop.permute.xlu0 %1524  ;;  %v1973_v35 = vsel %vm950_vm5, %v5409_v57, %v1972_v42  ;;  %v2069_v11 = vrot.slane %v2062_v6, 4  ;;  %v4198_v6 = vld [vmem:[#allocation4 + $0x10] sm:$0x3f]  ;;  %v4203_v57 = vstv %s4131_s6  ;;  %s4616_s6 = sld [smem:[#allocation5 + $0x2e]] }
 0x220   : > { %5407 = vst [vmem:[#allocation39_spill] sm:$0xff] %v4172_v39  ;;  %1675 = vrot.lane.b32.xlu1 %v1672_v58, %s2952_s25  ;;  %v815_v42 = vsel %vm810_vm4, %v5410_v22, %v814_v38  ;;  %v824_v29 = vmul.f32 %v4198_v6, %v4041_v27  ;;  %v5412_v58 = vrot.slane %v4126_v18, 1  ;;  %v4213_v38 = vmul.f32 %v4141_v59, %v3405_v15 }
 0x221   : > { %v647_v28 = vadd.f32 %v3807_v44, %v619_v16  ;;  %v819_v52 = vadd.f32 %v815_v42, %v801_v31  ;;  %v5413_v22 = vrot.slane %v4164_v5, 1  ;;  %v5414_v31 = vrot.slane %v3765_v25, 4 }
 0x222   : > { %v937_v44 = vpop.permute.xlu1 %936  ;;  %v1767_v9 = vrot.slane %v1761_v23, 2  ;;  %v1803_v18 = vmul.f32 %v4025_v36, %v4141_v59  ;;  %v4228_v5 = vstv %s4160_s17  ;;  %v4234_v25 = vmul.f32 %v4151_v1, %v4041_v27  ;;  %s4643_s17 = sld [smem:[#allocation5 + $0x5f]] }
 0x223   : > { %1976 = vrot.lane.b32.xlu0 %v1973_v35, %s2952_s25  ;;  %v4205_v16 = vpop.permute.xlu0 %1552  ;;  %v1714_v35 = vsel %vm670_vm3, %v1712_v24, %v5412_v58  ;;  %v692_v39 = vsel %vm670_vm3, %v5413_v22, %v691_v17  ;;  %v2070_v42 = vsel %vm192_vm0, %v5414_v31, %v2069_v11  ;;  %v1281_v24 = vmul.f32 %v4198_v6, %v3797_v53 }
 0x224   : > { %5411 = vst [vmem:[#allocation40_spill] sm:$0xff] %v4205_v16  ;;  %1717 = vrot.lane.b32.xlu1 %v1714_v35, %s2953_s24  ;;  %v2111_v16 = vrot.slane %v2104_v51, 4  ;;  %v696_v58 = vadd.f32 %v692_v39, %v647_v28  ;;  %v4238_v17 = vmul.f32 %v4151_v1, %v4072_v63  ;;  %v946_v53 = vmul.f32 %v4198_v6, %v4072_v63 }
 0x225   : > { %v4246_v11 = vmul.f32 %v4192_v10, %v3405_v15  ;;  %v857_v28 = vadd.f32 %v4038_v50, %v819_v52  ;;  %v5416_v35 = vrot.slane %v4179_v3, 2  ;;  %v5330_v31 = vrot.slane %v4213_v38, 2 }
 0x226   : > { %v4242_v39 = vpop.permute.xlu1 %992  ;;  %v738_v51 = vadd.f32 %v3891_v32, %v696_v58  ;;  %v5417_v27 = vrot.slane %v3786_v19, 4  ;;  %v1288_v59 = vrot.slane %v1281_v24, 5  ;;  %v2201_v32 = vmul.f32 %v3818_v55, %v3884_v20 }
 0x227   : > { %2073 = vrot.lane.b32.xlu0 %v2070_v42, %s2951_s30  ;;  %v4250_v23 = vpop.permute.xlu0 %1580  ;;  %v1769_v22 = vsel %vm810_vm4, %v1767_v9, %v5416_v35  ;;  %v831_v42 = vrot.slane %v824_v29, 2  ;;  %v899_v52 = vadd.f32 %v4122_v13, %v857_v28  ;;  %v1809_v9 = vrot.slane %v1803_v18, 2 }
 0x228   : > { %5415 = vst [vmem:[#allocation41_spill] sm:$0xff] %v4250_v23  ;;  %1772 = vrot.lane.b32.xlu1 %v1769_v22, %s2951_s30  ;;  %v2112_v63 = vsel %vm192_vm0, %v5417_v27, %v2111_v16  ;;  %v780_v50 = vadd.f32 %v3953_v56, %v738_v51  ;;  %v1845_v29 = vmul.f32 %v4025_v36, %v4192_v10  ;;  %v5329_v19 = vrot.slane %v4234_v25, 2 }
 0x229   : > { %v5331_v27 = vrot.slane %v4238_v17, 3  ;;  %v954_v16 = vrot.slane %v946_v53, 3  ;;  %v964_v55 = vmul.f32 %v4198_v6, %v4081_v30  ;;  %v941_v13 = vadd.f32 %v937_v44, %v899_v52 }
 0x22a   : > { %v4273_v56 = vpop.permute.xlu1 %1013  ;;  %v5332_v18 = vrot.slane %v4246_v11, 2  ;;  %v4283_v58 = vmul.f32 %v4203_v57, %v3405_v15  ;;  %v832_v53 = vsel %vm810_vm4, %v5329_v19, %v831_v42  ;;  %v5418_v44 = vrot.slane %v3805_v40, 5 }
 0x22b   : > { %2115 = vrot.lane.b32.xlu0 %v2112_v63, %s2952_s25  ;;  %v4275_v24 = vpop.permute.xlu0 %710  ;;  %v1811_v63 = vsel %vm810_vm4, %v1809_v9, %v5330_v31  ;;  %v2208_v28 = vrot.slane %v2201_v32, 5  ;;  %v1323_v35 = vmul.f32 %v4198_v6, %v3839_v4  ;;  %v836_v22 = vadd.f32 %v832_v53, %v780_v50  ;;  %v4307_v32 = vld [vmem:[#allocation4 + $0x20] sm:$0xff] }
 0x22c   : > { %1814 = vrot.lane.b32.xlu1 %v1811_v63, %s2952_s25  ;;  %v1289_v51 = vsel %vm1229_vm6, %v5418_v44, %v1288_v59  ;;  %v1851_v52 = vrot.slane %v1845_v29, 2  ;;  %v1900_v15 = vmul.f32 %v4025_v36, %v4203_v57  ;;  %v4298_v9 = vstv %s4230_s21  ;;  %s4671_s21 = sld [smem:[#allocation5 + $0x30]] }
 0x22d   : > { %v955_v42 = vsel %vm950_vm5, %v5331_v27, %v954_v16  ;;  %v4305_v40 = vmul.f32 %v4151_v1, %v4081_v30  ;;  %v4311_v4 = vmul.f32 %v4307_v32, %v4228_v5  ;;  %v1086_v50 = vmul.f32 %v4198_v6, %v4084_v43 }
 0x22e   : > { %v1035_v59 = vpop.permute.xlu1 %1034  ;;  %v878_v29 = vadd.f32 %v4075_v34, %v836_v22  ;;  %v959_v63 = vadd.f32 %v955_v42, %v941_v13  ;;  %v1853_v16 = vsel %vm810_vm4, %v1851_v52, %v5332_v18  ;;  %v5333_v44 = vrot.slane %v4283_v58, 3 }
 0x22f   : > { %1292 = vrot.lane.b32.xlu0 %v1289_v51, %s2951_s30  ;;  %5419 = vst [vmem:[#allocation42_spill] sm:$0xff] %v4305_v40  ;;  %v4316_v53 = vpop.permute.xlu0 %731  ;;  %v971_v51 = vrot.slane %v964_v55, 3  ;;  %v5420_v19 = vrot.slane %v3826_v49, 5  ;;  %v1330_v27 = vrot.slane %v1323_v35, 5  ;;  %v2243_v34 = vmul.f32 %v3862_v47, %v3884_v20 }
 0x230   : > { %1856 = vrot.lane.b32.xlu1 %v1853_v16, %s2953_s24  ;;  %v920_v13 = vadd.f32 %v4167_v0, %v878_v29  ;;  %v1906_v22 = vrot.slane %v1900_v15, 3  ;;  %v1942_v52 = vmul.f32 %v4025_v36, %v4228_v5  ;;  %v4333_v42 = vstv %s4267_s3  ;;  %s4673_s3 = sld [smem:[#allocation5 + $0x39]] }
 0x231   : > { %v2209_v31 = vsel %vm1229_vm6, %v5420_v19, %v2208_v28  ;;  %v5337_v55 = vrot.slane %v4305_v40, 3  ;;  %v4338_v49 = vmul.f32 %v4151_v1, %v4084_v43  ;;  %v1421_v47 = vmul.f32 %v4198_v6, %v3895_v8 }
 0x232   : > { %v1056_v16 = vpop.permute.xlu1 %1055  ;;  %v1103_v0 = vmul.f32 %v4198_v6, %v4097_v48  ;;  %v1908_v28 = vsel %vm950_vm5, %v1906_v22, %v5333_v44  ;;  %v4355_v15 = vmul.f32 %v4307_v32, %v4298_v9  ;;  %v1093_v18 = vrot.slane %v1086_v50, 4 }
 0x233   : > { %2212 = vrot.lane.b32.xlu0 %v2209_v31, %s2951_s30  ;;  %v997_v31 = vadd.f32 %v4242_v39, %v959_v63  ;;  %v4347_v19 = vpop.permute.xlu0 %752  ;;  %v972_v8 = vsel %vm950_vm5, %v5337_v55, %v971_v51  ;;  %v5421_v39 = vrot.slane %v3849_v41, 5  ;;  %v2250_v63 = vrot.slane %v2243_v34, 5 }
 0x234   : > { %1911 = vrot.lane.b32.xlu1 %v1908_v28, %s2951_s30  ;;  %v976_v23 = vadd.f32 %v972_v8, %v920_v13  ;;  %v1948_v44 = vrot.slane %v1942_v52, 3  ;;  %v1984_v35 = vmul.f32 %v4025_v36, %v4298_v9  ;;  %v5341_v40 = vrot.slane %v4338_v49, 4 }
 0x235   : > { %v1331_v29 = vsel %vm1229_vm6, %v5421_v39, %v1330_v27  ;;  %v1039_v22 = vadd.f32 %v1035_v59, %v997_v31  ;;  %v1428_v51 = vrot.slane %v1421_v47, 6  ;;  %v4370_v28 = vmul.f32 %v4151_v1, %v4097_v48 }
 0x236   : > { %v1077_v30 = vpop.permute.xlu1 %1076  ;;  %v4374_v41 = vmul.f32 %v4307_v32, %v4333_v42  ;;  %v1018_v27 = vadd.f32 %v4273_v56, %v976_v23  ;;  %v5422_v34 = vrot.slane %v4311_v4, 3  ;;  %v5339_v52 = vrot.slane %v4355_v15, 3 }
 0x237   : > { %1334 = vrot.lane.b32.xlu0 %v1331_v29, %s2952_s25  ;;  %v1081_v59 = vadd.f32 %v1077_v30, %v1039_v22  ;;  %v4379_v50 = vpop.permute.xlu0 %773  ;;  %v5423_v47 = vrot.slane %v3872_v14, 5  ;;  %v1094_v23 = vsel %vm192_vm0, %v5341_v40, %v1093_v18  ;;  %v1110_v30 = vrot.slane %v1103_v0, 4  ;;  %v4397_v22 = vld [vmem:[#allocation4] sm:$0xff] }
 0x238   : > { %v1950_v13 = vsel %vm950_vm5, %v1948_v44, %v5422_v34  ;;  %v2340_v56 = vmul.f32 %v3926_v45, %v3884_v20  ;;  %v1060_v8 = vadd.f32 %v1056_v16, %v1018_v27  ;;  %v1990_v39 = vrot.slane %v1984_v35, 3 }
 0x239   : > { %1953 = vrot.lane.b32.xlu1 %v1950_v13, %s2952_s25  ;;  %v2251_v31 = vsel %vm1229_vm6, %v5423_v47, %v2250_v63  ;;  %v1098_v44 = vadd.f32 %v1094_v23, %v1081_v59  ;;  %v2039_v29 = vmul.f32 %v4025_v36, %v4333_v42  ;;  %v5424_v14 = vstv %s3914_s27  ;;  %s4434_s27 = sld [smem:[#allocation5 + $0x56]] }
 0x23a   : > { %v582_v63 = vmul.f32 %v4397_v22, %v5424_v14  ;;  %v1132_v34 = vpop.permute.xlu1 %1131  ;;  %v5336_v18 = vrot.slane %v4370_v28, 4  ;;  %v4404_v0 = vstv %s4344_s5  ;;  %v1992_v16 = vsel %vm950_vm5, %v1990_v39, %v5339_v52  ;;  %s4680_s5 = sld [smem:[#allocation5 + $0x32]] }
 0x23b   : > { %2254 = vrot.lane.b32.xlu0 %v2251_v31, %s2952_s25  ;;  %v1136_v13 = vadd.f32 %v1132_v34, %v1098_v44  ;;  %v4406_v45 = vpop.permute.xlu0 %794  ;;  %v5338_v35 = vrot.slane %v4374_v41, 4  ;;  %v4414_v27 = vmul.f32 %v4307_v32, %v4404_v0  ;;  %v5425_v59 = vrot.slane %v3905_v37, 6 }
 0x23c   : > { %v1111_v31 = vsel %vm192_vm0, %v5336_v18, %v1110_v30  ;;  %v2347_v23 = vrot.slane %v2340_v56, 6  ;;  %v1463_v44 = vmul.f32 %v4198_v6, %v3956_v26  ;;  %v2045_v14 = vrot.slane %v2039_v29, 4  ;;  %v5428_v18 = vld [vmem:[#allocation31_spill] sm:$0xff] }
 0x23d   : > { %1995 = vrot.lane.b32.xlu1 %v1992_v16, %s2953_s24  ;;  %v1429_v47 = vsel %vm1369_vm7, %v5425_v59, %v1428_v51  ;;  %v1115_v39 = vadd.f32 %v1111_v31, %v1060_v8  ;;  %v2081_v34 = vmul.f32 %v4025_v36, %v4404_v0  ;;  %v604_v16 = vadd.f32 %v3841_v62, %v582_v63  ;;  %v5427_v31 = vld [vmem:[#allocation24_spill] sm:$0xff] }
 0x23e   : > { %v664_v37 = vmul.f32 %v4397_v22, %v3988_v21  ;;  %v1153_v51 = vpop.permute.xlu1 %1152  ;;  %v4432_v59 = vstv %s4376_s7  ;;  %v2047_v26 = vsel %vm192_vm0, %v2045_v14, %v5338_v35  ;;  %v5340_v8 = vrot.slane %v4414_v27, 4  ;;  %s4697_s7 = sld [smem:[#allocation5 + $0x23]] }
 0x23f   : > { %1432 = vrot.lane.b32.xlu0 %v1429_v47, %s2951_s30  ;;  %v1157_v30 = vadd.f32 %v1153_v51, %v1115_v39  ;;  %v4436_v56 = vpop.permute.xlu0 %850  ;;  %v4444_v62 = vmul.f32 %v4307_v32, %v4432_v59  ;;  %v632_v21 = vadd.f32 %v3930_v54, %v604_v16  ;;  %v5426_v29 = vrot.slane %v3938_v7, 6 }
 0x240   : > { %v1470_v47 = vrot.slane %v1463_v44, 6  ;;  %v2382_v39 = vmul.f32 %v5427_v31, %v3884_v20  ;;  %v2087_v14 = vrot.slane %v2081_v34, 4  ;;  %v2123_v51 = vmul.f32 %v4025_v36, %v4432_v59  ;;  %v5429_v34 = vld [vmem:[#allocation19_spill] sm:$0xff] }
 0x241   : > { %2050 = vrot.lane.b32.xlu1 %v2047_v26, %s2951_s30  ;;  %v2348_v63 = vsel %vm1369_vm7, %v5426_v29, %v2347_v23  ;;  %v660_v55 = vadd.f32 %v5428_v18, %v632_v21  ;;  %v671_v35 = vrot.slane %v664_v37, 1  ;;  %v5343_v44 = vrot.slane %v4444_v62, 4  ;;  %v5430_v18 = vld [vmem:[#allocation22_spill] sm:$0xff]  ;;  %v5433_v31 = vld [vmem:[#allocation27_spill] sm:$0xff] }
 0x242   : > { %v1174_v54 = vpop.permute.xlu1 %1173  ;;  %v2089_v23 = vsel %vm192_vm0, %v2087_v14, %v5340_v8  ;;  %v1260_v26 = vmul.f32 %v4198_v6, %v5429_v34  ;;  %v5431_v37 = vrot.slane %v5430_v18, 6  ;;  %v2389_v29 = vrot.slane %v2382_v39, 6 }
 0x243   : > { %2351 = vrot.lane.b32.xlu0 %v2348_v63, %s2951_s30  ;;  %v1178_v7 = vadd.f32 %v1174_v54, %v1136_v13  ;;  %v4459_v16 = vpop.permute.xlu0 %871  ;;  %v5432_v13 = vld [vmem:[#allocation30_spill] sm:$0xff]  ;;  %v5434_v54 = vrot.slane %v5433_v31, 1  ;;  %v2129_v14 = vrot.slane %v2123_v51, 4  ;;  %v4478_v34 = vstv %s4434_s27  ;;  %s4704_s27 = sld [smem:[#allocation5 + $0x61]] }
 0x244   : > { %v1471_v21 = vsel %vm1369_vm7, %v5431_v37, %v1470_v47  ;;  %v1624_v63 = vmul.f32 %v5432_v13, %v3884_v20  ;;  %v1267_v18 = vrot.slane %v1260_v26, 5  ;;  %v4501_v26 = vmul.f32 %v4307_v32, %v4478_v34 }
 0x245   : > { %2092 = vrot.lane.b32.xlu1 %v2089_v23, %s2952_s25  ;;  %v673_v52 = vsel %vm670_vm3, %v671_v35, %v5434_v54  ;;  %v2131_v39 = vsel %vm192_vm0, %v2129_v14, %v5343_v44  ;;  %v2180_v35 = vmul.f32 %v4478_v34, %v3884_v20  ;;  %v4505_v31 = vstv %s4457_s16  ;;  %v5448_v44 = vld [vmem:[#allocation32_spill] sm:$0xff]  ;;  %s2649_s16 = sld [smem:[#allocation5 + $0x47]] }
 0x246   : > { %v678_v8 = vadd.f32 %v673_v52, %v660_v55  ;;  %v1195_v40 = vpop.permute.xlu1 %1194  ;;  %v5436_v55 = vld [vmem:[#allocation25_spill] sm:$0xff] }
 0x247   : > { %1474 = vrot.lane.b32.xlu0 %v1471_v21, %s2952_s25  ;;  %v4482_v23 = vadd.f32 %v1195_v40, %v1157_v30  ;;  %v893_v47 = vpop.permute.xlu0 %892  ;;  %v5437_v52 = vrot.slane %v5436_v55, 6  ;;  %v1631_v21 = vrot.slane %v1624_v63, 1  ;;  %v1666_v40 = vmul.f32 %v4078_v2, %v3884_v20  ;;  %v5438_v30 = vld [vmem:[#allocation28_spill] sm:$0xff] }
 0x248   : > { %v716_v51 = vadd.f32 %v4275_v24, %v678_v8  ;;  %v804_v13 = vmul.f32 %v4397_v22, %v5438_v30  ;;  %v5440_v63 = vld [vmem:[#allocation20_spill] sm:$0xff]  ;;  %v1302_v55 = vmul.f32 %v4198_v6, %v4505_v31 }
 0x249   : > { %5435 = vst [vmem:[#allocation24_spill] sm:$0xff] %v4482_v23  ;;  %2134 = vrot.lane.b32.xlu1 %v2131_v39, %s2953_s24  ;;  %v2390_v37 = vsel %vm1369_vm7, %v5437_v52, %v2389_v29  ;;  %v5441_v54 = vrot.slane %v5440_v63, 5  ;;  %v2187_v39 = vrot.slane %v2180_v35, 5  ;;  %v4529_v35 = vmul.f32 %v4151_v1, %v4505_v31 }
 0x24a   : > { %v758_v24 = vadd.f32 %v4347_v19, %v716_v51  ;;  %v1216_v8 = vpop.permute.xlu1 %1215  ;;  %v5442_v51 = vrot.slane %v4057_v12, 1  ;;  %v811_v30 = vrot.slane %v804_v13, 2  ;;  %v5443_v12 = vrot.slane %v4118_v60, 2 }
 0x24b   : > { %2393 = vrot.lane.b32.xlu0 %v2390_v37, %s2952_s25  ;;  %v4509_v29 = vadd.f32 %v1216_v8, %v1178_v7  ;;  %v4511_v2 = vpop.permute.xlu0 %913  ;;  %v1268_v14 = vsel %vm1229_vm6, %v5441_v54, %v1267_v18  ;;  %v1673_v7 = vrot.slane %v1666_v40, 1  ;;  %v1708_v37 = vmul.f32 %v4112_v46, %v3884_v20 }
 0x24c   : > { %v800_v19 = vadd.f32 %v4406_v45, %v758_v24  ;;  %v1632_v52 = vsel %vm670_vm3, %v5442_v51, %v1631_v21  ;;  %v5342_v18 = vrot.slane %v4501_v26, 5  ;;  %v4534_v24 = vstv %s4480_s8  ;;  %s4877_s8 = sld [smem:[#allocation5 + $0x24]] }
 0x24d   : > { %5439 = vst [vmem:[#allocation31_spill] sm:$0xff] %v4509_v29  ;;  %1271 = vrot.lane.b32.xlu1 %v1268_v14, %s2951_s30  ;;  %v813_v46 = vsel %vm810_vm4, %v811_v30, %v5443_v12  ;;  %v1309_v13 = vrot.slane %v1302_v55, 5  ;;  %v2222_v8 = vmul.f32 %v4534_v24, %v3884_v20  ;;  %v5444_v54 = vrot.slane %v4094_v33, 1  ;;  %v5445_v12 = vld [vmem:[#allocation35_spill] sm:$0xff] }
 0x24e   : > { %v4531_v45 = vpop.permute.xlu1 %1654  ;;  %v2188_v40 = vsel %vm1229_vm6, %v5342_v18, %v2187_v39  ;;  %v818_v63 = vadd.f32 %v813_v46, %v800_v19  ;;  %v1715_v51 = vrot.slane %v1708_v37, 1  ;;  %v1763_v60 = vmul.f32 %v4129_v61, %v3884_v20 }
 0x24f   : > { %1635 = vrot.lane.b32.xlu0 %v1632_v52, %s2951_s30  ;;  %v935_v21 = vpop.permute.xlu0 %934  ;;  %v1674_v14 = vsel %vm670_vm3, %v5444_v54, %v1673_v7  ;;  %v5344_v52 = vrot.slane %v4529_v35, 5  ;;  %v4556_v39 = vmul.f32 %v4307_v32, %v4534_v24  ;;  %v4561_v19 = vstv %s4507_s23  ;;  %s4897_s23 = sld [smem:[#allocation5 + $0x4e]] }
 0x250   : > { %v2229_v7 = vrot.slane %v2222_v8, 5  ;;  %v1344_v37 = vmul.f32 %v4198_v6, %v4561_v19  ;;  %v856_v30 = vadd.f32 %v4436_v56, %v818_v63  ;;  %v5446_v46 = vrot.slane %v5445_v12, 1 }
 0x251   : > { %2191 = vrot.lane.b32.xlu1 %v2188_v40, %s2951_s30  ;;  %v1310_v61 = vsel %vm1229_vm6, %v5344_v52, %v1309_v13  ;;  %v1770_v54 = vrot.slane %v1763_v60, 2  ;;  %v944_v29 = vmul.f32 %v4397_v22, %v5448_v44  ;;  %v5345_v13 = vrot.slane %v4556_v39, 5 }
 0x252   : > { %v4558_v55 = vpop.permute.xlu1 %1696  ;;  %v1716_v40 = vsel %vm670_vm3, %v5446_v46, %v1715_v51  ;;  %v4583_v56 = vmul.f32 %v4151_v1, %v4561_v19  ;;  %v898_v8 = vadd.f32 %v893_v47, %v856_v30  ;;  %v1351_v60 = vrot.slane %v1344_v37, 5 }
 0x253   : > { %1677 = vrot.lane.b32.xlu0 %v1674_v14, %s2952_s25  ;;  %v991_v33 = vpop.permute.xlu0 %990  ;;  %v5447_v14 = vld [vmem:[#allocation37_spill] sm:$0xff]  ;;  %v2230_v44 = vsel %vm1229_vm6, %v5345_v13, %v2229_v7  ;;  %v5449_v47 = vrot.slane %v4179_v3, 2  ;;  %v951_v52 = vrot.slane %v944_v29, 3  ;;  %v5450_v3 = vrot.slane %v4238_v17, 3 }
 0x254   : > { %v1805_v18 = vmul.f32 %v5447_v14, %v3884_v20  ;;  %v940_v46 = vadd.f32 %v935_v21, %v898_v8  ;;  %v1847_v14 = vmul.f32 %v4192_v10, %v3884_v20  ;;  %v5346_v7 = vrot.slane %v4583_v56, 5 }
 0x255   : > { %1313 = vrot.lane.b32.xlu1 %v1310_v61, %s2952_s25  ;;  %v4588_v61 = vstv %s4536_s28  ;;  %v1771_v30 = vsel %vm810_vm4, %v5449_v47, %v1770_v54  ;;  %v4614_v8 = vstv %s4563_s29  ;;  %v953_v10 = vsel %vm950_vm5, %v951_v52, %v5450_v3  ;;  %s4959_s28 = sld [smem:[#allocation5 + $0x55]]  ;;  %s4963_s29 = sld [smem:[#allocation5 + $0x2b]] }
 0x256   : > { %v4585_v63 = vpop.permute.xlu1 %1793  ;;  %v2264_v12 = vmul.f32 %v4588_v61, %v3884_v20  ;;  %v4609_v37 = vmul.f32 %v4307_v32, %v4588_v61  ;;  %v958_v47 = vadd.f32 %v953_v10, %v940_v46  ;;  %v1854_v23 = vrot.slane %v1847_v14, 2 }
 0x257   : > { %1719 = vrot.lane.b32.xlu0 %v1716_v40, %s2953_s24  ;;  %v4592_v51 = vpop.permute.xlu0 %1011  ;;  %v1812_v40 = vrot.slane %v1805_v18, 2  ;;  %v1352_v18 = vsel %vm1229_vm6, %v5346_v7, %v1351_v60  ;;  %v1902_v17 = vmul.f32 %v4203_v57, %v3884_v20  ;;  %v4636_v60 = vmul.f32 %v4151_v1, %v4614_v8 }
 0x258   : > { %v2271_v54 = vrot.slane %v2264_v12, 5  ;;  %v5347_v52 = vrot.slane %v4609_v37, 5  ;;  %v4641_v46 = vstv %s4590_s4  ;;  %v996_v3 = vadd.f32 %v991_v33, %v958_v47  ;;  %s2670_s4 = sld [smem:[#allocation5 + $0x5c]] }
 0x259   : > { %2233 = vrot.lane.b32.xlu1 %v2230_v44, %s2952_s25  ;;  %v1400_v44 = vmul.f32 %v4198_v6, %v4614_v8  ;;  %v2319_v14 = vmul.f32 %v4641_v46, %v3884_v20  ;;  %v5452_v10 = vrot.slane %v4246_v11, 2  ;;  %v1944_v7 = vmul.f32 %v4228_v5, %v3884_v20 }
 0x25a   : > { %v4611_v21 = vpop.permute.xlu1 %1835  ;;  %v2272_v57 = vsel %vm1229_vm6, %v5347_v52, %v2271_v54  ;;  %v5349_v54 = vrot.slane %v4636_v60, 6  ;;  %v4669_v47 = vstv %s4616_s6  ;;  %v1986_v52 = vmul.f32 %v4298_v9, %v3884_v20  ;;  %s2641_s6 = sld [smem:[#allocation5 + $0x3f]] }
 0x25b   : > { %1774 = vrot.lane.b32.xlu0 %v1771_v30, %s2951_s30  ;;  %v1033_v29 = vpop.permute.xlu0 %1032  ;;  %v5451_v30 = vrot.slane %v4213_v38, 2  ;;  %5454 = vst [vmem:[#allocation22_spill] sm:$0xff] %v4669_v47 }
 0x25d   : > { %1355 = vrot.lane.b32.xlu1 %v1352_v18, %s2953_s24  ;;  %v1813_v13 = vsel %vm810_vm4, %v5451_v30, %v1812_v40  ;;  %v1084_v40 = vmul.f32 %v4397_v22, %v4084_v43  ;;  %v1855_v18 = vsel %vm810_vm4, %v5452_v10, %v1854_v23  ;;  %v1909_v30 = vrot.slane %v1902_v17, 3 }
 0x25e   : > { %v4638_v12 = vpop.permute.xlu1 %1932  ;;  %v4664_v43 = vmul.f32 %v4307_v32, %v4641_v46  ;;  %v2326_v17 = vrot.slane %v2319_v14, 6 }
 0x25f   : > { %1816 = vrot.lane.b32.xlu0 %v1813_v13, %s2952_s25  ;;  %v4645_v38 = vpop.permute.xlu0 %1053  ;;  %v1407_v13 = vrot.slane %v1400_v44, 6  ;;  %v1038_v44 = vadd.f32 %v1033_v29, %v996_v3  ;;  %v1090_v23 = vrot.slane %v1084_v40, 4  ;;  %v5455_v3 = vrot.slane %v4283_v58, 3 }
 0x260   : > { %5453 = vst [vmem:[#allocation19_spill] sm:$0xff] %v4664_v43  ;;  %v5348_v14 = vrot.slane %v4664_v43, 6 }
 0x261   : > { %2275 = vrot.lane.b32.xlu1 %v2272_v57, %s2953_s24  ;;  %v1408_v5 = vsel %vm1369_vm7, %v5349_v54, %v1407_v13  ;;  %v1442_v57 = vmul.f32 %v4198_v6, %v4669_v47  ;;  %v1910_v10 = vsel %vm950_vm5, %v5455_v3, %v1909_v30  ;;  %v5456_v13 = vrot.slane %v4338_v49, 4 }
 0x262   : > { %v4666_v33 = vpop.permute.xlu1 %1974  ;;  %v4702_v30 = vstv %s4643_s17  ;;  %v2327_v49 = vsel %vm1369_vm7, %v5348_v14, %v2326_v17  ;;  %v2083_v54 = vmul.f32 %v4404_v0, %v3884_v20  ;;  %s2648_s17 = sld [smem:[#allocation5 + $0x46]] }
 0x263   : > { %1858 = vrot.lane.b32.xlu0 %v1855_v18, %s2953_s24  ;;  %v1075_v11 = vpop.permute.xlu0 %1074  ;;  %v1951_v18 = vrot.slane %v1944_v7, 3  ;;  %v1092_v40 = vsel %vm192_vm0, %v1090_v23, %v5456_v13  ;;  %5459 = vst [vmem:[#allocation25_spill] sm:$0xff] %v4702_v30  ;;  %v2041_v13 = vmul.f32 %v4333_v42, %v3884_v20 }
 0x264   : > { %v1080_v29 = vadd.f32 %v1075_v11, %v1038_v44  ;;  %v4695_v44 = vmul.f32 %v4151_v1, %v4669_v47  ;;  %v1449_v11 = vrot.slane %v1442_v57, 6  ;;  %v4721_v57 = vmul.f32 %v4307_v32, %v4702_v30 }
 0x265   : > { %1411 = vrot.lane.b32.xlu1 %v1408_v5, %s2951_s30  ;;  %v2361_v5 = vmul.f32 %v4702_v30, %v3884_v20  ;;  %v2048_v14 = vrot.slane %v2041_v13, 4 }
 0x266   : > { %5457 = vst [vmem:[#allocation30_spill] sm:$0xff] %v4695_v44  ;;  %v4699_v58 = vpop.permute.xlu1 %2071  ;;  %v1097_v7 = vadd.f32 %v1092_v40, %v1080_v29  ;;  %v5460_v29 = vrot.slane %v4311_v4, 3  ;;  %v5350_v17 = vrot.slane %v4695_v44, 6  ;;  %5461 = vst [vmem:[#allocation28_spill] sm:$0xff] %v4721_v57  ;;  %v4729_v4 = vstv %s4673_s3  ;;  %s2655_s3 = sld [smem:[#allocation5 + $0x4d]] }
 0x267   : > { %1913 = vrot.lane.b32.xlu0 %v1910_v10, %s2951_s30  ;;  %5458 = vst [vmem:[#allocation27_spill] sm:$0xff] %v4699_v58  ;;  %v1130_v9 = vpop.permute.xlu0 %1129  ;;  %v1993_v10 = vrot.slane %v1986_v52, 3  ;;  %v1605_v13 = vmul.f32 %v4025_v36, %v4729_v4  ;;  %v4763_v20 = vmul.f32 %v4307_v32, %v4729_v4 }
 0x268   : > { %v1135_v23 = vadd.f32 %v1130_v9, %v1097_v7  ;;  %v1952_v3 = vsel %vm950_vm5, %v5460_v29, %v1951_v18  ;;  %v4726_v7 = vstv %s4671_s21  ;;  %v1450_v42 = vsel %vm1369_vm7, %v5350_v17, %v1449_v11  ;;  %s2620_s21 = sld [smem:[#allocation5 + $0x2a]] }
 0x269   : > { %2330 = vrot.lane.b32.xlu1 %v2327_v49, %s2951_s30  ;;  %5463 = vst [vmem:[#allocation35_spill] sm:$0xff] %v4726_v7  ;;  %v2368_v18 = vrot.slane %v2361_v5, 6  ;;  %v1484_v9 = vmul.f32 %v4198_v6, %v4726_v7  ;;  %v5464_v29 = vrot.slane %v4355_v15, 3  ;;  %v5355_v11 = vrot.slane %v4721_v57, 6  ;;  %v5467_v15 = vld [vmem:[#allocation26_spill] sm:$0xff]  ;;  %v5472_v57 = vld [vmem:[#allocation23_spill] sm:$0xff] }
 0x26a   : > { %v4723_v40 = vpop.permute.xlu1 %2113  ;;  %v4752_v6 = vmul.f32 %v4151_v1, %v4726_v7  ;;  %v4755_v5 = vstv %s4697_s7  ;;  %v4776_v49 = vld [vmem:[#allocation4 + $0x28] sm:$0x3f]  ;;  %v1611_v43 = vrot.slane %v1605_v13, 1  ;;  %v5480_v13 = vrot.slane %v4763_v20, 1  ;;  %s2669_s7 = sld [smem:[#allocation5 + $0x5b]] }
 0x26b   : > { %1955 = vrot.lane.b32.xlu0 %v1952_v3, %s2952_s25  ;;  %5462 = vst [vmem:[#allocation20_spill] sm:$0xff] %v4723_v40  ;;  %v4731_v52 = vpop.permute.xlu0 %1150  ;;  %v1994_v3 = vsel %vm950_vm5, %v5464_v29, %v1993_v10  ;;  %v5465_v40 = vstv %s3916_s19  ;;  %v682_v10 = vmul.f32 %v4397_v22, %v5467_v15  ;;  %s4765_s19 = sld [smem:[#allocation5 + $0x40]]  ;;  %v2369_v15 = vsel %vm1369_vm7, %v5355_v11, %v2368_v18 }
 0x26c   : > { %v588_v58 = vmul.f32 %v4397_v22, %v5465_v40  ;;  %5466 = vst [vmem:[#allocation37_spill] sm:$0xff] %v4752_v6  ;;  %v4770_v40 = vstv %s4704_s27  ;;  %v1491_v17 = vrot.slane %v1484_v9, 6  ;;  %v5360_v9 = vrot.slane %v4752_v6, 6  ;;  %s2578_s27 = sshll.u32 %s3138_s18, 4 }
 0x26d   : > { %1453 = vrot.lane.b32.xlu1 %v1450_v42, %s2952_s25  ;;  %5469 = vst [vmem:[#allocation26_spill] sm:$0xff] %v4770_v40  ;;  %v5470_v42 = vld [vmem:[#allocation21_spill] sm:$0xff]  ;;  %v2403_v7 = vmul.f32 %v4776_v49, %v4770_v40  ;;  %v4791_v11 = vmul.f32 %v4307_v32, %v4770_v40 }
 0x26e   : > { %v4767_v0 = vpop.permute.xlu1 %1290  ;;  %v618_v29 = vadd.f32 %v5470_v42, %v588_v58  ;;  %v2090_v58 = vrot.slane %v2083_v54, 4  ;;  %v2125_v42 = vmul.f32 %v4776_v49, %v4432_v59 }
 0x26f   : > { %1997 = vrot.lane.b32.xlu0 %v1994_v3, %s2953_s24  ;;  %5468 = vst [vmem:[#allocation32_spill] sm:$0xff] %v4767_v0  ;;  %v1172_v3 = vpop.permute.xlu0 %1171  ;;  %v5471_v0 = vrot.slane %v4374_v41, 4  ;;  %v688_v41 = vrot.slane %v682_v10, 1  ;;  %v5476_v10 = vld [vmem:[#allocation38_spill] sm:$0xff] }
 0x270   : > { %v1177_v44 = vadd.f32 %v1172_v3, %v1135_v23  ;;  %v646_v18 = vadd.f32 %v5472_v57, %v618_v29  ;;  %v4795_v23 = vmul.f32 %v4151_v1, %v4755_v5  ;;  %v1492_v29 = vsel %vm1369_vm7, %v5360_v9, %v1491_v17 }
 0x271   : > { %2372 = vrot.lane.b32.xlu1 %v2369_v15, %s2952_s25  ;;  %v2049_v30 = vsel %vm192_vm0, %v5471_v0, %v2048_v14  ;;  %v5473_v14 = vld [vmem:[#allocation29_spill] sm:$0xff]  ;;  %v5474_v0 = vstv %s4680_s5  ;;  %v2410_v3 = vrot.slane %v2403_v7, 6  ;;  %v1223_v15 = vmul.f32 %v4397_v22, %v4755_v5 }
 0x272   : > { %v822_v54 = vmul.f32 %v4397_v22, %v5473_v14  ;;  %v1512_v57 = vmul.f32 %v4025_v36, %v5474_v0  ;;  %v5477_v40 = vrot.slane %v5476_v10, 1  ;;  %v4813_v59 = vpop.permute.xlu1 %2210  ;;  %v5478_v0 = vrot.slane %v4414_v27, 4 }
 0x273   : > { %2052 = vrot.lane.b32.xlu0 %v2049_v30, %s2951_s30  ;;  %v4803_v30 = vpop.permute.xlu0 %1192  ;;  %v2132_v47 = vrot.slane %v2125_v42, 4  ;;  %v2408_v9 = vrot.slane %v4791_v11, 6  ;;  %v1231_v10 = vrot.slane %v4795_v23, 5  ;;  %v2178_v27 = vmul.f32 %v4025_v36, %v4478_v34 }
 0x274   : > { %5475 = vst [vmem:[#allocation21_spill] sm:$0xff] %v4803_v30  ;;  %v690_v14 = vsel %vm670_vm3, %v688_v41, %v5477_v40  ;;  %v2091_v6 = vsel %vm192_vm0, %v5478_v0, %v2090_v58  ;;  %v5479_v30 = vld [vmem:[#allocation14_spill] sm:$0xff]  ;;  %v1613_v40 = vsel %vm670_vm3, %v1611_v43, %v5480_v13  ;;  %v4827_v41 = vstv %s4765_s19  ;;  %v5481_v58 = vld [vmem:[#allocation15_spill] sm:$0xff]  ;;  %s187_s19 = scalar_lea.vmem [#allocation10], %s2578_s27 }
 0x275   : > { %1495 = vrot.lane.b32.xlu1 %v1492_v29, %s2953_s24  ;;  %v1542_v17 = vadd.f32 %v5479_v30, %v1512_v57  ;;  %v695_v7 = vadd.f32 %v690_v14, %v646_v18  ;;  %v1230_v30 = vrot.slane %v1223_v15, 5  ;;  %v4838_v29 = vmul.f32 %v4307_v32, %v4827_v41 }
 0x276   : > { %v5482_v34 = vrot.slane %v4444_v62, 4  ;;  %v828_v0 = vrot.slane %v822_v54, 2  ;;  %v1744_v15 = vmul.f32 %v4025_v36, %v4827_v41  ;;  %v2184_v13 = vrot.slane %v2178_v27, 5 }
 0x277   : > { %2094 = vrot.lane.b32.xlu0 %v2091_v6, %s2952_s25  ;;  %v1570_v42 = vadd.f32 %v5481_v58, %v1542_v17  ;;  %v737_v57 = vadd.f32 %v4316_v53, %v695_v7  ;;  %v1214_v18 = vpop.permute.xlu0 %1213  ;;  %v2411_v6 = vsel %vm1369_vm7, %v2408_v9, %v2410_v3  ;;  %v1232_v3 = vsel %vm1229_vm6, %v1230_v30, %v1231_v10  ;;  %v5485_v30 = vld [vmem:[#allocation33_spill] sm:$0xff] }
 0x278   : > { %v1219_v43 = vadd.f32 %v1214_v18, %v1177_v44  ;;  %v2133_v14 = vsel %vm192_vm0, %v5482_v34, %v2132_v47  ;;  %v4851_v44 = vpop.permute.xlu1 %1332  ;;  %v1300_v62 = vmul.f32 %v4397_v22, %v4505_v31  ;;  %v5483_v54 = vrot.slane %v4234_v25, 2 }
 0x279   : > { %2414 = vrot.lane.b32.xlu1 %v2411_v6, %s2953_s24  ;;  %v779_v53 = vadd.f32 %v4379_v50, %v737_v57  ;;  %v1618_v17 = vadd.f32 %v1613_v40, %v1570_v42  ;;  %v1751_v58 = vrot.slane %v4838_v29, 2  ;;  %v5484_v57 = vrot.slane %v4501_v26, 5 }
 0x27a   : > { %v1237_v7 = vadd.f32 %v1232_v3, %v1219_v43  ;;  %v830_v40 = vsel %vm810_vm4, %v828_v0, %v5483_v54  ;;  %v962_v31 = vmul.f32 %v4397_v22, %v5485_v30  ;;  %v1750_v25 = vrot.slane %v1744_v15, 2  ;;  %v5489_v54 = vld [vmem:[#allocation42_spill] sm:$0xff] }
 0x27b   : > { %2136 = vrot.lane.b32.xlu0 %v2133_v14, %s2953_s24  ;;  %v1660_v50 = vadd.f32 %v4531_v45, %v1618_v17  ;;  %v1270_v47 = vpop.permute.xlu0 %1269  ;;  %v2186_v18 = vsel %vm1229_vm6, %v2184_v13, %v5484_v57  ;;  %v835_v6 = vadd.f32 %v830_v40, %v779_v53  ;;  %v1306_v45 = vrot.slane %v1300_v62, 5  ;;  %v4903_v57 = vld [vmem:[#allocation4 + $0x18] sm:$0xff] }
 0x27c   : > { %v4860_v42 = vadd.f32 %v1270_v47, %v1237_v7  ;;  %v2220_v43 = vmul.f32 %v4025_v36, %v4534_v24  ;;  %v1752_v26 = vsel %vm810_vm4, %v1750_v25, %v1751_v58  ;;  %v4875_v53 = vstv %s2649_s16  ;;  %s2684_s16 = sshll.u32 %s2922_s12, 8  ;;  %s2955_s12 = smov [#allocation10]  }
 0x27d   : > { %v1702_v27 = vadd.f32 %v4558_v55, %v1660_v50  ;;  %v877_v34 = vadd.f32 %v4459_v16, %v835_v6  ;;  %v4879_v55 = vpop.permute.xlu1 %2252  ;;  %v5486_v0 = vrot.slane %v4529_v35, 5  ;;  %v968_v24 = vrot.slane %v962_v31, 3  ;;  %v5488_v50 = vld [vmem:[#allocation34_spill] sm:$0xff] }
 0x27e   : > { %v1607_v16 = vmul.f32 %v4776_v49, %v4729_v4  ;;  %v5487_v15 = vstv %s4680_s5  ;;  %v4893_v13 = vmul.f32 %v4307_v32, %v4875_v53  ;;  %v2226_v62 = vrot.slane %v2220_v43, 5  ;;  %s2662_s5 = sld [smem:[#allocation5 + $0x54]] }
 0x27f   : > { %2189 = vrot.lane.b32.xlu0 %v2186_v18, %s2951_s30  ;;  %v1657_v14 = vpop.permute.xlu0 %1656  ;;  %v1308_v17 = vsel %vm1229_vm6, %v1306_v45, %v5486_v0  ;;  %v919_v3 = vadd.f32 %v4511_v2, %v877_v34  ;;  %v1757_v36 = vadd.f32 %v1752_v26, %v1702_v27  ;;  %v1513_v7 = vmul.f32 %v4307_v32, %v5487_v15  ;;  %v5492_v45 = vld [vmem:[#allocation36_spill] sm:$0xff] }
 0x280   : > { %v1342_v35 = vmul.f32 %v4397_v22, %v4561_v19  ;;  %v5490_v4 = vrot.slane %v5489_v54, 3  ;;  %v1883_v18 = vmul.f32 %v4903_v57, %v4875_v53  ;;  %v5491_v6 = vrot.slane %v4556_v39, 5 }
 0x281   : > { %v1543_v47 = vadd.f32 %v5488_v50, %v1513_v7  ;;  %v1799_v19 = vadd.f32 %v4585_v63, %v1757_v36  ;;  %v1101_v31 = vmul.f32 %v4397_v22, %v4097_v48  ;;  %v1614_v25 = vrot.slane %v1607_v16, 1  ;;  %v4916_v26 = vpop.permute.xlu1 %1430 }
 0x282   : > { %v970_v40 = vsel %vm950_vm5, %v968_v24, %v5490_v4  ;;  %v2228_v27 = vsel %vm1229_vm6, %v2226_v62, %v5491_v6  ;;  %v1890_v34 = vrot.slane %v4893_v13, 3  ;;  %v1348_v0 = vrot.slane %v1342_v35, 5 }
 0x283   : > { %1311 = vrot.lane.b32.xlu0 %v1308_v17, %s2952_s25  ;;  %v1699_v2 = vpop.permute.xlu0 %1698  ;;  %v975_v30 = vadd.f32 %v970_v40, %v919_v3  ;;  %v1571_v43 = vadd.f32 %v5492_v45, %v1543_v47  ;;  %v2262_v39 = vmul.f32 %v4903_v57, %v4588_v61  ;;  %v1841_v63 = vadd.f32 %v4611_v21, %v1799_v19 }
 0x284   : > { %v1889_v48 = vrot.slane %v1883_v18, 3  ;;  %v4923_v36 = vstv %s4877_s8  ;;  %v5493_v24 = vrot.slane %v4583_v56, 5  ;;  %v1107_v7 = vrot.slane %v1101_v31, 4  ;;  %s2471_s8 = sshll.u32 %s187_s19, 4  ;;  %s5244_s8 = int_to_ptr.vmem [resolvable:$true] %s2471_s8 }
 0x285   : > { %v1017_v17 = vadd.f32 %v4592_v51, %v975_v30  ;;  %v5494_v62 = vrot.slane %v4763_v20, 1  ;;  %v1746_v51 = vmul.f32 %v4776_v49, %v4827_v41  ;;  %v2268_v56 = vrot.slane %v2262_v39, 5  ;;  %v4954_v6 = vpop.permute.xlu1 %2349 }
 0x286   : > { %v1350_v16 = vsel %vm1229_vm6, %v1348_v0, %v5493_v24  ;;  %v1891_v21 = vsel %vm950_vm5, %v1889_v48, %v1890_v34  ;;  %v1398_v50 = vmul.f32 %v4397_v22, %v4614_v8  ;;  %v4941_v47 = vstv %s4897_s23  ;;  %v5498_v24 = vld [vmem:[#allocation21_spill] sm:$0xff] }
 0x287   : > { %2231 = vrot.lane.b32.xlu0 %v2228_v27, %s2952_s25  ;;  %v1796_v3 = vpop.permute.xlu0 %1795  ;;  %v1059_v15 = vadd.f32 %v4645_v38, %v1017_v17  ;;  %v1615_v61 = vsel %vm670_vm3, %v5494_v62, %v1614_v25  ;;  %v1896_v38 = vadd.f32 %v1891_v21, %v1841_v63  ;;  %v4945_v20 = vmul.f32 %v4151_v1, %v4923_v36 }
 0x288   : > { %v1619_v35 = vadd.f32 %v1615_v61, %v1571_v43  ;;  %v4949_v41 = vmul.f32 %v4307_v32, %v4941_v47  ;;  %v5495_v4 = vrot.slane %v4370_v28, 4  ;;  %v5496_v8 = vrot.slane %v4609_v37, 5 }
 0x289   : > { %v1241_v1 = vmul.f32 %v4397_v22, %v4923_v36  ;;  %v1753_v30 = vrot.slane %v1746_v51, 2  ;;  %v2022_v28 = vmul.f32 %v4903_v57, %v4941_v47  ;;  %v1404_v31 = vrot.slane %v1398_v50, 6  ;;  %v5500_v51 = vld [vmem:[#allocation19_spill] sm:$0xff] }
 0x28a   : > { %v1109_v40 = vsel %vm192_vm0, %v1107_v7, %v5495_v4  ;;  %v1661_v18 = vadd.f32 %v1657_v14, %v1619_v35  ;;  %v2270_v27 = vsel %vm1229_vm6, %v2268_v56, %v5496_v8  ;;  %v2317_v37 = vmul.f32 %v4903_v57, %v4641_v46  ;;  %v5499_v7 = vld [vmem:[#allocation22_spill] sm:$0xff]  ;;  %v5502_v8 = vld [vmem:[#allocation25_spill] sm:$0xff] }
 0x28b   : > { %1353 = vrot.lane.b32.xlu0 %v1350_v16, %s2953_s24  ;;  %v1114_v19 = vadd.f32 %v1109_v40, %v1059_v15  ;;  %v1938_v25 = vadd.f32 %v4638_v12, %v1896_v38  ;;  %v2029_v0 = vrot.slane %v4949_v41, 4  ;;  %v1248_v39 = vrot.slane %v4945_v20, 5  ;;  %v4985_v16 = vpop.permute.xlu1 %1472 }
 0x28c   : > { %v1703_v14 = vadd.f32 %v1699_v2, %v1661_v18  ;;  %v5497_v17 = vrot.slane %v4636_v60, 6  ;;  %v1247_v48 = vrot.slane %v1241_v1, 5  ;;  %v1754_v12 = vsel %vm810_vm4, %v1751_v58, %v1753_v30 }
 0x28d   : > { %v1838_v54 = vpop.permute.xlu0 %1837  ;;  %v1156_v45 = vadd.f32 %v4731_v52, %v1114_v19  ;;  %v1980_v2 = vadd.f32 %v4666_v33, %v1938_v25  ;;  %v2028_v52 = vrot.slane %v2022_v28, 4  ;;  %v2323_v60 = vrot.slane %v2317_v37, 6  ;;  %v5017_v28 = vld [vmem:[#allocation4 + $0x8] sm:$0xff]  ;;  %v5503_v25 = vld [vmem:[#allocation30_spill] sm:$0xff] }
 0x28e   : > { %v1406_v63 = vsel %vm1369_vm7, %v1404_v31, %v5497_v17  ;;  %v1758_v15 = vadd.f32 %v1754_v12, %v1703_v14  ;;  %v1440_v62 = vmul.f32 %v4397_v22, %v5499_v7  ;;  %v1885_v33 = vmul.f32 %v4776_v49, %v4875_v53  ;;  %v5505_v17 = vld [vmem:[#allocation27_spill] sm:$0xff] }
 0x28f   : > { %2273 = vrot.lane.b32.xlu0 %v2270_v27, %s2953_s24  ;;  %v1198_v46 = vadd.f32 %v5498_v24, %v1156_v45  ;;  %v2030_v29 = vsel %vm192_vm0, %v2028_v52, %v2029_v0  ;;  %v1249_v58 = vsel %vm1229_vm6, %v1247_v48, %v1248_v39  ;;  %v5501_v21 = vrot.slane %v5500_v51, 6  ;;  %v2392_v31 = vpop.permute.xlu1 %2391  ;;  %v5507_v52 = vld [vmem:[#allocation35_spill] sm:$0xff]  ;;  %v5509_v51 = vld [vmem:[#allocation28_spill] sm:$0xff] }
 0x290   : > { %v2035_v56 = vadd.f32 %v2030_v29, %v1980_v2  ;;  %v5001_v50 = vstv %s4959_s28  ;;  %v5004_v4 = vstv %s4963_s29  ;;  %v1800_v40 = vadd.f32 %v1796_v3, %v1758_v15  ;;  %v5506_v2 = vld [vmem:[#allocation32_spill] sm:$0xff]  ;;  %s5242_s29 = scalar_lea.hbm %s5295_s2, %s2684_s16 }
 0x291   : > { %v4972_v43 = vpop.permute.xlu0 %1934  ;;  %v2325_v35 = vsel %vm1369_vm7, %v2323_v60, %v5501_v21  ;;  %v1254_v38 = vadd.f32 %v1249_v58, %v1198_v46  ;;  %v5009_v53 = vmul.f32 %v4307_v32, %v5001_v50  ;;  %v1446_v18 = vrot.slane %v1440_v62, 6 }
 0x292   : > { %v2359_v27 = vmul.f32 %v4903_v57, %v5502_v8  ;;  %v1892_v19 = vrot.slane %v1885_v33, 3  ;;  %v2161_v30 = vmul.f32 %v4903_v57, %v5001_v50  ;;  %v5021_v14 = vmul.f32 %v5017_v28, %v5004_v4 }
 0x293   : > { %1409 = vrot.lane.b32.xlu0 %v1406_v63, %s2951_s30  ;;  %v1842_v37 = vadd.f32 %v1838_v54, %v1800_v40  ;;  %v5504_v3 = vrot.slane %v5503_v25, 6  ;;  %v2077_v63 = vadd.f32 %v5505_v17, %v2035_v56  ;;  %v1296_v48 = vadd.f32 %v5506_v2, %v1254_v38  ;;  %v5508_v54 = vld [vmem:[#allocation20_spill] sm:$0xff] }
 0x294   : > { %v1381_v24 = vmul.f32 %v4397_v22, %v5004_v4  ;;  %v2168_v46 = vrot.slane %v5009_v53, 5  ;;  %v2365_v12 = vrot.slane %v2359_v27, 6  ;;  %v1482_v15 = vmul.f32 %v4397_v22, %v5507_v52  ;;  %v5511_v27 = vld [vmem:[#allocation26_spill] sm:$0xff] }
 0x295   : > { %v1977_v61 = vpop.permute.xlu0 %1976  ;;  %v1448_v45 = vsel %vm1369_vm7, %v1446_v18, %v5504_v3  ;;  %v2119_v60 = vadd.f32 %v5508_v54, %v2077_v63  ;;  %v1893_v7 = vsel %vm950_vm5, %v1890_v34, %v1892_v19  ;;  %v2167_v33 = vrot.slane %v2161_v30, 5  ;;  %v5052_v18 = vpop.permute.xlu1 %1633  ;;  %v5512_v3 = vld [vmem:[#allocation37_spill] sm:$0xff] }
 0x296   : > { %v1388_v29 = vrot.slane %v5021_v14, 6  ;;  %v1897_v58 = vadd.f32 %v1893_v7, %v1842_v37  ;;  %v5510_v21 = vrot.slane %v5509_v51, 6  ;;  %v1338_v56 = vadd.f32 %v4851_v44, %v1296_v48 }
 0x297   : > { %2328 = vrot.lane.b32.xlu0 %v2325_v35, %s2951_s30  ;;  %v1387_v38 = vrot.slane %v1381_v24, 6  ;;  %v2299_v40 = vstv %s2670_s4  ;;  %v2024_v22 = vmul.f32 %v4776_v49, %v4941_v47  ;;  %v2169_v13 = vsel %vm1229_vm6, %v2167_v33, %v2168_v46  ;;  %s2954_s30 = smov 127   ;;  %s2458_s4 = scalar_lea.sflag [#allocation7], %s3138_s18 }
 0x298   : > { %v2367_v35 = vsel %vm1369_vm7, %v2365_v12, %v5510_v21  ;;  %v5050_v34 = vmul.f32 %v4307_v32, %v2299_v40  ;;  %v1488_v8 = vrot.slane %v1482_v15, 6  ;;  %v2401_v44 = vmul.f32 %v4903_v57, %v5511_v27  ;;  %v5068_v15 = vld [vmem:[#allocation4 + $0x10] sm:$0x3f] }
 0x299   : > { %v5013_v1 = vpop.permute.xlu0 %2073  ;;  %v2174_v19 = vadd.f32 %v2169_v13, %v2119_v60  ;;  %v1389_v47 = vsel %vm1369_vm7, %v1387_v38, %v1388_v29  ;;  %v2300_v37 = vmul.f32 %v4903_v57, %v2299_v40  ;;  %v1939_v25 = vadd.f32 %v4972_v43, %v1897_v58  ;;  %v5072_v7 = vpop.permute.xlu1 %1675  ;;  %v5514_v13 = vld [vmem:[#allocation24_spill] sm:$0xff] }
 0x29a   : > { %v1394_v63 = vadd.f32 %v1389_v47, %v1338_v56  ;;  %v2031_v2 = vrot.slane %v2024_v22, 4  ;;  %v2307_v48 = vrot.slane %v5050_v34, 6  ;;  %v2407_v12 = vrot.slane %v2401_v44, 6 }
 0x29b   : > { %1451 = vrot.lane.b32.xlu0 %v1448_v45, %s2952_s25  ;;  %v5513_v45 = vrot.slane %v5512_v3, 6  ;;  %v2216_v17 = vadd.f32 %v4813_v59, %v2174_v19  ;;  %v1981_v24 = vadd.f32 %v1977_v61, %v1939_v25  ;;  %v1243_v43 = vmul.f32 %v5068_v15, %v4923_v36  ;;  %v5110_v25 = vld [vmem:[#allocation4 + $0x20] sm:$0xff] }
 0x29c   : > { %v2306_v60 = vrot.slane %v2300_v37, 6  ;;  %v2409_v59 = vsel %vm1369_vm7, %v2407_v12, %v2408_v9  ;;  %v1436_v33 = vadd.f32 %v4916_v26, %v1394_v63  ;;  %v2032_v61 = vsel %vm192_vm0, %v2029_v0, %v2031_v2  ;;  %v5515_v63 = vld [vmem:[#allocation39_spill] sm:$0xff] }
 0x29d   : > { %v2116_v62 = vpop.permute.xlu0 %2115  ;;  %v1490_v32 = vsel %vm1369_vm7, %v1488_v8, %v5513_v45  ;;  %v2258_v52 = vadd.f32 %v4879_v55, %v2216_v17  ;;  %v2036_v58 = vadd.f32 %v2032_v61, %v1981_v24  ;;  %v1250_v21 = vrot.slane %v1243_v43, 5  ;;  %v5088_v26 = vpop.permute.xlu1 %1717 }
 0x29e   : > { %v2308_v55 = vsel %vm1369_vm7, %v2306_v60, %v2307_v48  ;;  %v1478_v51 = vadd.f32 %v4985_v16, %v1436_v33  ;;  %v2163_v11 = vmul.f32 %v4776_v49, %v5001_v50  ;;  %v1383_v50 = vmul.f32 %v5068_v15, %v5004_v4  ;;  %v5517_v33 = vld [vmem:[#allocation41_spill] sm:$0xff] }
 0x29f   : > { %2370 = vrot.lane.b32.xlu0 %v2367_v35, %s2952_s25  ;;  %v2313_v36 = vadd.f32 %v2308_v55, %v2258_v52  ;;  %v2078_v41 = vadd.f32 %v5013_v1, %v2036_v58  ;;  %v1251_v56 = vsel %vm1229_vm6, %v1248_v39, %v1250_v21  ;;  %s5097_s25 = sld [smem:[#allocation5 + $0x31]]  ;;  %v2302_v34 = vmul.f32 %v4776_v49, %v2299_v40  ;;  %v5516_v52 = vld [vmem:[#allocation40_spill] sm:$0xff] }
 0x2a0   : > { %v2170_v16 = vrot.slane %v2163_v11, 5  ;;  %v1390_v39 = vrot.slane %v1383_v50, 6 }
 0x2a1   : > { %v1293_v30 = vpop.permute.xlu0 %1292  ;;  %v2355_v9 = vadd.f32 %v4954_v6, %v2313_v36  ;;  %v2120_v22 = vadd.f32 %v2116_v62, %v2078_v41  ;;  %v1255_v6 = vadd.f32 %v1251_v56, %v5514_v13  ;;  %v5104_v8 = vpop.permute.xlu1 %1772  ;;  %v2309_v19 = vrot.slane %v2302_v34, 6 }
 0x2a2   : > { %v2171_v20 = vsel %vm1229_vm6, %v2168_v46, %v2170_v16  ;;  %v1391_v44 = vsel %vm1369_vm7, %v1388_v29, %v1390_v39  ;;  %v5518_v39 = vld [vmem:[#allocation16_spill] sm:$0xff] }
 0x2a3   : > { %1493 = vrot.lane.b32.xlu0 %v1490_v32, %s2953_s24  ;;  %v2397_v0 = vadd.f32 %v2392_v31, %v2355_v9  ;;  %v1297_v1 = vadd.f32 %v1293_v30, %v1255_v6  ;;  %v2175_v4 = vadd.f32 %v2171_v20, %v2120_v22  ;;  %v2310_v32 = vsel %vm1369_vm7, %v2307_v48, %v2309_v19 }
 0x2a5   : > { %v2213_v54 = vpop.permute.xlu0 %2212  ;;  %v1505_v53 = vstv %s5097_s25  ;;  %v5113_v40 = vpop.permute.xlu1 %1814  ;;  %s2848_s25 = sshll.u32 %s2955_s12, 4  ;;  %s2849_s25 = int_to_ptr.vmem [resolvable:$false] %s2848_s25 }
 0x2a6   : > { %v2217_v27 = vadd.f32 %v2213_v54, %v2175_v4  ;;  %v1507_v46 = vmul.f32 %v5110_v25, %v1505_v53  ;;  %v1506_v20 = vmul.f32 %v4903_v57, %v1505_v53  ;;  %p2851_p0 = scmp.lt.s32.totalorder %s5244_s8, %s2849_s25 }
 0x2a7   : > { %2412 = vrot.lane.b32.xlu0 %v2409_v59, %s2953_s24  ;;  %s2634_s24 = sld [smem:[#allocation5 + $0x38]] }
 0x2a8   : > { %v1529_v29 = vadd.f32 %v5515_v63, %v1507_v46 }
 0x2a9   : > { %v1335_v35 = vpop.permute.xlu0 %1334  ;;  %v1857_v55 = vpop.permute.xlu1 %1856 }
 0x2aa   : > { %v1339_v62 = vadd.f32 %v1335_v35, %v1297_v1  ;;  %v1557_v43 = vadd.f32 %v5516_v52, %v1529_v29 }
 0x2ab   : > { %2422 = vrot.lane.b32.xlu0 %v1478_v51, %s2954_s30 }
 0x2ac   : > { %v1395_v37 = vadd.f32 %v1391_v44, %v1339_v62  ;;  %v1585_v61 = vadd.f32 %v5517_v33, %v1557_v43 }
 0x2ad   : > { %v2255_v38 = vpop.permute.xlu0 %2254  ;;  %v1587_v3 = vstv %s2634_s24  ;;  %v5124_v11 = vpop.permute.xlu1 %1911  ;;  %s2850_s24 = scalar_lea.vmem %s2849_s25, 512 }
 0x2ae   : > { %v2259_v30 = vadd.f32 %v2255_v38, %v2217_v27  ;;  %v1590_v14 = vmul.f32 %v4776_v49, %v1587_v3  ;;  %v1589_v12 = vmul.f32 %v5110_v25, %v1587_v3  ;;  %v1588_v6 = vmul.f32 %v4903_v57, %v1587_v3  ;;  %v5519_v27 = vld [vmem:[#allocation17_spill] sm:$0xff] }
 0x2af   : > { %2432 = vrot.lane.b32.xlu0 %v2397_v0, %s2954_s30  ;;  %v1726_v3 = vstv %s2641_s6 }
 0x2b0   : > { %v2314_v2 = vadd.f32 %v2310_v32, %v2259_v30  ;;  %v1597_v59 = vrot.slane %v1590_v14, 1  ;;  %v1595_v58 = vrot.slane %v1589_v12, 1  ;;  %v1594_v4 = vrot.slane %v1588_v6, 1 }
 0x2b1   : > { %v1433_v31 = vpop.permute.xlu0 %1432  ;;  %v5126_v56 = vpop.permute.xlu1 %1953  ;;  %v1728_v53 = vmul.f32 %v5110_v25, %v1726_v3  ;;  %v1729_v12 = vmul.f32 %v4776_v49, %v1726_v3 }
 0x2b2   : > { %v1437_v45 = vadd.f32 %v1433_v31, %v1395_v37  ;;  %v1598_v36 = vsel %vm670_vm3, %v1595_v58, %v1597_v59  ;;  %v1528_v31 = vadd.f32 %v5518_v39, %v1506_v20  ;;  %v1596_v19 = vsel %vm670_vm3, %v1594_v4, %v1595_v58 }
 0x2b3   : > { %v1602_v21 = vadd.f32 %v1598_v36, %v1585_v61  ;;  %v1734_v29 = vrot.slane %v1728_v53, 2  ;;  %v1865_v61 = vstv %s2648_s17 }
 0x2b4   : > { %v1556_v44 = vadd.f32 %v5519_v27, %v1528_v31  ;;  %v1866_v36 = vmul.f32 %v4903_v57, %v1865_v61  ;;  %v1868_v6 = vmul.f32 %v4776_v49, %v1865_v61 }
 0x2b5   : > { %v2352_v47 = vpop.permute.xlu0 %2351  ;;  %v5128_v38 = vpop.permute.xlu1 %1995 }
 0x2b6   : > { %v2356_v54 = vadd.f32 %v2352_v47, %v2314_v2  ;;  %v5520_v47 = vld [vmem:[#allocation18_spill] sm:$0xff]  ;;  %v1872_v20 = vrot.slane %v1866_v36, 3 }
 0x2b7   : > { %v1584_v30 = vadd.f32 %v5520_v47, %v1556_v44 }
 0x2b9   : > { %v1475_v17 = vpop.permute.xlu0 %1474  ;;  %v5130_v13 = vpop.permute.xlu1 %2050  ;;  %v1601_v46 = vadd.f32 %v1596_v19, %v1584_v30  ;;  %v1875_v19 = vrot.slane %v1868_v6, 3  ;;  %v2800_v30 = vld [vmem:[#allocation4] sm:$0xff] }
 0x2ba   : > { %v1479_v24 = vadd.f32 %v1475_v17, %v1437_v45  ;;  %v1727_v17 = vmul.f32 %v4903_v57, %v1726_v3  ;;  %v2004_v3 = vstv %s2655_s3 }
 0x2bb   : > { %v1639_v32 = vadd.f32 %v5052_v18, %v1601_v46 }
 0x2bc   : > { %2424 = vrot.lane.b32.xlu1 %v1479_v24, %s2954_s30  ;;  %v1733_v52 = vrot.slane %v1727_v17, 2 }
 0x2bd   : > { %v2394_v60 = vpop.permute.xlu0 %2393  ;;  %v5137_v34 = vpop.permute.xlu1 %2092  ;;  %v1681_v63 = vadd.f32 %v5072_v7, %v1639_v32 }
 0x2be   : > { %v2398_v48 = vadd.f32 %v2394_v60, %v2356_v54  ;;  %v1735_v54 = vsel %vm810_vm4, %v1733_v52, %v1734_v29  ;;  %v1736_v60 = vrot.slane %v1729_v12, 2 }
 0x2bf   : > { %v1723_v2 = vadd.f32 %v5088_v26, %v1681_v63  ;;  %v1867_v26 = vmul.f32 %v5110_v25, %v1865_v61  ;;  %v2005_v63 = vmul.f32 %v4903_v57, %v2004_v3 }
 0x2c0   : > { %2434 = vrot.lane.b32.xlu1 %v2398_v48, %s2954_s30  ;;  %v1737_v58 = vsel %vm810_vm4, %v1734_v29, %v1736_v60  ;;  %s2844_s30 = scalar_lea.vmem %s5244_s8, 256 }
 0x2c1   : > { %v1636_v51 = vpop.permute.xlu0 %1635  ;;  %v5146_v45 = vpop.permute.xlu1 %2134  ;;  %v1740_v18 = vadd.f32 %v1735_v54, %v1723_v2  ;;  %v2011_v61 = vrot.slane %v2005_v63, 4  ;;  %p2845_p4 = scmp.ne.s32.totalorder %s5244_s8, %s2844_s30  ;;  %p2852_p3 = scmp.lt.s32.totalorder %s2850_s24, %s2844_s30 }
 0x2c2   : > { %v1640_v35 = vadd.f32 %v1636_v51, %v1602_v21 }
 0x2c3   : > { %v1778_v48 = vadd.f32 %v5104_v8, %v1740_v18  ;;  %v5175_v8 = vstv %s2620_s21  ;;  %p2846_p2 = pnand %p2845_p4, %p5522_p8  ;;  %p2853_p5 = por %p2852_p3, %p2851_p0 }
 0x2c4   : > { %v5180_v44 = vmul.f32 %v5017_v28, %v5175_v8  ;;  %v1363_v46 = vmul.f32 %v2800_v30, %v5175_v8 }
 0x2c5   : > { %v1678_v9 = vpop.permute.xlu0 %1677  ;;  %v5155_v24 = vpop.permute.xlu1 %1271  ;;  %p2847_p12 = pneg %p2846_p2 }
 0x2c6   : > { %v1682_v41 = vadd.f32 %v1678_v9, %v1640_v35  ;;  %v1820_v35 = vadd.f32 %v5113_v40, %v1778_v48  ;;  %v1873_v9 = vrot.slane %v1867_v26, 3  ;;  %v1371_v32 = vrot.slane %v5180_v44, 6 }
 0x2c7   : > { %v1370_v2 = vrot.slane %v1363_v46, 6  ;;  %p2854_p11 = pnand %p2853_p5, %p2847_p12 }
 0x2c8   : > { %v1874_v4 = vsel %vm950_vm5, %v1872_v20, %v1873_v9  ;;  %v1876_v17 = vsel %vm950_vm5, %v1873_v9, %v1875_v19 }
 0x2c9   : > { %v1720_v0 = vpop.permute.xlu0 %1719  ;;  %v5163_v7 = vpop.permute.xlu1 %2191  ;;  %v1372_v18 = vsel %vm1369_vm7, %v1370_v2, %v1371_v32 }
 0x2ca   : > { %v1724_v59 = vadd.f32 %v1720_v0, %v1682_v41  ;;  %v1862_v41 = vadd.f32 %v1857_v55, %v1820_v35 }
 0x2cc   : > { %v1741_v51 = vadd.f32 %v1737_v58, %v1724_v59  ;;  %v1879_v40 = vadd.f32 %v1874_v4, %v1862_v41 }
 0x2cd   : > { %v1775_v16 = vpop.permute.xlu0 %1774  ;;  %v5172_v0 = vpop.permute.xlu1 %1313 }
 0x2ce   : > { %v1779_v39 = vadd.f32 %v1775_v16, %v1741_v51  ;;  %v2006_v16 = vmul.f32 %v5110_v25, %v2004_v3 }
 0x2d0   : > { %v2012_v54 = vrot.slane %v2006_v16, 4 }
 0x2d1   : > { %v1817_v50 = vpop.permute.xlu0 %1816  ;;  %v5183_v53 = vpop.permute.xlu1 %2233 }
 0x2d2   : > { %v1821_v27 = vadd.f32 %v1817_v50, %v1779_v39  ;;  %v1917_v50 = vadd.f32 %v5124_v11, %v1879_v40 }
 0x2d4   : > { %v1959_v12 = vadd.f32 %v5126_v56, %v1917_v50  ;;  %v2013_v56 = vsel %vm192_vm0, %v2011_v61, %v2012_v54 }
 0x2d5   : > { %v1859_v22 = vpop.permute.xlu0 %1858  ;;  %v5196_v60 = vpop.permute.xlu1 %1355 }
 0x2d6   : > { %v1863_v47 = vadd.f32 %v1859_v22, %v1821_v27  ;;  %v2001_v11 = vadd.f32 %v5128_v38, %v1959_v12  ;;  %v2143_v38 = vstv %s2662_s5 }
 0x2d7   : > { %v2145_v6 = vmul.f32 %v5110_v25, %v2143_v38  ;;  %v2146_v19 = vmul.f32 %v4776_v49, %v2143_v38 }
 0x2d8   : > { %v1880_v22 = vadd.f32 %v1876_v17, %v1863_v47  ;;  %v2018_v36 = vadd.f32 %v2013_v56, %v2001_v11  ;;  %v2282_v17 = vstv %s2669_s7  ;;  %v1225_v11 = vmul.f32 %v5068_v15, %v4755_v5 }
 0x2d9   : > { %v5133_v1 = vpop.permute.xlu0 %1913  ;;  %v2276_v41 = vpop.permute.xlu1 %2275  ;;  %v2151_v27 = vrot.slane %v2145_v6, 5  ;;  %v2153_v16 = vrot.slane %v2146_v19, 5  ;;  %v2285_v56 = vmul.f32 %v4776_v49, %v2282_v17 }
 0x2da   : > { %v1918_v26 = vadd.f32 %v5133_v1, %v1880_v22  ;;  %v2056_v20 = vadd.f32 %v5130_v13, %v2018_v36 }
 0x2dd   : > { %v5139_v62 = vpop.permute.xlu0 %1955 }
 0x2de   : > { %v1960_v58 = vadd.f32 %v5139_v62, %v1918_v26  ;;  %v2098_v62 = vadd.f32 %v5137_v34, %v2056_v20  ;;  %v2284_v34 = vmul.f32 %v5110_v25, %v2282_v17  ;;  %v1233_v26 = vrot.slane %v1225_v11, 5  ;;  %v5521_v20 = vld [vmem:[#allocation31_spill] sm:$0xff] }
 0x2e0   : > { %v2140_v40 = vadd.f32 %v5146_v45, %v2098_v62  ;;  %v1234_v5 = vsel %vm1229_vm6, %v1231_v10, %v1233_v26 }
 0x2e1   : > { %v5144_v37 = vpop.permute.xlu0 %1997 }
 0x2e2   : > { %v2002_v35 = vadd.f32 %v5144_v37, %v1960_v58  ;;  %v1412_v37 = vpop.permute.xlu1 %1411 }
 0x2e5   : > { %v5151_v14 = vpop.permute.xlu0 %2052 }
 0x2e6   : > { %v2331_v45 = vpop.permute.xlu1 %2330 }
 0x2e9   : > { %v5158_v43 = vpop.permute.xlu0 %2094 }
 0x2ed   : > { %v5161_v33 = vpop.permute.xlu0 %2136 }
 0x2f1   : > { %v5169_v21 = vpop.permute.xlu0 %2189 }
 0x2f5   : > { %v1312_v31 = vpop.permute.xlu0 %1311 }
 0x2f6   : > { %v1317_v28 = vadd.f32 %v1312_v31, %v4860_v42  ;;  %v2007_v42 = vmul.f32 %v4776_v49, %v2004_v3  ;;  %v2144_v31 = vmul.f32 %v4903_v57, %v2143_v38  ;;  %v1365_v49 = vmul.f32 %v5068_v15, %v5175_v8 }
 0x2f8   : > { %v2014_v51 = vrot.slane %v2007_v42, 4  ;;  %v2150_v30 = vrot.slane %v2144_v31, 5 }
 0x2f9   : > { %v2232_v55 = vpop.permute.xlu0 %2231 }
 0x2fa   : > { %v2015_v39 = vsel %vm192_vm0, %v2012_v54, %v2014_v51  ;;  %v2152_v3 = vsel %vm1229_vm6, %v2150_v30, %v2151_v27 }
 0x2fb   : > { %v2019_v1 = vadd.f32 %v2015_v39, %v2002_v35  ;;  %v2157_v50 = vadd.f32 %v2152_v3, %v2140_v40  ;;  %v1238_v39 = vadd.f32 %v1234_v5, %v5521_v20  ;;  %v1373_v40 = vrot.slane %v1365_v49, 6 }
 0x2fd   : > { %v1354_v29 = vpop.permute.xlu0 %1353  ;;  %v2057_v47 = vadd.f32 %v5151_v14, %v2019_v1  ;;  %v2195_v22 = vadd.f32 %v5169_v21, %v2157_v50  ;;  %v2154_v14 = vsel %vm1229_vm6, %v2151_v27, %v2153_v16  ;;  %v1276_v31 = vadd.f32 %v5155_v24, %v1238_v39 }
 0x2fe   : > { %v1359_v52 = vadd.f32 %v1354_v29, %v1317_v28  ;;  %v2283_v29 = vmul.f32 %v4903_v57, %v2282_v17  ;;  %v1374_v15 = vsel %vm1369_vm7, %v1371_v32, %v1373_v40 }
 0x2ff   : > { %v2099_v13 = vadd.f32 %v5158_v43, %v2057_v47  ;;  %v2237_v2 = vadd.f32 %v2232_v55, %v2195_v22  ;;  %v2290_v43 = vrot.slane %v2284_v34, 6  ;;  %v1318_v10 = vadd.f32 %v5172_v0, %v1276_v31 }
 0x300   : > { %v1377_v59 = vadd.f32 %v1372_v18, %v1359_v52  ;;  %v2289_v18 = vrot.slane %v2283_v29, 6 }
 0x301   : > { %v2274_v48 = vpop.permute.xlu0 %2273  ;;  %v2141_v28 = vadd.f32 %v5161_v33, %v2099_v13  ;;  %v1454_v33 = vpop.permute.xlu1 %1453  ;;  %v1360_v47 = vadd.f32 %v5196_v60, %v1318_v10 }
 0x302   : > { %v2279_v54 = vadd.f32 %v2274_v48, %v2237_v2  ;;  %v2291_v42 = vsel %vm1369_vm7, %v2289_v18, %v2290_v43 }
 0x303   : > { %v2158_v12 = vadd.f32 %v2154_v14, %v2141_v28  ;;  %v1378_v30 = vadd.f32 %v1374_v15, %v1360_v47 }
 0x304   : > { %v2296_v21 = vadd.f32 %v2291_v42, %v2279_v54 }
 0x305   : > { %v1410_v9 = vpop.permute.xlu0 %1409  ;;  %v2196_v25 = vadd.f32 %v5163_v7, %v2158_v12  ;;  %v2373_v48 = vpop.permute.xlu1 %2372  ;;  %v2292_v7 = vrot.slane %v2285_v56, 6  ;;  %v1416_v24 = vadd.f32 %v1412_v37, %v1378_v30 }
 0x306   : > { %v1415_v57 = vadd.f32 %v1410_v9, %v1377_v59 }
 0x307   : > { %v2238_v58 = vadd.f32 %v5183_v53, %v2196_v25  ;;  %v2293_v23 = vsel %vm1369_vm7, %v2290_v43, %v2292_v7  ;;  %v1458_v3 = vadd.f32 %v1454_v33, %v1416_v24 }
 0x309   : > { %v2329_v4 = vpop.permute.xlu0 %2328  ;;  %v2280_v1 = vadd.f32 %v2276_v41, %v2238_v58 }
 0x30a   : > { %v2334_v55 = vadd.f32 %v2329_v4, %v2296_v21  ;;  %v1496_v4 = vpop.permute.xlu1 %1495 }
 0x30b   : > { %v2297_v27 = vadd.f32 %v2293_v23, %v2280_v1  ;;  %v1500_v16 = vadd.f32 %v1496_v4, %v1458_v3 }
 0x30d   : > { %v1452_v46 = vpop.permute.xlu0 %1451  ;;  %v2335_v41 = vadd.f32 %v2331_v45, %v2297_v27 }
 0x30e   : > { %v1457_v51 = vadd.f32 %v1452_v46, %v1415_v57  ;;  %v2415_v8 = vpop.permute.xlu1 %2414 }
 0x30f   : > { %v2377_v46 = vadd.f32 %v2373_v48, %v2335_v41 }
 0x311   : > { %v2371_v63 = vpop.permute.xlu0 %2370  ;;  %v2419_v0 = vadd.f32 %v2415_v8, %v2377_v46 }
 0x312   : > { %v2376_v35 = vadd.f32 %v2371_v63, %v2334_v55 }
 0x315   : > { %v1494_v52 = vpop.permute.xlu0 %1493 }
 0x316   : > { %v1499_v38 = vadd.f32 %v1494_v52, %v1457_v51 }
 0x319   : > { %v2413_v61 = vpop.permute.xlu0 %2412 }
 0x31a   : > { %v2418_v6 = vadd.f32 %v2413_v61, %v2376_v35 }
 0x31d   : > { %v2423_v36 = vpop.permute.xlu0 %2422 }
 0x31e   : > { %v2428_v9 = vadd.f32 %v2423_v36, %v1499_v38 }
 0x321   : > { %v2433_v59 = vpop.permute.xlu0 %2432 }
 0x322   : > { %v2438_v53 = vadd.f32 %v2433_v59, %v2418_v6 }
 0x324   : > { %v2440_v62 = vadd.f32 %v2438_v53, %v2428_v9 }
 0x326   : > { %v2676_v19 = vmul.f32 -1.442695, %v2440_v62 }
 0x328   : > { %2782 = vpow2.f32 %v2676_v19 }
 0x32e   : > { %v2425_v13 = vpop.permute.xlu1 %2424 }
 0x32f   : > { %v2429_v60 = vadd.f32 %v2425_v13, %v1500_v16 }
 0x332   : > { %v2783_v50 = vpop.eup %2782  ;;  %v2435_v17 = vpop.permute.xlu1 %2434 }
 0x333   : > { %v2448_v28 = vadd.f32 1.0, %v2783_v50  ;;  %v2439_v34 = vadd.f32 %v2435_v17, %v2419_v0 }
 0x335   : > { %2784 = vrcp.f32 %v2448_v28  ;;  %v2441_v63 = vadd.f32 %v2439_v34, %v2429_v60 }
 0x337   : > { %v2677_v44 = vmul.f32 -1.442695, %v2441_v63 }
 0x339   : > { %2786 = vpow2.f32 %v2677_v44 }
 0x33f   : > { %v2785_v32 = vpop.eup %2784 }
 0x340   : > { %2455 = vst.msk [vmem:[%s187_s19] sm:$0xff] %vm2454_vm8, %v2785_v32 }
 0x343   : > { %v2787_v37 = vpop.eup %2786 }
 0x344   : > { %v2449_v45 = vadd.f32 1.0, %v2787_v37 }
 0x346   : > { %2788 = vrcp.f32 %v2449_v45 }
 0x350   : > { %v2789_v22 = vpop.eup %2788 }
 0x351   : > { %2456 = vst.msk [vmem:[%s187_s19 + $0x8] sm:$0xff] %vm2454_vm8, %v2789_v22 }
 0x352   : > { %2857 = shalt.err (!%p2854_p11)
}
 0x353   : > { %s2858_s6 = scalar_lea.hbm %s5242_s29, 256  ;;  %s2862_s3 = scalar_lea.hbm %s5295_s2, 512 }
 0x354   : > { %p2859_p13 = scmp.ne.s32.totalorder %s5242_s29, %s2858_s6  ;;  %p2863_p6 = scmp.lt.u32.totalorder %s5242_s29, %s5295_s2 }
 0x355   : > { %p2864_p9 = scmp.lt.u32.totalorder %s2862_s3, %s2858_s6  ;;  %p2866_p4 = scmp.lt.u32.totalorder %s2858_s6, %s5242_s29 }
 0x356   : > { %p2860_p7 = pnand %p2859_p13, %p5522_p8 }
 0x357   : > { %p2865_p1 = por %p2864_p9, %p2863_p6 }
 0x358   : > { %p2861_p10 = pneg %p2860_p7 }
 0x359   : > { %p2867_p2 = por %p2866_p4, %p2865_p1 }
 0x35b   : > { %p2868_p12 = pnand %p2867_p2, %p2861_p10 }
 0x35d   : > { %2871 = shalt.err (!%p2868_p12)
}
 0x35e   : > { %s2956_s27 = smov 128   ;;  %s2957_s19 = smov 8  }
 0x35f   : > { %2691 = dma.vmem_to_hbm [thread:$0]  (%p5522_p8), %s5244_s8, 256, %s5242_s29, %s2458_s4, %s2956_s27, %s2956_s27, %s2957_s19  }
 0x360 PF: > { %s2486_s16 = sand.u32 1, %s2910_s9   ;;  %p5523_p0 = scmp.ne.s32.totalorder %s5364_s20, 0 }
 0x361   : > { %p5524_p3 = scmp.ge.s32.totalorder %s2930_s14, 2  ;;  %s2487_s23 = scalar_lea.sflag [#allocation7], %s2486_s16 }
 0x363   : > { %p2702_p5 = pnand %p5524_p3, %p5523_p0 }
 0x365   : > { %2905 = dma.done.wait (!%p2702_p5), %s2487_s23, 256  }
 0x366   : > { %2907 = vsyncadd (!%p2702_p5), %s2487_s23, 4294967040  ;;  %s19_s14 = sadd.s32 1, %s2930_s14   ;;  %s5525_s9 = smov %s2914_s10 }
 0x367   : > { %p16_p11 = scmp.ge.s32.totalorder %s19_s14, 4   ;;  %s5526_s10 = smov %s2918_s11 }
 0x368   : > { %s5527_s11 = smov %s3090_s26  ;;  %s5528_s12 = smov %s2926_s13 }
 0x369   : > { %s5529_s13 = smov %s5531_s22  ;;  %18 = sbr.rel (!%p16_p11) target bundleno = 7 (0x7), region = 91 }
 0x370   :  { %2492 = vsyncpa [#allocation6], 1 }
 0x371   :  { %2494 = vsyncpa [#allocation6 + $0x1], 1 }
 0x372   :  { %2495 = vsyncpa [#allocation7], 1 }
 0x373   :  { %2497 = vsyncpa [#allocation7 + $0x1], 1 }
 0x374   :  { %2498 = vsyncpa [#allocation8], 1 }
 0x375   :  { %2500 = vsyncpa [#allocation8 + $0x1], 1 }

</bundles_post_ra>
